<compile_context>
chip_gen: v5e
topology: v5e:2x2
jax: 0.10.0
libtpu: 0.0.40
codegen_flags: <defaults>
</compile_context>

<pallas_src>
import functools

import jax
import jax.numpy as jnp
import numpy as np
from jax import lax
from jax.experimental import pallas as pl
from jax.experimental.pallas import tpu as pltpu


# ----------------------------- Pallas kernel ------------------------------- #

def _bottleneck_kernel(x_ref, w1_ref, b1_ref, w2_ref, b2_ref, w3_ref, b3_ref,
                       o_ref, xp_ref, *, W, pad):
    """Fused Bottleneck for a block of Bt images; activations are (Bt, H*W, C)."""
    Bt, HW, Cin = x_ref.shape
    fp = w1_ref.shape[1]
    M = Bt * HW

    # ---- conv1 (1x1, bn1 scale folded into w1) + shift + relu ----------------
    x2d = x_ref[...].reshape(M, Cin)                                # bf16
    y1 = jnp.dot(x2d, w1_ref[...], preferred_element_type=jnp.float32)
    y1 = jnp.maximum(y1 + b1_ref[...], 0.0)                         # (M, fp) f32

    # ---- conv2 (3x3, stride 1, pad 1) ----------------------------------------
    # Per-image zero-halo scratch: tap (dy, dx) is a shift of (dy-1)*W + (dx-1)
    # along the flattened spatial axis.  Only the halo slabs are zeroed (the
    # interior is fully overwritten every step); this is done every step, not
    # under pl.when(step == 0), because the scratch is per-core under megacore.
    halo = jnp.zeros((Bt, pad, fp), jnp.float32)
    xp_ref[:, :pad, :] = halo
    xp_ref[:, pad + HW:, :] = halo
    xp_ref[:, pad:pad + HW, :] = y1.reshape(Bt, HW, fp)

    # Horizontal-edge masks from an in-kernel iota (vertical edges land in the
    # zero halo).  Taps reading column w-1 are invalid at w == 0; taps reading
    # column w+1 are invalid at w == W-1.
    pos = lax.broadcasted_iota(jnp.int32, (HW, 1), 0)
    if (W & (W - 1)) == 0:
        col = jnp.bitwise_and(pos, W - 1)
    else:
        col = pos % W  # TODO(synk): validate vector i32 rem lowering, non-pow2 W
    not_left = col != 0
    not_right = col != (W - 1)

    w2 = w2_ref[...]                                                # (9, fp, width)
    acc = None
    for dy in range(3):
        for dx in range(3):
            shift = (dy - 1) * W + (dx - 1)
            patch = xp_ref[:, pad + shift:pad + shift + HW, :]      # (Bt, HW, fp)
            if dx == 0:
                patch = jnp.where(not_left, patch, 0.0)
            elif dx == 2:
                patch = jnp.where(not_right, patch, 0.0)
            part = jnp.dot(patch.astype(jnp.bfloat16).reshape(M, fp),
                           w2[dy * 3 + dx],
                           preferred_element_type=jnp.float32)
            acc = part if acc is None else acc + part
    y2 = jnp.maximum(acc + b2_ref[...], 0.0)                        # (M, width) f32

    # ---- conv3 (1x1) + shift + residual add + relu ---------------------------
    y3 = jnp.dot(y2.astype(jnp.bfloat16), w3_ref[...],
                 preferred_element_type=jnp.float32)
    # Re-read the input here (instead of keeping it live across both matmul
    # phases) to shrink vreg pressure.
    res = x_ref[...].reshape(M, Cin).astype(jnp.float32)
    y3 = jnp.maximum(y3 + b3_ref[...] + res, 0.0)
    o_ref[...] = y3.reshape(Bt, HW, -1).astype(o_ref.dtype)


# ------------------------------- Wrapper ------------------------------------ #

def _fold_bn(bn, eps=1e-5):
    gamma, beta, mean, var = bn
    scale = gamma * lax.rsqrt(var + eps)
    shift = beta - mean * scale
    return scale.astype(jnp.float32), shift.astype(jnp.float32)


def _round_up(x, m):
    return ((x + m - 1) // m) * m


def _pick_batch_tile(n, hw, target_rows=1024):
    """Images per grid step: enough rows to amortize the ~0.35us per-step
    overhead (target ~512-1024 rows), while preferring an even, >=2-long grid
    so both v7x TensorCores get work when the batch allows it."""
    fit = [d for d in range(1, n + 1)
           if n % d == 0 and d * hw <= max(target_rows, hw)]
    best = max(fit)
    even = [d for d in fit if (n // d) % 2 == 0 and 2 * d * hw >= best * hw]
    return max(even) if even else best


def _padded_bytes(shape, dtype):
    """Rough VMEM footprint of `shape` with (sublane, lane) tile padding."""
    itemsize = jnp.dtype(dtype).itemsize
    sub_tile = 8 * max(1, 4 // itemsize)
    lead = int(np.prod(shape[:-2])) if len(shape) > 2 else 1
    sub = shape[-2] if len(shape) >= 2 else 1
    lane = shape[-1]
    return lead * _round_up(sub, sub_tile) * _round_up(lane, 128) * itemsize


def bottleneck_forward(x_nchw, params):
    """Forward pass of Bottleneck (inference-mode BN).  Returns bf16 NCHW."""
    N, Cin, H, W = x_nchw.shape
    HW = H * W

    w1 = params["w1"]            # (first_planes, inplanes, 1, 1)  torch OIHW
    w2 = params["w2"]            # (width, first_planes, 3, 3)
    w3 = params["w3"]            # (outplanes, width, 1, 1)
    fp, width, outp = w1.shape[0], w2.shape[0], w3.shape[0]
    assert Cin == outp, "identity residual needs inplanes == planes*expansion"

    s1, b1 = _fold_bn(params["bn1"])
    s2, b2 = _fold_bn(params["bn2"])
    s3, b3 = _fold_bn(params["bn3"])

    # BN scales folded into bf16 weights laid out for (rows, C) @ (C, C') dots.
    w1_k = (jnp.transpose(w1.reshape(fp, Cin)) * s1[None, :]).astype(jnp.bfloat16)
    w2_k = (jnp.transpose(w2, (2, 3, 1, 0)).reshape(9, fp, width)
            * s2[None, None, :]).astype(jnp.bfloat16)
    w3_k = (jnp.transpose(w3.reshape(outp, width)) * s3[None, :]).astype(jnp.bfloat16)
    b1_k, b2_k, b3_k = b1[None, :], b2[None, :], b3[None, :]

    # NCHW -> (N, H*W, C) bf16 (XLA fuses the transpose and cast into one pass).
    x_k = jnp.transpose(x_nchw, (0, 2, 3, 1)).reshape(N, HW, Cin).astype(jnp.bfloat16)

    Bt = _pick_batch_tile(N, HW)
    pad = _round_up(W + 1, 8)            # zero halo for the +-(W+1) tap shifts

    kernel = functools.partial(_bottleneck_kernel, W=W, pad=pad)

    def const2(shape):
        return pl.BlockSpec(shape, lambda n: (0, 0))

    def const3(shape):
        return pl.BlockSpec(shape, lambda n: (0, 0, 0))

    # Explicit VMEM budget: double-buffered activation blocks + constants + the
    # f32 conv2 scratch, with headroom, capped well under v7x's 64 MiB.
    est = (2 * _padded_bytes((Bt, HW, Cin), jnp.bfloat16)
           + 2 * _padded_bytes((Bt, HW, outp), jnp.bfloat16)
           + 2 * (_padded_bytes((Cin, fp), jnp.bfloat16)
                  + _padded_bytes((9, fp, width), jnp.bfloat16)
                  + _padded_bytes((width, outp), jnp.bfloat16)
                  + _padded_bytes((1, fp), jnp.float32)
                  + _padded_bytes((1, width), jnp.float32)
                  + _padded_bytes((1, outp), jnp.float32))
           + _padded_bytes((Bt, HW + 2 * pad, fp), jnp.float32))
    vmem_limit = int(min(max(4 * est, 16 * 2 ** 20), 48 * 2 ** 20))

    out = pl.pallas_call(
        kernel,
        out_shape=jax.ShapeDtypeStruct((N, HW, outp), jnp.bfloat16),
        grid_spec=pltpu.PrefetchScalarGridSpec(
            num_scalar_prefetch=0,
            grid=(N // Bt,),
            in_specs=[
                pl.BlockSpec((Bt, HW, Cin), lambda n: (n, 0, 0)),      # x
                const2((Cin, fp)), const2((1, fp)),                    # conv1 / bn1
                const3((9, fp, width)), const2((1, width)),            # conv2 / bn2
                const2((width, outp)), const2((1, outp)),              # conv3 / bn3
            ],
            out_specs=pl.BlockSpec((Bt, HW, outp), lambda n: (n, 0, 0)),
            scratch_shapes=[pltpu.VMEM((Bt, HW + 2 * pad, fp), jnp.float32)],
        ),
        compiler_params=pltpu.CompilerParams(
            dimension_semantics=("parallel",),
            vmem_limit_bytes=vmem_limit),
    )(x_k, w1_k, b1_k, w2_k, b2_k, w3_k, b3_k)

    # (N, H*W, Cout) -> NCHW (reshape is free; transpose is one XLA pass).
    return jnp.transpose(out.reshape(N, H, W, outp), (0, 3, 1, 2))


# ------------------------------ Reference ----------------------------------- #

def bottleneck_reference(x_nchw, params, eps=1e-5):
    """Pure-JAX reference (inference-mode BN, scales folded into bf16 weights
    at the same points as the kernel; fp32 accumulation)."""
    dn = ("NCHW", "OIHW", "NCHW")

    def folded(w, bn):
        s, b = _fold_bn(bn, eps)
        return ((w * s[:, None, None, None]).astype(jnp.bfloat16),
                b[None, :, None, None])

    w1, b1 = folded(params["w1"], params["bn1"])
    w2, b2 = folded(params["w2"], params["bn2"])
    w3, b3 = folded(params["w3"], params["bn3"])

    x = x_nchw.astype(jnp.bfloat16)
    y = lax.conv_general_dilated(x, w1, (1, 1), "VALID", dimension_numbers=dn,
                                 preferred_element_type=jnp.float32)
    y = jax.nn.relu(y + b1).astype(jnp.bfloat16)
    y = lax.conv_general_dilated(y, w2, (1, 1), ((1, 1), (1, 1)),
                                 dimension_numbers=dn,
                                 preferred_element_type=jnp.float32)
    y = jax.nn.relu(y + b2).astype(jnp.bfloat16)
    y = lax.conv_general_dilated(y, w3, (1, 1), "VALID", dimension_numbers=dn,
                                 preferred_element_type=jnp.float32)
    y = y + b3 + x.astype(jnp.float32)
    return jax.nn.relu(y)


# --------------------------------- Main -------------------------------------- #

if __name__ == "__main__":
    # Module config: inplanes=16, planes=4 -> width=4, first_planes=4,
    # outplanes=16 (downsample=None requires inplanes == planes * expansion).
    N, inplanes, planes, H, W = 2, 16, 4, 16, 16
    cardinality, reduce_first = 1, 1
    width = planes * cardinality
    first_planes = width // reduce_first
    outplanes = planes * 4

    key = jax.random.PRNGKey(0)
    keys = jax.random.split(key, 8)

    def bn_params(k, c):
        k1, k2, k3, k4 = jax.random.split(k, 4)
        gamma = 1.0 + 0.1 * jax.random.normal(k1, (c,), jnp.float32)
        beta = 0.1 * jax.random.normal(k2, (c,), jnp.float32)
        mean = 0.1 * jax.random.normal(k3, (c,), jnp.float32)
        var = jnp.abs(jax.random.normal(k4, (c,), jnp.float32)) + 0.5
        return (gamma, beta, mean, var)

    params = {
        "w1": 0.1 * jax.random.normal(keys[0], (first_planes, inplanes, 1, 1), jnp.float32),
        "bn1": bn_params(keys[1], first_planes),
        "w2": 0.1 * jax.random.normal(keys[2], (width, first_planes, 3, 3), jnp.float32),
        "bn2": bn_params(keys[3], width),
        "w3": 0.1 * jax.random.normal(keys[4], (outplanes, width, 1, 1), jnp.float32),
        "bn3": bn_params(keys[5], outplanes),
    }

    x = jax.random.normal(keys[6], (N, inplanes, H, W), jnp.float32)

    out = jax.block_until_ready(jax.jit(bottleneck_forward)(x, params))
    ref = jax.block_until_ready(jax.jit(bottleneck_reference)(x, params))

    np.testing.assert_allclose(np.asarray(out.astype(jnp.float32)),
                               np.asarray(ref), rtol=2e-2, atol=2e-2)
    print("KERNEL_OK")
</pallas_src>

<mosaic_0001>
module attributes {stable_mosaic.version = 11 : i64} {
  func.func @_bottleneck_kernel(%arg0: i32, %arg1: memref<1x256x16xbf16, #tpu.memory_space<vmem>>, %arg2: memref<16x4xbf16, #tpu.memory_space<vmem>>, %arg3: memref<1x4xf32, #tpu.memory_space<vmem>>, %arg4: memref<9x4x4xbf16, #tpu.memory_space<vmem>>, %arg5: memref<1x4xf32, #tpu.memory_space<vmem>>, %arg6: memref<4x16xbf16, #tpu.memory_space<vmem>>, %arg7: memref<1x16xf32, #tpu.memory_space<vmem>>, %arg8: memref<1x256x16xbf16, #tpu.memory_space<vmem>>, %arg9: memref<1x304x4xf32, #tpu.memory_space<vmem>>) attributes {dimension_semantics = [#tpu.dimension_semantics<parallel>], iteration_bounds = array<i64: 2>, scalar_prefetch = 0 : i64, scratch_operands = 1 : i64, tpu.core_type = #tpu.core_type<tc>, window_params = [{transform_indices = @transform_0, window_bounds = array<i64: 1, 256, 16>}, {pipeline_mode = #tpu.pipeline_mode<synchronous>, transform_indices = @transform_1, window_bounds = array<i64: 16, 4>}, {pipeline_mode = #tpu.pipeline_mode<synchronous>, transform_indices = @transform_2, window_bounds = array<i64: 1, 4>}, {pipeline_mode = #tpu.pipeline_mode<synchronous>, transform_indices = @transform_3, window_bounds = array<i64: 9, 4, 4>}, {pipeline_mode = #tpu.pipeline_mode<synchronous>, transform_indices = @transform_4, window_bounds = array<i64: 1, 4>}, {pipeline_mode = #tpu.pipeline_mode<synchronous>, transform_indices = @transform_5, window_bounds = array<i64: 4, 16>}, {pipeline_mode = #tpu.pipeline_mode<synchronous>, transform_indices = @transform_6, window_bounds = array<i64: 1, 16>}, {transform_indices = @transform_7, window_bounds = array<i64: 1, 256, 16>}]} {
    %c0 = arith.constant 0 : index
    %c0_0 = arith.constant 0 : index
    %c0_1 = arith.constant 0 : index
    %0 = vector.load %arg1[%c0, %c0_0, %c0_1] : memref<1x256x16xbf16, #tpu.memory_space<vmem>>, vector<1x256x16xbf16>
    %1 = vector.shape_cast %0 : vector<1x256x16xbf16> to vector<256x16xbf16>
    %c0_2 = arith.constant 0 : index
    %c0_3 = arith.constant 0 : index
    %2 = vector.load %arg2[%c0_2, %c0_3] : memref<16x4xbf16, #tpu.memory_space<vmem>>, vector<16x4xbf16>
    %cst = arith.constant dense<0.000000e+00> : vector<256x4xf32>
    %3 = tpu.matmul %1, %2, %cst {dimension_numbers = #tpu.dot_dimension_numbers<[1], [0], [0], [1], [0, 0, 1, 1], [], []>} : vector<256x16xbf16>, vector<16x4xbf16>, vector<256x4xf32> -> vector<256x4xf32>
    %c0_4 = arith.constant 0 : index
    %c0_5 = arith.constant 0 : index
    %4 = vector.load %arg3[%c0_4, %c0_5] : memref<1x4xf32, #tpu.memory_space<vmem>>, vector<1x4xf32>
    %5 = vector.broadcast %4 : vector<1x4xf32> to vector<256x4xf32>
    %6 = arith.addf %3, %5 : vector<256x4xf32>
    %cst_6 = arith.constant 0.000000e+00 : f32
    %7 = vector.broadcast %cst_6 : f32 to vector<256x4xf32>
    %8 = arith.maximumf %6, %7 : vector<256x4xf32>
    %cst_7 = arith.constant 0.000000e+00 : f32
    %9 = vector.broadcast %cst_7 : f32 to vector<1x24x4xf32>
    %c0_8 = arith.constant 0 : index
    %c0_9 = arith.constant 0 : index
    %c0_10 = arith.constant 0 : index
    %10 = vector.load %arg9[%c0_8, %c0_9, %c0_10] : memref<1x304x4xf32, #tpu.memory_space<vmem>>, vector<1x24x4xf32>
    tpu.vector_store %arg9[%c0_8, %c0_9, %c0_10], %9 {strides = array<i32>} : memref<1x304x4xf32, #tpu.memory_space<vmem>>, vector<1x24x4xf32>,
    %c0_11 = arith.constant 0 : index
    %c280 = arith.constant 280 : index
    %c0_12 = arith.constant 0 : index
    %11 = vector.load %arg9[%c0_11, %c280, %c0_12] : memref<1x304x4xf32, #tpu.memory_space<vmem>>, vector<1x24x4xf32>
    tpu.vector_store %arg9[%c0_11, %c280, %c0_12], %9 {strides = array<i32>} : memref<1x304x4xf32, #tpu.memory_space<vmem>>, vector<1x24x4xf32>,
    %12 = vector.shape_cast %8 : vector<256x4xf32> to vector<1x256x4xf32>
    %c0_13 = arith.constant 0 : index
    %c24 = arith.constant 24 : index
    %c0_14 = arith.constant 0 : index
    %13 = vector.load %arg9[%c0_13, %c24, %c0_14] : memref<1x304x4xf32, #tpu.memory_space<vmem>>, vector<1x256x4xf32>
    tpu.vector_store %arg9[%c0_13, %c24, %c0_14], %12 {strides = array<i32>} : memref<1x304x4xf32, #tpu.memory_space<vmem>>, vector<1x256x4xf32>,
    %14 = tpu.iota {dimensions = array<i32: 0>} : vector<256x1xi32>
    %c15_i32 = arith.constant 15 : i32
    %15 = vector.broadcast %c15_i32 : i32 to vector<256x1xi32>
    %16 = arith.andi %14, %15 : vector<256x1xi32>
    %c0_i32 = arith.constant 0 : i32
    %17 = vector.broadcast %c0_i32 : i32 to vector<256x1xi32>
    %18 = arith.cmpi ne, %16, %17 : vector<256x1xi32>
    %c15_i32_15 = arith.constant 15 : i32
    %19 = vector.broadcast %c15_i32_15 : i32 to vector<256x1xi32>
    %20 = arith.cmpi ne, %16, %19 : vector<256x1xi32>
    %c0_16 = arith.constant 0 : index
    %c0_17 = arith.constant 0 : index
    %c0_18 = arith.constant 0 : index
    %21 = vector.load %arg4[%c0_16, %c0_17, %c0_18] : memref<9x4x4xbf16, #tpu.memory_space<vmem>>, vector<9x4x4xbf16>
    %c0_19 = arith.constant 0 : index
    %c7 = arith.constant 7 : index
    %c0_20 = arith.constant 0 : index
    %22 = vector.load %arg9[%c0_19, %c7, %c0_20] : memref<1x304x4xf32, #tpu.memory_space<vmem>>, vector<1x256x4xf32>
    %cst_21 = arith.constant 0.000000e+00 : f32
    %23 = vector.shape_cast %18 : vector<256x1xi1> to vector<1x256x1xi1>
    %24 = vector.broadcast %23 : vector<1x256x1xi1> to vector<1x256x4xi1>
    %25 = vector.broadcast %cst_21 : f32 to vector<1x256x4xf32>
    %26 = arith.select %24, %22, %25 : vector<1x256x4xi1>, vector<1x256x4xf32>
    %27 = arith.truncf %26 : vector<1x256x4xf32> to vector<1x256x4xbf16>
    %28 = vector.shape_cast %27 : vector<1x256x4xbf16> to vector<256x4xbf16>
    %29 = vector.extract_strided_slice %21 {offsets = [0, 0, 0], sizes = [1, 4, 4], strides = [1, 1, 1]} : vector<9x4x4xbf16> to vector<1x4x4xbf16>
    %30 = vector.shape_cast %29 : vector<1x4x4xbf16> to vector<4x4xbf16>
    %cst_22 = arith.constant dense<0.000000e+00> : vector<256x4xf32>
    %31 = tpu.matmul %28, %30, %cst_22 {dimension_numbers = #tpu.dot_dimension_numbers<[1], [0], [0], [1], [0, 0, 1, 1], [], []>} : vector<256x4xbf16>, vector<4x4xbf16>, vector<256x4xf32> -> vector<256x4xf32>
    %c0_23 = arith.constant 0 : index
    %c8 = arith.constant 8 : index
    %c0_24 = arith.constant 0 : index
    %32 = vector.load %arg9[%c0_23, %c8, %c0_24] : memref<1x304x4xf32, #tpu.memory_space<vmem>>, vector<1x256x4xf32>
    %33 = arith.truncf %32 : vector<1x256x4xf32> to vector<1x256x4xbf16>
    %34 = vector.shape_cast %33 : vector<1x256x4xbf16> to vector<256x4xbf16>
    %35 = vector.extract_strided_slice %21 {offsets = [1, 0, 0], sizes = [1, 4, 4], strides = [1, 1, 1]} : vector<9x4x4xbf16> to vector<1x4x4xbf16>
    %36 = vector.shape_cast %35 : vector<1x4x4xbf16> to vector<4x4xbf16>
    %cst_25 = arith.constant dense<0.000000e+00> : vector<256x4xf32>
    %37 = tpu.matmul %34, %36, %cst_25 {dimension_numbers = #tpu.dot_dimension_numbers<[1], [0], [0], [1], [0, 0, 1, 1], [], []>} : vector<256x4xbf16>, vector<4x4xbf16>, vector<256x4xf32> -> vector<256x4xf32>
    %38 = arith.addf %31, %37 : vector<256x4xf32>
    %c0_26 = arith.constant 0 : index
    %c9 = arith.constant 9 : index
    %c0_27 = arith.constant 0 : index
    %39 = vector.load %arg9[%c0_26, %c9, %c0_27] : memref<1x304x4xf32, #tpu.memory_space<vmem>>, vector<1x256x4xf32>
    %cst_28 = arith.constant 0.000000e+00 : f32
    %40 = vector.shape_cast %20 : vector<256x1xi1> to vector<1x256x1xi1>
    %41 = vector.broadcast %40 : vector<1x256x1xi1> to vector<1x256x4xi1>
    %42 = vector.broadcast %cst_28 : f32 to vector<1x256x4xf32>
    %43 = arith.select %41, %39, %42 : vector<1x256x4xi1>, vector<1x256x4xf32>
    %44 = arith.truncf %43 : vector<1x256x4xf32> to vector<1x256x4xbf16>
    %45 = vector.shape_cast %44 : vector<1x256x4xbf16> to vector<256x4xbf16>
    %46 = vector.extract_strided_slice %21 {offsets = [2, 0, 0], sizes = [1, 4, 4], strides = [1, 1, 1]} : vector<9x4x4xbf16> to vector<1x4x4xbf16>
    %47 = vector.shape_cast %46 : vector<1x4x4xbf16> to vector<4x4xbf16>
    %cst_29 = arith.constant dense<0.000000e+00> : vector<256x4xf32>
    %48 = tpu.matmul %45, %47, %cst_29 {dimension_numbers = #tpu.dot_dimension_numbers<[1], [0], [0], [1], [0, 0, 1, 1], [], []>} : vector<256x4xbf16>, vector<4x4xbf16>, vector<256x4xf32> -> vector<256x4xf32>
    %49 = arith.addf %38, %48 : vector<256x4xf32>
    %c0_30 = arith.constant 0 : index
    %c23 = arith.constant 23 : index
    %c0_31 = arith.constant 0 : index
    %50 = vector.load %arg9[%c0_30, %c23, %c0_31] : memref<1x304x4xf32, #tpu.memory_space<vmem>>, vector<1x256x4xf32>
    %cst_32 = arith.constant 0.000000e+00 : f32
    %51 = vector.shape_cast %18 : vector<256x1xi1> to vector<1x256x1xi1>
    %52 = vector.broadcast %51 : vector<1x256x1xi1> to vector<1x256x4xi1>
    %53 = vector.broadcast %cst_32 : f32 to vector<1x256x4xf32>
    %54 = arith.select %52, %50, %53 : vector<1x256x4xi1>, vector<1x256x4xf32>
    %55 = arith.truncf %54 : vector<1x256x4xf32> to vector<1x256x4xbf16>
    %56 = vector.shape_cast %55 : vector<1x256x4xbf16> to vector<256x4xbf16>
    %57 = vector.extract_strided_slice %21 {offsets = [3, 0, 0], sizes = [1, 4, 4], strides = [1, 1, 1]} : vector<9x4x4xbf16> to vector<1x4x4xbf16>
    %58 = vector.shape_cast %57 : vector<1x4x4xbf16> to vector<4x4xbf16>
    %cst_33 = arith.constant dense<0.000000e+00> : vector<256x4xf32>
    %59 = tpu.matmul %56, %58, %cst_33 {dimension_numbers = #tpu.dot_dimension_numbers<[1], [0], [0], [1], [0, 0, 1, 1], [], []>} : vector<256x4xbf16>, vector<4x4xbf16>, vector<256x4xf32> -> vector<256x4xf32>
    %60 = arith.addf %49, %59 : vector<256x4xf32>
    %c0_34 = arith.constant 0 : index
    %c24_35 = arith.constant 24 : index
    %c0_36 = arith.constant 0 : index
    %61 = vector.load %arg9[%c0_34, %c24_35, %c0_36] : memref<1x304x4xf32, #tpu.memory_space<vmem>>, vector<1x256x4xf32>
    %62 = arith.truncf %61 : vector<1x256x4xf32> to vector<1x256x4xbf16>
    %63 = vector.shape_cast %62 : vector<1x256x4xbf16> to vector<256x4xbf16>
    %64 = vector.extract_strided_slice %21 {offsets = [4, 0, 0], sizes = [1, 4, 4], strides = [1, 1, 1]} : vector<9x4x4xbf16> to vector<1x4x4xbf16>
    %65 = vector.shape_cast %64 : vector<1x4x4xbf16> to vector<4x4xbf16>
    %cst_37 = arith.constant dense<0.000000e+00> : vector<256x4xf32>
    %66 = tpu.matmul %63, %65, %cst_37 {dimension_numbers = #tpu.dot_dimension_numbers<[1], [0], [0], [1], [0, 0, 1, 1], [], []>} : vector<256x4xbf16>, vector<4x4xbf16>, vector<256x4xf32> -> vector<256x4xf32>
    %67 = arith.addf %60, %66 : vector<256x4xf32>
    %c0_38 = arith.constant 0 : index
    %c25 = arith.constant 25 : index
    %c0_39 = arith.constant 0 : index
    %68 = vector.load %arg9[%c0_38, %c25, %c0_39] : memref<1x304x4xf32, #tpu.memory_space<vmem>>, vector<1x256x4xf32>
    %cst_40 = arith.constant 0.000000e+00 : f32
    %69 = vector.shape_cast %20 : vector<256x1xi1> to vector<1x256x1xi1>
    %70 = vector.broadcast %69 : vector<1x256x1xi1> to vector<1x256x4xi1>
    %71 = vector.broadcast %cst_40 : f32 to vector<1x256x4xf32>
    %72 = arith.select %70, %68, %71 : vector<1x256x4xi1>, vector<1x256x4xf32>
    %73 = arith.truncf %72 : vector<1x256x4xf32> to vector<1x256x4xbf16>
    %74 = vector.shape_cast %73 : vector<1x256x4xbf16> to vector<256x4xbf16>
    %75 = vector.extract_strided_slice %21 {offsets = [5, 0, 0], sizes = [1, 4, 4], strides = [1, 1, 1]} : vector<9x4x4xbf16> to vector<1x4x4xbf16>
    %76 = vector.shape_cast %75 : vector<1x4x4xbf16> to vector<4x4xbf16>
    %cst_41 = arith.constant dense<0.000000e+00> : vector<256x4xf32>
    %77 = tpu.matmul %74, %76, %cst_41 {dimension_numbers = #tpu.dot_dimension_numbers<[1], [0], [0], [1], [0, 0, 1, 1], [], []>} : vector<256x4xbf16>, vector<4x4xbf16>, vector<256x4xf32> -> vector<256x4xf32>
    %78 = arith.addf %67, %77 : vector<256x4xf32>
    %c0_42 = arith.constant 0 : index
    %c39 = arith.constant 39 : index
    %c0_43 = arith.constant 0 : index
    %79 = vector.load %arg9[%c0_42, %c39, %c0_43] : memref<1x304x4xf32, #tpu.memory_space<vmem>>, vector<1x256x4xf32>
    %cst_44 = arith.constant 0.000000e+00 : f32
    %80 = vector.shape_cast %18 : vector<256x1xi1> to vector<1x256x1xi1>
    %81 = vector.broadcast %80 : vector<1x256x1xi1> to vector<1x256x4xi1>
    %82 = vector.broadcast %cst_44 : f32 to vector<1x256x4xf32>
    %83 = arith.select %81, %79, %82 : vector<1x256x4xi1>, vector<1x256x4xf32>
    %84 = arith.truncf %83 : vector<1x256x4xf32> to vector<1x256x4xbf16>
    %85 = vector.shape_cast %84 : vector<1x256x4xbf16> to vector<256x4xbf16>
    %86 = vector.extract_strided_slice %21 {offsets = [6, 0, 0], sizes = [1, 4, 4], strides = [1, 1, 1]} : vector<9x4x4xbf16> to vector<1x4x4xbf16>
    %87 = vector.shape_cast %86 : vector<1x4x4xbf16> to vector<4x4xbf16>
    %cst_45 = arith.constant dense<0.000000e+00> : vector<256x4xf32>
    %88 = tpu.matmul %85, %87, %cst_45 {dimension_numbers = #tpu.dot_dimension_numbers<[1], [0], [0], [1], [0, 0, 1, 1], [], []>} : vector<256x4xbf16>, vector<4x4xbf16>, vector<256x4xf32> -> vector<256x4xf32>
    %89 = arith.addf %78, %88 : vector<256x4xf32>
    %c0_46 = arith.constant 0 : index
    %c40 = arith.constant 40 : index
    %c0_47 = arith.constant 0 : index
    %90 = vector.load %arg9[%c0_46, %c40, %c0_47] : memref<1x304x4xf32, #tpu.memory_space<vmem>>, vector<1x256x4xf32>
    %91 = arith.truncf %90 : vector<1x256x4xf32> to vector<1x256x4xbf16>
    %92 = vector.shape_cast %91 : vector<1x256x4xbf16> to vector<256x4xbf16>
    %93 = vector.extract_strided_slice %21 {offsets = [7, 0, 0], sizes = [1, 4, 4], strides = [1, 1, 1]} : vector<9x4x4xbf16> to vector<1x4x4xbf16>
    %94 = vector.shape_cast %93 : vector<1x4x4xbf16> to vector<4x4xbf16>
    %cst_48 = arith.constant dense<0.000000e+00> : vector<256x4xf32>
    %95 = tpu.matmul %92, %94, %cst_48 {dimension_numbers = #tpu.dot_dimension_numbers<[1], [0], [0], [1], [0, 0, 1, 1], [], []>} : vector<256x4xbf16>, vector<4x4xbf16>, vector<256x4xf32> -> vector<256x4xf32>
    %96 = arith.addf %89, %95 : vector<256x4xf32>
    %c0_49 = arith.constant 0 : index
    %c41 = arith.constant 41 : index
    %c0_50 = arith.constant 0 : index
    %97 = vector.load %arg9[%c0_49, %c41, %c0_50] : memref<1x304x4xf32, #tpu.memory_space<vmem>>, vector<1x256x4xf32>
    %cst_51 = arith.constant 0.000000e+00 : f32
    %98 = vector.shape_cast %20 : vector<256x1xi1> to vector<1x256x1xi1>
    %99 = vector.broadcast %98 : vector<1x256x1xi1> to vector<1x256x4xi1>
    %100 = vector.broadcast %cst_51 : f32 to vector<1x256x4xf32>
    %101 = arith.select %99, %97, %100 : vector<1x256x4xi1>, vector<1x256x4xf32>
    %102 = arith.truncf %101 : vector<1x256x4xf32> to vector<1x256x4xbf16>
    %103 = vector.shape_cast %102 : vector<1x256x4xbf16> to vector<256x4xbf16>
    %104 = vector.extract_strided_slice %21 {offsets = [8, 0, 0], sizes = [1, 4, 4], strides = [1, 1, 1]} : vector<9x4x4xbf16> to vector<1x4x4xbf16>
    %105 = vector.shape_cast %104 : vector<1x4x4xbf16> to vector<4x4xbf16>
    %cst_52 = arith.constant dense<0.000000e+00> : vector<256x4xf32>
    %106 = tpu.matmul %103, %105, %cst_52 {dimension_numbers = #tpu.dot_dimension_numbers<[1], [0], [0], [1], [0, 0, 1, 1], [], []>} : vector<256x4xbf16>, vector<4x4xbf16>, vector<256x4xf32> -> vector<256x4xf32>
    %107 = arith.addf %96, %106 : vector<256x4xf32>
    %c0_53 = arith.constant 0 : index
    %c0_54 = arith.constant 0 : index
    %108 = vector.load %arg5[%c0_53, %c0_54] : memref<1x4xf32, #tpu.memory_space<vmem>>, vector<1x4xf32>
    %109 = vector.broadcast %108 : vector<1x4xf32> to vector<256x4xf32>
    %110 = arith.addf %107, %109 : vector<256x4xf32>
    %cst_55 = arith.constant 0.000000e+00 : f32
    %111 = vector.broadcast %cst_55 : f32 to vector<256x4xf32>
    %112 = arith.maximumf %110, %111 : vector<256x4xf32>
    %113 = arith.truncf %112 : vector<256x4xf32> to vector<256x4xbf16>
    %c0_56 = arith.constant 0 : index
    %c0_57 = arith.constant 0 : index
    %114 = vector.load %arg6[%c0_56, %c0_57] : memref<4x16xbf16, #tpu.memory_space<vmem>>, vector<4x16xbf16>
    %cst_58 = arith.constant dense<0.000000e+00> : vector<256x16xf32>
    %115 = tpu.matmul %113, %114, %cst_58 {dimension_numbers = #tpu.dot_dimension_numbers<[1], [0], [0], [1], [0, 0, 1, 1], [], []>} : vector<256x4xbf16>, vector<4x16xbf16>, vector<256x16xf32> -> vector<256x16xf32>
    %c0_59 = arith.constant 0 : index
    %c0_60 = arith.constant 0 : index
    %c0_61 = arith.constant 0 : index
    %116 = vector.load %arg1[%c0_59, %c0_60, %c0_61] : memref<1x256x16xbf16, #tpu.memory_space<vmem>>, vector<1x256x16xbf16>
    %117 = vector.shape_cast %116 : vector<1x256x16xbf16> to vector<256x16xbf16>
    %118 = arith.extf %117 : vector<256x16xbf16> to vector<256x16xf32>
    %c0_62 = arith.constant 0 : index
    %c0_63 = arith.constant 0 : index
    %119 = vector.load %arg7[%c0_62, %c0_63] : memref<1x16xf32, #tpu.memory_space<vmem>>, vector<1x16xf32>
    %120 = vector.broadcast %119 : vector<1x16xf32> to vector<256x16xf32>
    %121 = arith.addf %115, %120 : vector<256x16xf32>
    %122 = arith.addf %121, %118 : vector<256x16xf32>
    %cst_64 = arith.constant 0.000000e+00 : f32
    %123 = vector.broadcast %cst_64 : f32 to vector<256x16xf32>
    %124 = arith.maximumf %122, %123 : vector<256x16xf32>
    %125 = vector.shape_cast %124 : vector<256x16xf32> to vector<1x256x16xf32>
    %126 = arith.truncf %125 : vector<1x256x16xf32> to vector<1x256x16xbf16>
    %c0_65 = arith.constant 0 : index
    %c0_66 = arith.constant 0 : index
    %c0_67 = arith.constant 0 : index
    %127 = vector.load %arg8[%c0_65, %c0_66, %c0_67] : memref<1x256x16xbf16, #tpu.memory_space<vmem>>, vector<1x256x16xbf16>
    tpu.vector_store %arg8[%c0_65, %c0_66, %c0_67], %126 {strides = array<i32>} : memref<1x256x16xbf16, #tpu.memory_space<vmem>>, vector<1x256x16xbf16>,
    return
  }
  func.func @transform_0(%arg0: i32) -> (i32, i32, i32) {
    %c0_i32 = arith.constant 0 : i32
    %c0_i32_0 = arith.constant 0 : i32
    %c0_i32_1 = arith.constant 0 : i32
    return %arg0, %c0_i32, %c0_i32_0 : i32, i32, i32
  }
  func.func @transform_1(%arg0: i32) -> (i32, i32) {
    %c0_i32 = arith.constant 0 : i32
    %c0_i32_0 = arith.constant 0 : i32
    %c0_i32_1 = arith.constant 0 : i32
    return %c0_i32, %c0_i32_0 : i32, i32
  }
  func.func @transform_2(%arg0: i32) -> (i32, i32) {
    %c0_i32 = arith.constant 0 : i32
    %c0_i32_0 = arith.constant 0 : i32
    %c0_i32_1 = arith.constant 0 : i32
    return %c0_i32, %c0_i32_0 : i32, i32
  }
  func.func @transform_3(%arg0: i32) -> (i32, i32, i32) {
    %c0_i32 = arith.constant 0 : i32
    %c0_i32_0 = arith.constant 0 : i32
    %c0_i32_1 = arith.constant 0 : i32
    %c0_i32_2 = arith.constant 0 : i32
    return %c0_i32, %c0_i32_0, %c0_i32_1 : i32, i32, i32
  }
  func.func @transform_4(%arg0: i32) -> (i32, i32) {
    %c0_i32 = arith.constant 0 : i32
    %c0_i32_0 = arith.constant 0 : i32
    %c0_i32_1 = arith.constant 0 : i32
    return %c0_i32, %c0_i32_0 : i32, i32
  }
  func.func @transform_5(%arg0: i32) -> (i32, i32) {
    %c0_i32 = arith.constant 0 : i32
    %c0_i32_0 = arith.constant 0 : i32
    %c0_i32_1 = arith.constant 0 : i32
    return %c0_i32, %c0_i32_0 : i32, i32
  }
  func.func @transform_6(%arg0: i32) -> (i32, i32) {
    %c0_i32 = arith.constant 0 : i32
    %c0_i32_0 = arith.constant 0 : i32
    %c0_i32_1 = arith.constant 0 : i32
    return %c0_i32, %c0_i32_0 : i32, i32
  }
  func.func @transform_7(%arg0: i32) -> (i32, i32, i32) {
    %c0_i32 = arith.constant 0 : i32
    %c0_i32_0 = arith.constant 0 : i32
    %c0_i32_1 = arith.constant 0 : i32
    return %arg0, %c0_i32, %c0_i32_0 : i32, i32, i32
  }
}

</mosaic_0001>

<bundles_post_ra>
// kernel: bottleneck_forward.1
= control target key start
LH: loop header
LB: loop body
LE: loop exit
PB: predicated region body
PF: predicated region fallthrough
CT: control target
= control target key end

     0   :  { %s4748_s24 = smov 0   ;;  %s6609_s0 = inlined_call_operand.vmem [shape: bf16[2,256,16], index: 0, kind: input, shape index: {}]   ;;  %s6610_s1 = inlined_call_operand.vmem [shape: bf16[16,4], index: 1, kind: input, shape index: {}]   ;;  %s6611_s2 = inlined_call_operand.vmem [shape: f32[1,4], index: 2, kind: input, shape index: {}]   ;;  %s6612_s3 = inlined_call_operand.vmem [shape: bf16[9,4,4], index: 3, kind: input, shape index: {}]   ;;  %s6613_s4 = inlined_call_operand.vmem [shape: f32[1,4], index: 4, kind: input, shape index: {}]   ;;  %s6614_s5 = inlined_call_operand.vmem [shape: bf16[4,16], index: 5, kind: input, shape index: {}]   ;;  %s6615_s6 = inlined_call_operand.vmem [shape: f32[1,16], index: 6, kind: input, shape index: {}]   ;;  %s6616_s7 = inlined_call_operand.vmem [shape: bf16[2,256,16], index: 7, kind: output, shape index: {}]  }
   0x1 LB: > { %s4329_s25 = sadd.s32 4294967295, %s4705_s24   ;;  %p4333_p0 = scmp.ge.s32.totalorder %s4705_s24, 1  ;;  %s4705_s24 = sphi %s4748_s24, %s17_s24  }
   0x2   : > { %p237_p1 = scmp.lt.s32.totalorder %s4705_s24, 3 }
   0x4   : > { %p238_p2 = pnand %p4333_p0, %p237_p1 }
   0x6   : > { %241 = sbr.rel (%p238_p2) target bundleno = 1270 (0x4f6), region = 48 }
   0xb   : > { %v4602_v0 = vld [vmem:[%s6610_s1] sm:$0xff]  ;;  %p269_p3 = scmp.lt.s32.totalorder %s4329_s25, 1  ;;  %vm404_vm0 = vcmask 130048   ;;  %vm6642_vm1 = vcmask 31744   ;;  %v4707_v7 = vmov 0.0   ;;  %v613_v8 = vlaneseq }
   0xc   : > { %460 = vmatpush.bf16.msra.mxu0 %v4602_v0  ;;  %4682 = vmatpush.bf16.msra.mxu3 %v4602_v0  ;;  %576 = vst.msk [vmem:[#allocation2 + $0x8] sm:$0xff] %vm6642_vm1, %v4707_v7  ;;  %v6676_v12 = vmov 0  ;;  %v743_v20 = vld [vmem:[%s6612_s3 + $0x2] sm:$0x3]  ;;  %vm6617_vm3 = vcmask 1041408   ;;  %v6679_v45 = vmov 0 }
   0xd   : > { %s7163_s25 = smov (!%p269_p3, %s4329_s25), 1  ;;  %577 = vst.msk [vmem:[#allocation2 + $0x10] sm:$0xff] %vm6642_vm1, %v4707_v7  ;;  %v4786_v10 = vshrl.u32 %v613_v8, 7  ;;  %v742_v21 = vld [vmem:[%s6612_s3] sm:$0x3]  ;;  %v1105_v23 = vsel %vm6617_vm3, %v743_v20, 0 }
   0xe   : > { %s4584_s28 = sshll.u32 %s7163_s25, 7  ;;  %575 = vst.msk [vmem:[#allocation2] sm:$0xff] %vm6642_vm1, %v4707_v7  ;;  %v1325_v24 = vsel %vm6617_vm3, %v742_v21, 0  ;;  %1114 = vmatpush.bf16.msra.mxu1 %v1105_v23  ;;  %v4813_v33 = vld [vmem:[%s6611_s2] ss:$0 sm:$0xff] }
   0xf   : > { %s4767_s8 = scalar_lea.vmem %s6609_s0, %s4584_s28  ;;  %578 = vst.msk [vmem:[#allocation2 + $0x118] sm:$0xff] %vm6642_vm1, %v4707_v7  ;;  %v646_v11 = vand.u32 15, %v4786_v10  ;;  %1334 = vmatpush.bf16.msra.mxu2 %v1325_v24  ;;  %v616_v39 = vadd.s32 16, %v4786_v10  ;;  %v617_v57 = vadd.s32 24, %v4786_v10  ;;  %v618_v60 = vadd.s32 32, %v4786_v10  ;;  %s6430_s20 = scalar_lea.vmem %s6616_s7, %s4584_s28 }
  0x10   : > { %v4586_v1 = vld [vmem:[%s4767_s8] sm:$0xff]  ;;  %v4587_v2 = vld [vmem:[%s4767_s8 + $0x8] sm:$0xff]  ;;  %v4588_v3 = vld [vmem:[%s4767_s8 + $0x10] sm:$0xff]  ;;  %579 = vst.msk [vmem:[#allocation2 + $0x120] sm:$0xff] %vm6642_vm1, %v4707_v7  ;;  %4683 = vmatpush.bf16.msrb.mxu3 %v1105_v23 }
  0x11   : > { %4406 = vmatmul.msk.bf16.vlgmr.msra.gmra.mxu0 %vm404_vm0, %v4586_v1  ;;  %v4589_v4 = vld [vmem:[%s4767_s8 + $0x18] sm:$0xff]  ;;  %v4590_v5 = vld [vmem:[%s4767_s8 + $0x20] sm:$0xff]  ;;  %v4591_v6 = vld [vmem:[%s4767_s8 + $0x28] sm:$0xff]  ;;  %580 = vst.msk [vmem:[#allocation2 + $0x128] sm:$0xff] %vm6642_vm1, %v4707_v7  ;;  %vm4792_vm2 = vcmp.ne.s32.totalorder %v646_v11, 0  ;;  %v648_v42 = vand.u32 15, %v616_v39 }
  0x12   : > { %v4592_v9 = vld [vmem:[%s4767_s8 + $0x30] sm:$0xff]  ;;  %v6677_v12 = vsel %vm4792_vm2, 4294967295, %v6676_v12  ;;  %v4593_v32 = vld [vmem:[%s4767_s8 + $0x38] sm:$0xff]  ;;  %v4594_v34 = vld [vmem:[%s4767_s8 + $0x40] sm:$0xff]  ;;  %v6682_v11 = vmov 0  ;;  %v619_v39 = vadd.s32 40, %v4786_v10 }
  0x13   : > { %6678 = vst [vmem:[#allocation3_spill] sm:$0xff] %v6677_v12  ;;  %v911_v13 = vld [vmem:[#allocation2 + $0x8] sm:$0xff]  ;;  %v4598_v38 = vld [vmem:[%s4767_s8 + $0x60] sm:$0xff]  ;;  %vm4826_vm4 = vcmp.ne.s32.totalorder %v648_v42, 0 }
  0x14   : > { %v912_v14 = vld [vmem:[#allocation2 + $0x10] sm:$0xff]  ;;  %v943_v16 = vpack.c.bf16 %v911_v13, %v911_v13  ;;  %4418 = vmatmul.msk.bf16.vlgmr.msra.gmra.mxu3 %vm404_vm0, %v4598_v38  ;;  %v6680_v45 = vsel %vm4826_vm4, 4294967295, %v6679_v45  ;;  %v4595_v46 = vld [vmem:[%s4767_s8 + $0x48] sm:$0xff]  ;;  %v6685_v13 = vmov 0 }
  0x15   : > { %v752_v15 = vld [vmem:[#allocation2 + $0xf] sm:$0xff]  ;;  %v944_v17 = vpack.c.bf16 %v912_v14, %v912_v14  ;;  %v751_v18 = vld [vmem:[#allocation2 + $0x7] sm:$0xff]  ;;  %4684 = vmatpush.bf16.msra.mxu3 %v1325_v24  ;;  %6681 = vst [vmem:[#allocation4_spill] sm:$0xff] %v6680_v45 }
  0x16   : > { %v880_v19 = vpack.c.bf16 %v752_v15, %v752_v15  ;;  %v847_v22 = vsel %vm4792_vm2, %v751_v18, 0.0  ;;  %v1007_v25 = vunpack.c.l.b16 %v943_v16  ;;  %v4599_v56 = vld [vmem:[%s4767_s8 + $0x68] sm:$0xff]  ;;  %v745_v15 = vld [vmem:[%s6612_s3 + $0x6] sm:$0x3] }
  0x17   : > { %v1008_v26 = vunpack.c.l.b16 %v944_v17  ;;  %v879_v27 = vpack.c.bf16 %v847_v22, %v847_v22  ;;  %v4596_v17 = vld [vmem:[%s4767_s8 + $0x50] sm:$0xff]  ;;  %v2053_v18 = vsel %vm6617_vm3, %v745_v15, 0 }
  0x18   : > { %v1229_v28 = vunpack.c.l.b16 %v880_v19  ;;  %2062 = vmatpush.bf16.msrb.mxu0 %v2053_v18 }
  0x19   : > { %v1039_v29 = vpack.c.b16 %v1008_v26, %v1007_v25  ;;  %v1228_v30 = vunpack.c.l.b16 %v879_v27 }
  0x1b   : > { %4422 = vmatmul.msk.bf16.vlgmr.msra.gmra.mxu1 %vm6642_vm1, %v1039_v29  ;;  %v1260_v31 = vpack.c.b16 %v1229_v28, %v1228_v30 }
  0x1d   : > { %4438 = vmatmul.msk.bf16.vlgmr.msra.gmra.mxu2 %vm6642_vm1, %v1260_v31 }
  0x21   : > { %4407 = vmatmul.msk.bf16.gmra.mxu0 %vm404_vm0, %v4587_v2  ;;  %v649_v2 = vand.u32 15, %v617_v57  ;;  %v6691_v57 = vmov 0 }
  0x23   : > { %vm4852_vm5 = vcmp.ne.s32.totalorder %v649_v2, 15 }
  0x24   : > { %4419 = vmatmul.msk.bf16.gmra.mxu3 %vm404_vm0, %v4599_v56  ;;  %v6683_v11 = vsel %vm4852_vm5, 4294967295, %v6682_v11 }
  0x25   : > { %6684 = vst [vmem:[#allocation5_spill] sm:$0xff] %v6683_v11 }
  0x31   : > { %4408 = vmatmul.msk.bf16.gmra.mxu0 %vm404_vm0, %v4588_v3 }
  0x41   : > { %4409 = vmatmul.msk.bf16.gmra.mxu0 %vm404_vm0, %v4589_v4 }
  0x51   : > { %4410 = vmatmul.msk.bf16.gmra.mxu0 %vm404_vm0, %v4590_v5 }
  0x61   : > { %4411 = vmatmul.msk.bf16.gmra.mxu0 %vm404_vm0, %v4591_v6  ;;  %v650_v6 = vand.u32 15, %v618_v60  ;;  %v6695_v60 = vmov 0 }
  0x63   : > { %vm4857_vm6 = vcmp.ne.s32.totalorder %v650_v6, 0 }
  0x64   : > { %v6686_v13 = vsel %vm4857_vm6, 4294967295, %v6685_v13 }
  0x65   : > { %6687 = vst [vmem:[#allocation6_spill] sm:$0xff] %v6686_v13 }
  0x71   : > { %4412 = vmatmul.msk.bf16.gmra.mxu0 %vm404_vm0, %v4592_v9 }
  0x81   : > { %4413 = vmatmul.msk.bf16.gmra.mxu0 %vm404_vm0, %v4593_v32  ;;  %v620_v32 = vadd.s32 48, %v4786_v10 }
  0x8e   : > { %v462_v35 = vpop.f32.mrf.mxu0 }
  0x8f   : > { %v463_v36 = vadd.f32 %v4813_v33, %v462_v35  ;;  %v615_v35 = vadd.s32 8, %v4786_v10 }
  0x91   : > { %v542_v37 = vmax.f32 %v463_v36, 0.0  ;;  %4414 = vmatmul.msk.bf16.gmra.mxu0 %vm404_vm0, %v4594_v34  ;;  %v4600_v34 = vld [vmem:[%s4767_s8 + $0x70] sm:$0xff] }
  0x92   : > { %4420 = vmatmul.msk.bf16.gmra.mxu3 %vm404_vm0, %v4600_v34 }
  0x93   : > { %581 = vst.msk [vmem:[#allocation2 + $0x18] sm:$0xff] %vm6642_vm1, %v542_v37 }
  0x96   : > { %v464_v40 = vpop.f32.mrf.mxu0 }
  0x97   : > { %v465_v41 = vadd.f32 %v4813_v33, %v464_v40  ;;  %v522_v12 = vpop.f32.mrf.mxu3 }
  0x99   : > { %v543_v43 = vmax.f32 %v465_v41, 0.0 }
  0x9a   : > { %v4824_v44 = vld [vmem:[#allocation2 + $0x17] sm:$0xff] }
  0x9b   : > { %582 = vst.msk [vmem:[#allocation2 + $0x20] sm:$0xff] %vm6642_vm1, %v543_v43  ;;  %v913_v48 = vld [vmem:[#allocation2 + $0x18] sm:$0xff]  ;;  %v849_v49 = vsel %vm4826_vm4, %v4824_v44, 0.0 }
  0x9c   : > { %v945_v52 = vpack.c.bf16 %v913_v48, %v913_v48  ;;  %v881_v53 = vpack.c.bf16 %v849_v49, %v849_v49  ;;  %v647_v48 = vand.u32 15, %v615_v35 }
  0x9e   : > { %v467_v47 = vpop.f32.mrf.mxu0  ;;  %v1009_v61 = vunpack.c.l.b16 %v945_v52  ;;  %v1230_v63 = vunpack.c.l.b16 %v881_v53  ;;  %v651_v52 = vand.u32 15, %v619_v39  ;;  %vm4897_vm7 = vcmp.ne.s32.totalorder %v647_v48, 15 }
  0x9f   : > { %v468_v50 = vadd.f32 %v4813_v33, %v467_v47  ;;  %v652_v47 = vand.u32 15, %v620_v32  ;;  %v1860_v32 = vsel %vm4792_vm2, %v4824_v44, 0.0  ;;  %v6698_v44 = vmov 0 }
  0xa0   : > { %vm4915_vm9 = vcmp.ne.s32.totalorder %v651_v52, 15  ;;  %v6701_v48 = vmov 0  ;;  %vm6748_vm2 = vcmask 1041408  }
  0xa1   : > { %v544_v51 = vmax.f32 %v468_v50, 0.0  ;;  %4415 = vmatmul.msk.bf16.gmra.mxu0 %vm404_vm0, %v4595_v46  ;;  %vm4904_vm8 = vcmp.ne.s32.totalorder %v652_v47, 0  ;;  %v6696_v60 = vsel %vm4915_vm9, 4294967295, %v6695_v60 }
  0xa2   : > { %v914_v54 = vld [vmem:[#allocation2 + $0x20] sm:$0xff]  ;;  %v6692_v57 = vsel %vm4904_vm8, 4294967295, %v6691_v57 }
  0xa3   : > { %v754_v55 = vld [vmem:[#allocation2 + $0x1f] sm:$0xff]  ;;  %583 = vst.msk [vmem:[#allocation2 + $0x28] sm:$0xff] %vm6642_vm1, %v544_v51  ;;  %v946_v58 = vpack.c.bf16 %v914_v54, %v914_v54 }
  0xa4   : > { %v882_v59 = vpack.c.bf16 %v754_v55, %v754_v55  ;;  %v2492_v8 = vld [vmem:[#allocation2 + $0x19] sm:$0xff]  ;;  %6693 = vst [vmem:[#allocation8_spill] sm:$0xff] %v6692_v57 }
  0xa5   : > { %v1010_v62 = vunpack.c.l.b16 %v946_v58  ;;  %v2556_v16 = vpack.c.bf16 %v2492_v8, %v2492_v8 }
  0xa6   : > { %v4841_v0 = vunpack.c.l.b16 %v882_v59  ;;  %v469_v1 = vpop.f32.mrf.mxu0 }
  0xa7   : > { %v470_v3 = vadd.f32 %v4813_v33, %v469_v1  ;;  %v4844_v4 = vpack.c.b16 %v1010_v62, %v1009_v61  ;;  %v4875_v25 = vunpack.c.l.b16 %v2556_v16  ;;  %v4597_v62 = vld [vmem:[%s4767_s8 + $0x58] sm:$0xff] }
  0xa8   : > { %v1261_v5 = vpack.c.b16 %v4841_v0, %v1230_v63 }
  0xa9   : > { %v545_v7 = vmax.f32 %v470_v3, 0.0  ;;  %4423 = vmatmul.msk.bf16.gmra.mxu1 %vm6642_vm1, %v4844_v4 }
  0xaa   : > { %4439 = vmatmul.msk.bf16.gmra.mxu2 %vm6642_vm1, %v1261_v5  ;;  %v4850_v9 = vld [vmem:[#allocation2 + $0x21] sm:$0xff] }
  0xab   : > { %584 = vst.msk [vmem:[#allocation2 + $0x30] sm:$0xff] %vm6642_vm1, %v545_v7  ;;  %v4861_v14 = vld [vmem:[#allocation2 + $0x27] sm:$0xff]  ;;  %v1515_v19 = vsel %vm4852_vm5, %v4850_v9, 0.0 }
  0xac   : > { %v915_v21 = vld [vmem:[#allocation2 + $0x28] sm:$0xff]  ;;  %v851_v22 = vsel %vm4857_vm6, %v4861_v14, 0.0  ;;  %v1547_v23 = vpack.c.bf16 %v1515_v19, %v1515_v19 }
  0xad   : > { %v947_v28 = vpack.c.bf16 %v915_v21, %v915_v21  ;;  %v883_v29 = vpack.c.bf16 %v851_v22, %v851_v22  ;;  %v621_v21 = vadd.s32 56, %v4786_v10 }
  0xae   : > { %v472_v20 = vpop.f32.mrf.mxu0  ;;  %v4877_v26 = vunpack.c.l.b16 %v1547_v23 }
  0xaf   : > { %v473_v24 = vadd.f32 %v4813_v33, %v472_v20  ;;  %v1011_v40 = vunpack.c.l.b16 %v947_v28  ;;  %v1232_v42 = vunpack.c.l.b16 %v883_v29  ;;  %v4601_v20 = vld [vmem:[%s4767_s8 + $0x78] sm:$0xff]  ;;  %v653_v35 = vand.u32 15, %v621_v21 }
  0xb0   : > { %6688 = vst [vmem:[#allocation7_spill] sm:$0xff] %v4877_v26  ;;  %4421 = vmatmul.msk.bf16.gmra.mxu3 %vm404_vm0, %v4601_v20 }
  0xb1   : > { %v546_v27 = vmax.f32 %v473_v24, 0.0  ;;  %4416 = vmatmul.msk.bf16.gmra.mxu0 %vm404_vm0, %v4596_v17  ;;  %v622_v24 = vadd.s32 64, %v4786_v10  ;;  %vm4953_vm10 = vcmp.ne.s32.totalorder %v653_v35, 15 }
  0xb2   : > { %v916_v30 = vld [vmem:[#allocation2 + $0x30] sm:$0xff]  ;;  %v6699_v44 = vsel %vm4953_vm10, 4294967295, %v6698_v44 }
  0xb3   : > { %v756_v31 = vld [vmem:[#allocation2 + $0x2f] sm:$0xff]  ;;  %585 = vst.msk [vmem:[#allocation2 + $0x38] sm:$0xff] %vm6642_vm1, %v546_v27  ;;  %v948_v37 = vpack.c.bf16 %v916_v30, %v916_v30 }
  0xb4   : > { %v884_v38 = vpack.c.bf16 %v756_v31, %v756_v31  ;;  %v2494_v54 = vld [vmem:[#allocation2 + $0x29] sm:$0xff]  ;;  %6700 = vst [vmem:[#allocation11_spill] sm:$0xff] %v6699_v44 }
  0xb5   : > { %v1012_v41 = vunpack.c.l.b16 %v948_v37  ;;  %v2558_v61 = vpack.c.bf16 %v2494_v54, %v2494_v54 }
  0xb6   : > { %v4888_v43 = vunpack.c.l.b16 %v884_v38  ;;  %v474_v46 = vpop.f32.mrf.mxu0 }
  0xb7   : > { %v475_v49 = vadd.f32 %v4813_v33, %v474_v46  ;;  %v4891_v50 = vpack.c.b16 %v1012_v41, %v1011_v40  ;;  %v4927_v7 = vunpack.c.l.b16 %v2558_v61  ;;  %v654_v40 = vand.u32 15, %v622_v24 }
  0xb8   : > { %v1262_v51 = vpack.c.b16 %v4888_v43, %v1232_v42  ;;  %v1892_v41 = vpack.c.bf16 %v1860_v32, %v1860_v32  ;;  %v1862_v32 = vsel %vm4826_vm4, %v4861_v14, 0.0  ;;  %v6705_v14 = vmov 0 }
  0xb9   : > { %v547_v53 = vmax.f32 %v475_v49, 0.0  ;;  %4424 = vmatmul.msk.bf16.gmra.mxu1 %vm6642_vm1, %v4891_v50  ;;  %vm4958_vm11 = vcmp.ne.s32.totalorder %v654_v40, 0 }
  0xba   : > { %4440 = vmatmul.msk.bf16.gmra.mxu2 %vm6642_vm1, %v1262_v51  ;;  %v4901_v56 = vld [vmem:[#allocation2 + $0x31] sm:$0xff]  ;;  %v6702_v48 = vsel %vm4958_vm11, 4294967295, %v6701_v48  ;;  %v1956_v52 = vunpack.c.l.b16 %v1892_v41 }
  0xbb   : > { %586 = vst.msk [vmem:[#allocation2 + $0x40] sm:$0xff] %vm6642_vm1, %v547_v53  ;;  %v4908_v58 = vld [vmem:[#allocation2 + $0x37] sm:$0xff]  ;;  %v4913_v59 = vsel %vm4897_vm7, %v4901_v56, 0.0  ;;  %v1517_v3 = vsel %vm4915_vm9, %v4901_v56, 0.0 }
  0xbc   : > { %6694 = vst [vmem:[#allocation9_spill] sm:$0xff] %v4913_v59  ;;  %v917_v1 = vld [vmem:[#allocation2 + $0x38] sm:$0xff]  ;;  %v853_v2 = vsel %vm4904_vm8, %v4908_v58, 0.0  ;;  %v1549_v6 = vpack.c.bf16 %v1517_v3, %v1517_v3 }
  0xbd   : > { %v949_v15 = vpack.c.bf16 %v917_v1, %v917_v1  ;;  %v885_v16 = vpack.c.bf16 %v853_v2, %v853_v2  ;;  %6703 = vst [vmem:[#allocation12_spill] sm:$0xff] %v6702_v48  ;;  %v1988_v2 = vpack.c.b16 %v4841_v0, %v1956_v52  ;;  %v6708_v52 = vmov 0 }
  0xbe   : > { %v477_v63 = vpop.f32.mrf.mxu0  ;;  %v4930_v17 = vunpack.c.l.b16 %v1549_v6  ;;  %v632_v48 = vadd.s32 144, %v4786_v10 }
  0xbf   : > { %v478_v5 = vadd.f32 %v4813_v33, %v477_v63  ;;  %v1013_v28 = vunpack.c.l.b16 %v949_v15  ;;  %v1234_v30 = vunpack.c.l.b16 %v885_v16 }
  0xc0   : > { %6697 = vst [vmem:[#allocation10_spill] sm:$0xff] %v4930_v17 }
  0xc1   : > { %v548_v8 = vmax.f32 %v478_v5, 0.0  ;;  %4417 = vmatmul.msk.bf16.gmra.mxu0 %vm404_vm0, %v4597_v62 }
  0xc2   : > { %v918_v18 = vld [vmem:[#allocation2 + $0x40] sm:$0xff] }
  0xc3   : > { %v758_v19 = vld [vmem:[#allocation2 + $0x3f] sm:$0xff]  ;;  %587 = vst.msk [vmem:[#allocation2 + $0x48] sm:$0xff] %vm6642_vm1, %v548_v8  ;;  %v950_v22 = vpack.c.bf16 %v918_v18, %v918_v18 }
  0xc4   : > { %v886_v23 = vpack.c.bf16 %v758_v19, %v758_v19  ;;  %v2496_v46 = vld [vmem:[#allocation2 + $0x39] sm:$0xff]  ;;  %v623_v19 = vadd.s32 72, %v4786_v10 }
  0xc5   : > { %v1014_v29 = vunpack.c.l.b16 %v950_v22  ;;  %v2560_v51 = vpack.c.bf16 %v2496_v46, %v2496_v46  ;;  %v624_v22 = vadd.s32 80, %v4786_v10 }
  0xc6   : > { %v4939_v31 = vunpack.c.l.b16 %v886_v23  ;;  %v479_v34 = vpop.f32.mrf.mxu0 }
  0xc7   : > { %v480_v37 = vadd.f32 %v4813_v33, %v479_v34  ;;  %v4945_v38 = vpack.c.b16 %v1014_v29, %v1013_v28  ;;  %v4972_v3 = vunpack.c.l.b16 %v2560_v51  ;;  %v655_v34 = vand.u32 15, %v623_v19 }
  0xc8   : > { %v1263_v39 = vpack.c.b16 %v4939_v31, %v1234_v30  ;;  %v656_v40 = vand.u32 15, %v624_v22 }
  0xc9   : > { %v549_v42 = vmax.f32 %v480_v37, 0.0  ;;  %4425 = vmatmul.msk.bf16.gmra.mxu1 %vm6642_vm1, %v4945_v38  ;;  %vm4996_vm12 = vcmp.ne.s32.totalorder %v655_v34, 15 }
  0xca   : > { %4441 = vmatmul.msk.bf16.gmra.mxu2 %vm6642_vm1, %v1263_v39  ;;  %v4951_v47 = vld [vmem:[#allocation2 + $0x41] sm:$0xff]  ;;  %v6706_v14 = vsel %vm4996_vm12, 4294967295, %v6705_v14  ;;  %vm5001_vm13 = vcmp.ne.s32.totalorder %v656_v40, 0 }
  0xcb   : > { %588 = vst.msk [vmem:[#allocation2 + $0x50] sm:$0xff] %vm6642_vm1, %v549_v42  ;;  %v4962_v49 = vld [vmem:[#allocation2 + $0x47] sm:$0xff]  ;;  %v1519_v53 = vsel %vm4953_vm10, %v4951_v47, 0.0  ;;  %v1894_v42 = vpack.c.bf16 %v1862_v32, %v1862_v32  ;;  %v6709_v52 = vsel %vm5001_vm13, 4294967295, %v6708_v52 }
  0xcc   : > { %v919_v61 = vld [vmem:[#allocation2 + $0x48] sm:$0xff]  ;;  %v855_v62 = vsel %vm4958_vm11, %v4962_v49, 0.0  ;;  %v1551_v63 = vpack.c.bf16 %v1519_v53, %v1519_v53  ;;  %6707 = vst [vmem:[#allocation14_spill] sm:$0xff] %v6706_v14 }
  0xcd   : > { %v951_v8 = vpack.c.bf16 %v919_v61, %v919_v61  ;;  %v887_v15 = vpack.c.bf16 %v855_v62, %v855_v62  ;;  %6710 = vst [vmem:[#allocation15_spill] sm:$0xff] %v6709_v52  ;;  %v1958_v61 = vunpack.c.l.b16 %v1894_v42  ;;  %v1864_v42 = vsel %vm4857_vm6, %v4908_v58, 0.0 }
  0xce   : > { %v482_v54 = vpop.f32.mrf.mxu0  ;;  %v4974_v5 = vunpack.c.l.b16 %v1551_v63  ;;  %v6714_v58 = vmov 0 }
  0xcf   : > { %v483_v1 = vadd.f32 %v4813_v33, %v482_v54  ;;  %v1015_v23 = vunpack.c.l.b16 %v951_v8  ;;  %v1236_v28 = vunpack.c.l.b16 %v887_v15  ;;  %v1989_v8 = vpack.c.b16 %v4888_v43, %v1958_v61 }
  0xd0   : > { %6704 = vst [vmem:[#allocation13_spill] sm:$0xff] %v4974_v5  ;;  %v626_v43 = vadd.s32 96, %v4786_v10 }
  0xd1   : > { %v550_v6 = vmax.f32 %v483_v1, 0.0  ;;  %4470 = vmatmul.msk.bf16.vlgmr.msrb.gmra.mxu0 %vm6642_vm1, %v1988_v2 }
  0xd2   : > { %v920_v16 = vld [vmem:[#allocation2 + $0x50] sm:$0xff] }
  0xd3   : > { %v760_v18 = vld [vmem:[#allocation2 + $0x4f] sm:$0xff]  ;;  %589 = vst.msk [vmem:[#allocation2 + $0x58] sm:$0xff] %vm6642_vm1, %v550_v6  ;;  %v952_v21 = vpack.c.bf16 %v920_v16, %v920_v16 }
  0xd4   : > { %v888_v0 = vpack.c.bf16 %v760_v18, %v760_v18  ;;  %v2498_v46 = vld [vmem:[#allocation2 + $0x49] sm:$0xff] }
  0xd5   : > { %v1016_v24 = vunpack.c.l.b16 %v952_v21  ;;  %v2562_v54 = vpack.c.bf16 %v2498_v46, %v2498_v46 }
  0xd6   : > { %v4982_v29 = vunpack.c.l.b16 %v888_v0  ;;  %v484_v30 = vpop.f32.mrf.mxu0 }
  0xd7   : > { %v485_v35 = vadd.f32 %v4813_v33, %v484_v30  ;;  %v4988_v37 = vpack.c.b16 %v1016_v24, %v1015_v23  ;;  %v5015_v16 = vunpack.c.l.b16 %v2562_v54  ;;  %v625_v24 = vadd.s32 88, %v4786_v10 }
  0xd8   : > { %v1264_v39 = vpack.c.b16 %v4982_v29, %v1236_v28 }
  0xd9   : > { %v551_v41 = vmax.f32 %v485_v35, 0.0  ;;  %4426 = vmatmul.msk.bf16.gmra.mxu1 %vm6642_vm1, %v4988_v37  ;;  %v657_v46 = vand.u32 15, %v625_v24 }
  0xda   : > { %4442 = vmatmul.msk.bf16.gmra.mxu2 %vm6642_vm1, %v1264_v39  ;;  %v4994_v51 = vld [vmem:[#allocation2 + $0x51] sm:$0xff] }
  0xdb   : > { %590 = vst.msk [vmem:[#allocation2 + $0x60] sm:$0xff] %vm6642_vm1, %v551_v41  ;;  %v5005_v53 = vld [vmem:[#allocation2 + $0x57] sm:$0xff]  ;;  %v1521_v62 = vsel %vm4996_vm12, %v4994_v51, 0.0  ;;  %vm5036_vm14 = vcmp.ne.s32.totalorder %v657_v46, 15 }
  0xdc   : > { %v921_v1 = vld [vmem:[#allocation2 + $0x58] sm:$0xff]  ;;  %v857_v2 = vsel %vm5001_vm13, %v5005_v53, 0.0  ;;  %v1553_v15 = vpack.c.bf16 %v1521_v62, %v1521_v62 }
  0xdd   : > { %v953_v19 = vpack.c.bf16 %v921_v1, %v921_v1  ;;  %v889_v21 = vpack.c.bf16 %v857_v2, %v857_v2  ;;  %v1896_v2 = vpack.c.bf16 %v1864_v42, %v1864_v42 }
  0xde   : > { %v487_v63 = vpop.f32.mrf.mxu0  ;;  %v5018_v0 = vunpack.c.l.b16 %v1553_v15 }
  0xdf   : > { %v488_v6 = vadd.f32 %v4813_v33, %v487_v63  ;;  %v1017_v34 = vunpack.c.l.b16 %v953_v19  ;;  %v1238_v39 = vunpack.c.l.b16 %v889_v21  ;;  %v658_v63 = vand.u32 15, %v626_v43 }
  0xe0   : > { %6711 = vst [vmem:[#allocation16_spill] sm:$0xff] %v5018_v0  ;;  %v1960_v21 = vunpack.c.l.b16 %v1896_v2 }
  0xe1   : > { %v552_v18 = vmax.f32 %v488_v6, 0.0  ;;  %4471 = vmatmul.msk.bf16.gmra.mxu0 %vm6642_vm1, %v1989_v8  ;;  %vm5041_vm15 = vcmp.ne.s32.totalorder %v658_v63, 0 }
  0xe2   : > { %v922_v22 = vld [vmem:[#allocation2 + $0x60] sm:$0xff]  ;;  %v6715_v58 = vsel %vm5041_vm15, 4294967295, %v6714_v58  ;;  %v1990_v43 = vpack.c.b16 %v4939_v31, %v1960_v21  ;;  %v628_v31 = vadd.s32 112, %v4786_v10 }
  0xe3   : > { %v762_v23 = vld [vmem:[#allocation2 + $0x5f] sm:$0xff]  ;;  %591 = vst.msk [vmem:[#allocation2 + $0x68] sm:$0xff] %vm6642_vm1, %v552_v18  ;;  %v954_v28 = vpack.c.bf16 %v922_v22, %v922_v22 }
  0xe4   : > { %v890_v30 = vpack.c.bf16 %v762_v23, %v762_v23  ;;  %v2500_v6 = vld [vmem:[#allocation2 + $0x59] sm:$0xff]  ;;  %6716 = vst [vmem:[#allocation17_spill] sm:$0xff] %v6715_v58 }
  0xe5   : > { %v1018_v35 = vunpack.c.l.b16 %v954_v28  ;;  %v2564_v19 = vpack.c.bf16 %v2500_v6, %v2500_v6 }
  0xe6   : > { %v5025_v40 = vunpack.c.l.b16 %v890_v30  ;;  %v489_v41 = vpop.f32.mrf.mxu0 }
  0xe7   : > { %v490_v54 = vadd.f32 %v4813_v33, %v489_v41  ;;  %v1044_v61 = vpack.c.b16 %v1018_v35, %v1017_v34  ;;  %v5055_v35 = vunpack.c.l.b16 %v2564_v19 }
  0xe8   : > { %v1265_v62 = vpack.c.b16 %v5025_v40, %v1238_v39 }
  0xe9   : > { %v553_v1 = vmax.f32 %v490_v54, 0.0  ;;  %4427 = vmatmul.msk.bf16.gmra.mxu1 %vm6642_vm1, %v1044_v61 }
  0xea   : > { %4443 = vmatmul.msk.bf16.gmra.mxu2 %vm6642_vm1, %v1265_v62  ;;  %v5034_v8 = vld [vmem:[#allocation2 + $0x61] sm:$0xff]  ;;  %v627_v62 = vadd.s32 104, %v4786_v10 }
  0xeb   : > { %592 = vst.msk [vmem:[#allocation2 + $0x70] sm:$0xff] %vm6642_vm1, %v553_v1  ;;  %v5045_v18 = vld [vmem:[#allocation2 + $0x67] sm:$0xff]  ;;  %v1523_v22 = vsel %vm5036_vm14, %v5034_v8, 0.0 }
  0xec   : > { %v923_v24 = vld [vmem:[#allocation2 + $0x68] sm:$0xff]  ;;  %v859_v28 = vsel %vm5041_vm15, %v5045_v18, 0.0  ;;  %v1555_v34 = vpack.c.bf16 %v1523_v22, %v1523_v22 }
  0xed   : > { %v955_v41 = vpack.c.bf16 %v923_v24, %v923_v24  ;;  %v891_v42 = vpack.c.bf16 %v859_v28, %v859_v28  ;;  %v1866_v24 = vsel %vm4904_vm8, %v4962_v49, 0.0  ;;  %v659_v28 = vand.u32 15, %v627_v62 }
  0xee   : > { %v492_v23 = vpop.f32.mrf.mxu0  ;;  %v5058_v46 = vunpack.c.l.b16 %v1555_v34  ;;  %v6720_v49 = vmov 0  ;;  %vm6725_vm8 = vcmask 1041408  }
  0xef   : > { %v493_v30 = vadd.f32 %v4813_v33, %v492_v23  ;;  %v1019_v6 = vunpack.c.l.b16 %v955_v41  ;;  %v1240_v21 = vunpack.c.l.b16 %v891_v42  ;;  %v1898_v41 = vpack.c.bf16 %v1866_v24, %v1866_v24 }
  0xf0   : > { %6717 = vst [vmem:[#allocation18_spill] sm:$0xff] %v5058_v46  ;;  %vm5076_vm0 = vcmp.ne.s32.totalorder %v659_v28, 15 }
  0xf1   : > { %v554_v39 = vmax.f32 %v493_v30, 0.0  ;;  %4472 = vmatmul.msk.bf16.gmra.mxu0 %vm6642_vm1, %v1990_v43 }
  0xf2   : > { %v924_v54 = vld [vmem:[#allocation2 + $0x70] sm:$0xff] }
  0xf3   : > { %v764_v61 = vld [vmem:[#allocation2 + $0x6f] sm:$0xff]  ;;  %593 = vst.msk [vmem:[#allocation2 + $0x78] sm:$0xff] %vm6642_vm1, %v554_v39  ;;  %v956_v63 = vpack.c.bf16 %v924_v54, %v924_v54  ;;  %v660_v39 = vand.u32 15, %v628_v31  ;;  %v1962_v31 = vunpack.c.l.b16 %v1898_v41 }
  0xf4   : > { %v892_v1 = vpack.c.bf16 %v764_v61, %v764_v61  ;;  %v2502_v42 = vld [vmem:[#allocation2 + $0x69] sm:$0xff] }
  0xf5   : > { %v1020_v19 = vunpack.c.l.b16 %v956_v63  ;;  %v6718_v63 = vmov 0  ;;  %vm5081_vm3 = vcmp.ne.s32.totalorder %v660_v39, 0  ;;  %v1991_v28 = vpack.c.b16 %v4982_v29, %v1962_v31 }
  0xf6   : > { %v5065_v22 = vunpack.c.l.b16 %v892_v1  ;;  %v494_v23 = vpop.f32.mrf.mxu0  ;;  %v6719_v63 = vsel %vm5076_vm0, 4294967295, %v6718_v63  ;;  %v6721_v49 = vsel %vm5081_vm3, 4294967295, %v6720_v49  ;;  %v2566_v1 = vpack.c.bf16 %v2502_v42, %v2502_v42 }
  0xf7   : > { %v495_v30 = vadd.f32 %v4813_v33, %v494_v23  ;;  %v1045_v43 = vpack.c.b16 %v1020_v19, %v1019_v6  ;;  %6722 = vst [vmem:[#allocation19_spill] sm:$0xff] %v6721_v49 }
  0xf8   : > { %v1266_v34 = vpack.c.b16 %v5065_v22, %v1240_v21 }
  0xf9   : > { %v555_v54 = vmax.f32 %v495_v30, 0.0  ;;  %4428 = vmatmul.msk.bf16.gmra.mxu1 %vm6642_vm1, %v1045_v43  ;;  %v1116_v30 = vpop.f32.mrf.mxu1  ;;  %v1336_v43 = vpop.f32.mrf.mxu2 }
  0xfa   : > { %4444 = vmatmul.msk.bf16.gmra.mxu2 %vm6642_vm1, %v1266_v34  ;;  %v5074_v61 = vld [vmem:[#allocation2 + $0x71] sm:$0xff]  ;;  %v5095_v39 = vadd.f32 %v1336_v43, %v1116_v30 }
  0xfb   : > { %594 = vst.msk [vmem:[#allocation2 + $0x80] sm:$0xff] %vm6642_vm1, %v555_v54  ;;  %v5085_v62 = vld [vmem:[#allocation2 + $0x77] sm:$0xff]  ;;  %v1525_v6 = vsel %vm5076_vm0, %v5074_v61, 0.0  ;;  %v5097_v54 = vunpack.c.l.b16 %v2566_v1  ;;  %v746_v1 = vld [vmem:[%s6612_s3 + $0x8] sm:$0x3] }
  0xfc   : > { %v925_v21 = vld [vmem:[#allocation2 + $0x78] sm:$0xff]  ;;  %v861_v23 = vsel %vm5081_vm3, %v5085_v62, 0.0  ;;  %v1557_v34 = vpack.c.bf16 %v1525_v6, %v1525_v6  ;;  %6723 = vst [vmem:[#allocation20_spill] sm:$0xff] %v5095_v39  ;;  %v630_v6 = vadd.s32 128, %v4786_v10 }
  0xfd   : > { %v957_v42 = vpack.c.bf16 %v925_v21, %v925_v21  ;;  %v893_v2 = vpack.c.bf16 %v861_v23, %v861_v23  ;;  %v2369_v23 = vsel %vm6725_vm8, %v746_v1, 0 }
  0xfe   : > { %v497_v19 = vpop.f32.mrf.mxu0  ;;  %v5100_v32 = vunpack.c.l.b16 %v1557_v34  ;;  %2378 = vmatpush.bf16.msrb.mxu1 %v2369_v23  ;;  %v662_v21 = vand.u32 15, %v630_v6 }
  0xff   : > { %v498_v24 = vadd.f32 %v4813_v33, %v497_v19  ;;  %v629_v19 = vadd.s32 120, %v4786_v10  ;;  %v1242_v30 = vunpack.c.l.b16 %v893_v2 }
 0x100   : > { %6724 = vst [vmem:[#allocation21_spill] sm:$0xff] %v5100_v32  ;;  %v634_v32 = vadd.s32 160, %v4786_v10 }
 0x101   : > { %v556_v41 = vmax.f32 %v498_v24, 0.0  ;;  %4473 = vmatmul.msk.bf16.gmra.mxu0 %vm6642_vm1, %v1991_v28  ;;  %v1021_v24 = vunpack.c.l.b16 %v957_v42 }
 0x102   : > { %v926_v20 = vld [vmem:[#allocation2 + $0x80] sm:$0xff] }
 0x103   : > { %v766_v27 = vld [vmem:[#allocation2 + $0x7f] sm:$0xff]  ;;  %595 = vst.msk [vmem:[#allocation2 + $0x88] sm:$0xff] %vm6642_vm1, %v556_v41  ;;  %v958_v29 = vpack.c.bf16 %v926_v20, %v926_v20  ;;  %v661_v20 = vand.u32 15, %v629_v19 }
 0x104   : > { %v894_v31 = vpack.c.bf16 %v766_v27, %v766_v27  ;;  %v1868_v27 = vsel %vm4958_vm11, %v5005_v53, 0.0  ;;  %v2504_v42 = vld [vmem:[#allocation2 + $0x79] sm:$0xff]  ;;  %vm5127_vm11 = vcmp.ne.s32.totalorder %v662_v21, 0  ;;  %v6728_v53 = vmov 0 }
 0x105   : > { %v1022_v28 = vunpack.c.l.b16 %v958_v29  ;;  %v1900_v2 = vpack.c.bf16 %v1868_v27, %v1868_v27  ;;  %vm5122_vm8 = vcmp.ne.s32.totalorder %v661_v20, 15  ;;  %v6729_v53 = vsel %vm5127_vm11, 4294967295, %v6728_v53 }
 0x106   : > { %v5111_v43 = vunpack.c.l.b16 %v894_v31  ;;  %v499_v34 = vpop.f32.mrf.mxu0  ;;  %6730 = vst [vmem:[#allocation22_spill] sm:$0xff] %v6729_v53  ;;  %v2568_v6 = vpack.c.bf16 %v2504_v42, %v2504_v42 }
 0x107   : > { %v500_v41 = vadd.f32 %v4813_v33, %v499_v34  ;;  %v1046_v36 = vpack.c.b16 %v1022_v28, %v1021_v24 }
 0x108   : > { %v1267_v57 = vpack.c.b16 %v5111_v43, %v1242_v30  ;;  %v5141_v30 = vunpack.c.l.b16 %v2568_v6 }
 0x109   : > { %v557_v13 = vmax.f32 %v500_v41, 0.0  ;;  %4429 = vmatmul.msk.bf16.gmra.mxu1 %vm6642_vm1, %v1046_v36  ;;  %v1964_v36 = vunpack.c.l.b16 %v1900_v2 }
 0x10a   : > { %4445 = vmatmul.msk.bf16.gmra.mxu2 %vm6642_vm1, %v1267_v57  ;;  %v5120_v29 = vld [vmem:[#allocation2 + $0x81] sm:$0xff] }
 0x10b   : > { %596 = vst.msk [vmem:[#allocation2 + $0x90] sm:$0xff] %vm6642_vm1, %v557_v13  ;;  %v5131_v19 = vld [vmem:[#allocation2 + $0x87] sm:$0xff]  ;;  %v1527_v57 = vsel %vm5122_vm8, %v5120_v29, 0.0  ;;  %v1992_v21 = vpack.c.b16 %v5025_v40, %v1964_v36  ;;  %v631_v40 = vadd.s32 136, %v4786_v10 }
 0x10c   : > { %v927_v23 = vld [vmem:[#allocation2 + $0x88] sm:$0xff]  ;;  %v863_v24 = vsel %vm5127_vm11, %v5131_v19, 0.0  ;;  %v1559_v28 = vpack.c.bf16 %v1527_v57, %v1527_v57 }
 0x10d   : > { %v959_v27 = vpack.c.bf16 %v927_v23, %v927_v23  ;;  %v895_v20 = vpack.c.bf16 %v863_v24, %v863_v24  ;;  %v663_v39 = vand.u32 15, %v631_v40 }
 0x10e   : > { %v502_v1 = vpop.f32.mrf.mxu0  ;;  %v5144_v41 = vunpack.c.l.b16 %v1559_v28  ;;  %v664_v28 = vand.u32 15, %v632_v48 }
 0x10f   : > { %v503_v13 = vadd.f32 %v4813_v33, %v502_v1  ;;  %v1023_v36 = vunpack.c.l.b16 %v959_v27  ;;  %v6732_v27 = vmov 0 }
 0x110   : > { %6731 = vst [vmem:[#allocation23_spill] sm:$0xff] %v5144_v41  ;;  %vm5161_vm6 = vcmp.ne.s32.totalorder %v664_v28, 0 }
 0x111   : > { %v558_v34 = vmax.f32 %v503_v13, 0.0  ;;  %4474 = vmatmul.msk.bf16.gmra.mxu0 %vm6642_vm1, %v1992_v21  ;;  %v1244_v13 = vunpack.c.l.b16 %v895_v20  ;;  %v1870_v21 = vsel %vm5001_vm13, %v5045_v18, 0.0  ;;  %v6733_v27 = vsel %vm5161_vm6, 4294967295, %v6732_v27 }
 0x112   : > { %v928_v2 = vld [vmem:[#allocation2 + $0x90] sm:$0xff]  ;;  %6734 = vst [vmem:[#allocation24_spill] sm:$0xff] %v6733_v27  ;;  %v523_v18 = vadd.f32 %v4813_v33, %v522_v12  ;;  %vm5170_vm13 = vcmp.ne.s32.totalorder %v663_v39, 15 }
 0x113   : > { %v768_v42 = vld [vmem:[#allocation2 + $0x8f] sm:$0xff]  ;;  %597 = vst.msk [vmem:[#allocation2 + $0x98] sm:$0xff] %vm6642_vm1, %v558_v34  ;;  %v960_v45 = vpack.c.bf16 %v928_v2, %v928_v2 }
 0x114   : > { %v896_v1 = vpack.c.bf16 %v768_v42, %v768_v42  ;;  %v2506_v20 = vld [vmem:[#allocation2 + $0x89] sm:$0xff] }
 0x115   : > { %v1024_v57 = vunpack.c.l.b16 %v960_v45  ;;  %v1902_v45 = vpack.c.bf16 %v1870_v21, %v1870_v21  ;;  %v2570_v28 = vpack.c.bf16 %v2506_v20, %v2506_v20  ;;  %v5188_v20 = vpop.f32.mrf.mxu2 }
 0x116   : > { %v5151_v23 = vunpack.c.l.b16 %v896_v1  ;;  %v504_v24 = vpop.f32.mrf.mxu0  ;;  %6739 = vst [vmem:[#allocation27_spill] sm:$0xff] %v5188_v20 }
 0x117   : > { %v505_v34 = vadd.f32 %v4813_v33, %v504_v24  ;;  %v1047_v2 = vpack.c.b16 %v1024_v57, %v1023_v36  ;;  %v5174_v36 = vpop.f32.mrf.mxu1  ;;  %v1966_v57 = vunpack.c.l.b16 %v1902_v45 }
 0x118   : > { %v1268_v42 = vpack.c.b16 %v5151_v23, %v1244_v13  ;;  %6737 = vst [vmem:[#allocation25_spill] sm:$0xff] %v5174_v36 }
 0x119   : > { %v559_v59 = vmax.f32 %v505_v34, 0.0  ;;  %4430 = vmatmul.msk.bf16.gmra.mxu1 %vm6642_vm1, %v1047_v2  ;;  %v1993_v34 = vpack.c.b16 %v5065_v22, %v1966_v57  ;;  %v524_v2 = vpop.f32.mrf.mxu3 }
 0x11a   : > { %4446 = vmatmul.msk.bf16.gmra.mxu2 %vm6642_vm1, %v1268_v42  ;;  %v5165_v48 = vld [vmem:[#allocation2 + $0x97] sm:$0xff] }
 0x11b   : > { %598 = vst.msk [vmem:[#allocation2 + $0xa0] sm:$0xff] %vm6642_vm1, %v559_v59  ;;  %v5168_v1 = vld [vmem:[#allocation2 + $0x91] sm:$0xff]  ;;  %v566_v59 = vmax.f32 %v523_v18, 0.0  ;;  %v865_v21 = vsel %vm5161_vm6, %v5165_v48, 0.0 }
 0x11c   : > { %v929_v13 = vld [vmem:[#allocation2 + $0x98] sm:$0xff]  ;;  %v1529_v12 = vsel %vm5170_vm13, %v5168_v1, 0.0  ;;  %v897_v6 = vpack.c.bf16 %v865_v21, %v865_v21 }
 0x11d   : > { %605 = vst.msk [vmem:[#allocation2 + $0xd8] sm:$0xff] %vm6642_vm1, %v566_v59  ;;  %v1561_v42 = vpack.c.bf16 %v1529_v12, %v1529_v12  ;;  %v961_v45 = vpack.c.bf16 %v929_v13, %v929_v13  ;;  %v525_v13 = vadd.f32 %v4813_v33, %v524_v2  ;;  %v633_v59 = vadd.s32 152, %v4786_v10 }
 0x11e   : > { %v507_v24 = vpop.f32.mrf.mxu0 }
 0x11f   : > { %v508_v39 = vadd.f32 %v4813_v33, %v507_v24  ;;  %v5186_v36 = vunpack.c.l.b16 %v1561_v42  ;;  %v5191_v24 = vunpack.c.l.b16 %v2570_v28  ;;  %v1025_v12 = vunpack.c.l.b16 %v961_v45 }
 0x120   : > { %v567_v20 = vmax.f32 %v525_v13, 0.0  ;;  %v6740_v13 = vmov 0 }
 0x121   : > { %v560_v18 = vmax.f32 %v508_v39, 0.0  ;;  %4475 = vmatmul.msk.bf16.gmra.mxu0 %vm6642_vm1, %v1993_v34  ;;  %6738 = vst [vmem:[#allocation26_spill] sm:$0xff] %v5186_v36  ;;  %v1246_v34 = vunpack.c.l.b16 %v897_v6  ;;  %v527_v21 = vpop.f32.mrf.mxu3 }
 0x122   : > { %v930_v52 = vld [vmem:[#allocation2 + $0xa0] sm:$0xff]  ;;  %606 = vst.msk [vmem:[#allocation2 + $0xe0] sm:$0xff] %vm6642_vm1, %v567_v20 }
 0x123   : > { %v770_v41 = vld [vmem:[#allocation2 + $0x9f] sm:$0xff]  ;;  %599 = vst.msk [vmem:[#allocation2 + $0xa8] sm:$0xff] %vm6642_vm1, %v560_v18  ;;  %v962_v22 = vpack.c.bf16 %v930_v52, %v930_v52  ;;  %v1872_v52 = vsel %vm5041_vm15, %v5085_v62, 0.0 }
 0x124   : > { %v898_v57 = vpack.c.bf16 %v770_v41, %v770_v41  ;;  %v666_v41 = vand.u32 15, %v634_v32  ;;  %v2508_v62 = vld [vmem:[#allocation2 + $0x99] sm:$0xff] }
 0x125   : > { %v1026_v39 = vunpack.c.l.b16 %v962_v22  ;;  %v665_v22 = vand.u32 15, %v633_v59 }
 0x126   : > { %v5198_v42 = vunpack.c.l.b16 %v898_v57  ;;  %v509_v46 = vpop.f32.mrf.mxu0  ;;  %v1121_v28 = vpop.f32.mrf.mxu1  ;;  %v1904_v57 = vpack.c.bf16 %v1872_v52, %v1872_v52  ;;  %vm5208_vm4 = vcmp.ne.s32.totalorder %v666_v41, 0 }
 0x127   : > { %v510_v2 = vadd.f32 %v4813_v33, %v509_v46  ;;  %v1048_v18 = vpack.c.b16 %v1026_v39, %v1025_v12  ;;  %v6741_v13 = vsel %vm5208_vm4, 4294967295, %v6740_v13  ;;  %v528_v46 = vadd.f32 %v4813_v33, %v527_v21 }
 0x128   : > { %v1269_v45 = vpack.c.b16 %v5198_v42, %v1246_v34  ;;  %6742 = vst [vmem:[#allocation28_spill] sm:$0xff] %v6741_v13  ;;  %vm5218_vm15 = vcmp.ne.s32.totalorder %v665_v22, 15  ;;  %v1968_v34 = vunpack.c.l.b16 %v1904_v57  ;;  %v2572_v21 = vpack.c.bf16 %v2508_v62, %v2508_v62 }
 0x129   : > { %v561_v6 = vmax.f32 %v510_v2, 0.0  ;;  %4431 = vmatmul.msk.bf16.gmra.mxu1 %vm6642_vm1, %v1048_v18  ;;  %v568_v2 = vmax.f32 %v528_v46, 0.0 }
 0x12a   : > { %4447 = vmatmul.msk.bf16.gmra.mxu2 %vm6642_vm1, %v1269_v45  ;;  %v5212_v32 = vld [vmem:[#allocation2 + $0xa7] sm:$0xff]  ;;  %v1994_v58 = vpack.c.b16 %v5111_v43, %v1968_v34  ;;  %v5237_v26 = vunpack.c.l.b16 %v2572_v21 }
 0x12b   : > { %600 = vst.msk [vmem:[#allocation2 + $0xb0] sm:$0xff] %vm6642_vm1, %v561_v6  ;;  %v5216_v20 = vld [vmem:[#allocation2 + $0xa1] sm:$0xff]  ;;  %v867_v41 = vsel %vm5208_vm4, %v5212_v32, 0.0 }
 0x12c   : > { %v931_v52 = vld [vmem:[#allocation2 + $0xa8] sm:$0xff]  ;;  %v1531_v22 = vsel %vm5218_vm15, %v5216_v20, 0.0  ;;  %607 = vst.msk [vmem:[#allocation2 + $0xe8] sm:$0xff] %vm6642_vm1, %v568_v2  ;;  %v636_v2 = vadd.s32 176, %v4786_v10 }
 0x12d   : > { %v1341_v12 = vpop.f32.mrf.mxu2  ;;  %v1563_v57 = vpack.c.bf16 %v1531_v22, %v1531_v22 }
 0x12e   : > { %v5222_v39 = vadd.f32 %v1341_v12, %v1121_v28  ;;  %v512_v18 = vpop.f32.mrf.mxu0  ;;  %v1123_v45 = vpop.f32.mrf.mxu1  ;;  %v963_v12 = vpack.c.bf16 %v931_v52, %v931_v52 }
 0x12f   : > { %v513_v6 = vadd.f32 %v4813_v33, %v512_v18  ;;  %v529_v28 = vpop.f32.mrf.mxu3  ;;  %v5235_v62 = vunpack.c.l.b16 %v1563_v57 }
 0x130   : > { %6745 = vst [vmem:[#allocation29_spill] sm:$0xff] %v5222_v39  ;;  %v899_v39 = vpack.c.bf16 %v867_v41, %v867_v41  ;;  %v530_v36 = vadd.f32 %v4813_v33, %v529_v28  ;;  %v1027_v41 = vunpack.c.l.b16 %v963_v12 }
 0x131   : > { %v562_v46 = vmax.f32 %v513_v6, 0.0  ;;  %4476 = vmatmul.msk.bf16.gmra.mxu0 %vm6642_vm1, %v1994_v58  ;;  %6746 = vst [vmem:[#allocation30_spill] sm:$0xff] %v5235_v62  ;;  %v747_v58 = vld [vmem:[%s6612_s3 + $0xa] sm:$0x3] }
 0x132   : > { %v932_v0 = vld [vmem:[#allocation2 + $0xb0] sm:$0xff]  ;;  %v569_v17 = vmax.f32 %v530_v36, 0.0  ;;  %v1248_v18 = vunpack.c.l.b16 %v899_v39 }
 0x133   : > { %v772_v5 = vld [vmem:[#allocation2 + $0xaf] sm:$0xff]  ;;  %601 = vst.msk [vmem:[#allocation2 + $0xb8] sm:$0xff] %vm6642_vm1, %v562_v46  ;;  %v964_v43 = vpack.c.bf16 %v932_v0, %v932_v0  ;;  %v668_v46 = vand.u32 15, %v636_v2 }
 0x134   : > { %v900_v34 = vpack.c.bf16 %v772_v5, %v772_v5  ;;  %608 = vst.msk [vmem:[#allocation2 + $0xf0] sm:$0xff] %vm6642_vm1, %v569_v17  ;;  %v2717_v5 = vsel %vm6748_vm2, %v747_v58, 0  ;;  %v1874_v17 = vsel %vm5081_vm3, %v5131_v19, 0.0  ;;  %v6749_v19 = vmov 0 }
 0x135   : > { %v1343_v52 = vpop.f32.mrf.mxu2  ;;  %v1028_v22 = vunpack.c.l.b16 %v964_v43  ;;  %2726 = vmatpush.bf16.msrb.mxu2 %v2717_v5  ;;  %vm5261_vm2 = vcmp.ne.s32.totalorder %v668_v46, 0 }
 0x136   : > { %v5247_v21 = vadd.f32 %v1343_v52, %v1123_v45  ;;  %v5249_v6 = vunpack.c.l.b16 %v900_v34  ;;  %v514_v0 = vpop.f32.mrf.mxu0  ;;  %v1126_v28 = vpop.f32.mrf.mxu1  ;;  %v1906_v52 = vpack.c.bf16 %v1874_v17, %v1874_v17  ;;  %v6750_v19 = vsel %vm5261_vm2, 4294967295, %v6749_v19 }
 0x137   : > { %v515_v39 = vadd.f32 %v4813_v33, %v514_v0  ;;  %v1049_v57 = vpack.c.b16 %v1028_v22, %v1027_v41  ;;  %v532_v45 = vpop.f32.mrf.mxu3  ;;  %6751 = vst [vmem:[#allocation32_spill] sm:$0xff] %v6750_v19 }
 0x138   : > { %6747 = vst [vmem:[#allocation31_spill] sm:$0xff] %v5247_v21  ;;  %v1270_v12 = vpack.c.b16 %v5249_v6, %v1248_v18  ;;  %v533_v43 = vadd.f32 %v4813_v33, %v532_v45  ;;  %v1970_v22 = vunpack.c.l.b16 %v1906_v52 }
 0x139   : > { %v563_v34 = vmax.f32 %v515_v39, 0.0  ;;  %4432 = vmatmul.msk.bf16.gmra.mxu1 %vm6642_vm1, %v1049_v57 }
 0x13a   : > { %4448 = vmatmul.msk.bf16.gmra.mxu2 %vm6642_vm1, %v1270_v12  ;;  %v570_v58 = vmax.f32 %v533_v43, 0.0  ;;  %v5265_v41 = vld [vmem:[#allocation2 + $0xb7] sm:$0xff]  ;;  %v1995_v12 = vpack.c.b16 %v5151_v23, %v1970_v22 }
 0x13b   : > { %602 = vst.msk [vmem:[#allocation2 + $0xc0] sm:$0xff] %vm6642_vm1, %v563_v34  ;;  %v933_v5 = vld [vmem:[#allocation2 + $0xb8] sm:$0xff]  ;;  %v869_v17 = vsel %vm5261_vm2, %v5265_v41, 0.0 }
 0x13c   : > { %609 = vst.msk [vmem:[#allocation2 + $0xf8] sm:$0xff] %vm6642_vm1, %v570_v58  ;;  %v965_v45 = vpack.c.bf16 %v933_v5, %v933_v5  ;;  %v3521_v31 = vld [vmem:[#allocation2 + $0xb1] sm:$0xff] }
 0x13d   : > { %v1346_v18 = vpop.f32.mrf.mxu2 }
 0x13e   : > { %v5268_v2 = vadd.f32 %v1346_v18, %v1126_v28  ;;  %v517_v0 = vpop.f32.mrf.mxu0  ;;  %v1128_v39 = vpop.f32.mrf.mxu1  ;;  %v901_v28 = vpack.c.bf16 %v869_v17, %v869_v17  ;;  %v1029_v21 = vunpack.c.l.b16 %v965_v45  ;;  %v1876_v17 = vsel %vm5127_vm11, %v5165_v48, 0.0 }
 0x13f   : > { %v518_v57 = vadd.f32 %v4813_v33, %v517_v0  ;;  %v534_v46 = vpop.f32.mrf.mxu3 }
 0x140   : > { %6752 = vst [vmem:[#allocation33_spill] sm:$0xff] %v5268_v2  ;;  %v535_v43 = vadd.f32 %v4813_v33, %v534_v46  ;;  %v1250_v5 = vunpack.c.l.b16 %v901_v28 }
 0x141   : > { %v564_v34 = vmax.f32 %v518_v57, 0.0  ;;  %4477 = vmatmul.msk.bf16.gmra.mxu0 %vm6642_vm1, %v1995_v12  ;;  %v4697_v12 = vld [vmem:[%s6611_s2] ss:$0 sm:$0xff] }
 0x142   : > { %v934_v52 = vld [vmem:[#allocation2 + $0xc0] sm:$0xff]  ;;  %v571_v18 = vmax.f32 %v535_v43, 0.0 }
 0x143   : > { %v774_v58 = vld [vmem:[#allocation2 + $0xbf] sm:$0xff]  ;;  %603 = vst.msk [vmem:[#allocation2 + $0xc8] sm:$0xff] %vm6642_vm1, %v564_v34  ;;  %v966_v36 = vpack.c.bf16 %v934_v52, %v934_v52 }
 0x144   : > { %v902_v49 = vpack.c.bf16 %v774_v58, %v774_v58  ;;  %610 = vst.msk [vmem:[#allocation2 + $0x100] sm:$0xff] %vm6642_vm1, %v571_v18 }
 0x145   : > { %v1348_v2 = vpop.f32.mrf.mxu2  ;;  %v1030_v22 = vunpack.c.l.b16 %v966_v36 }
 0x146   : > { %v5279_v23 = vadd.f32 %v1348_v2, %v1128_v39  ;;  %v5281_v33 = vunpack.c.l.b16 %v902_v49  ;;  %v519_v0 = vpop.f32.mrf.mxu0  ;;  %v1131_v57 = vpop.f32.mrf.mxu1  ;;  %v1908_v49 = vpack.c.bf16 %v1876_v17, %v1876_v17 }
 0x147   : > { %v520_v46 = vadd.f32 %v4697_v12, %v519_v0  ;;  %v1050_v45 = vpack.c.b16 %v1030_v22, %v1029_v21  ;;  %v537_v2 = vpop.f32.mrf.mxu3  ;;  %v2525_v21 = vsel %vm4897_vm7, %v4850_v9, 0.0 }
 0x148   : > { %6753 = vst [vmem:[#allocation34_spill] sm:$0xff] %v5279_v23  ;;  %v1271_v43 = vpack.c.b16 %v5281_v33, %v1250_v5  ;;  %v538_v39 = vadd.f32 %v4697_v12, %v537_v2  ;;  %v1972_v52 = vunpack.c.l.b16 %v1908_v49  ;;  %v2557_v17 = vpack.c.bf16 %v2525_v21, %v2525_v21 }
 0x149   : > { %v565_v36 = vmax.f32 %v520_v46, 0.0  ;;  %4433 = vmatmul.msk.bf16.gmra.mxu1 %vm6642_vm1, %v1050_v45 }
 0x14a   : > { %4449 = vmatmul.msk.bf16.gmra.mxu2 %vm6642_vm1, %v1271_v43  ;;  %v572_v34 = vmax.f32 %v538_v39, 0.0  ;;  %v935_v22 = vld [vmem:[#allocation2 + $0xc8] sm:$0xff]  ;;  %v1996_v5 = vpack.c.b16 %v5198_v42, %v1972_v52  ;;  %v1878_v42 = vsel %vm5161_vm6, %v5212_v32, 0.0  ;;  %v637_v52 = vadd.s32 184, %v4786_v10 }
 0x14b   : > { %604 = vst.msk [vmem:[#allocation2 + $0xd0] sm:$0xff] %vm6642_vm1, %v565_v36  ;;  %v967_v45 = vpack.c.bf16 %v935_v22, %v935_v22  ;;  %v2621_v36 = vunpack.c.l.b16 %v2557_v17  ;;  %v2527_v32 = vsel %vm4852_vm5, %v4901_v56, 0.0  ;;  %vm6768_vm5 = vcmask 31744   ;;  %v2520_v19 = vld [vmem:[#allocation2 + $0xf9] sm:$0xff] }
 0x14c   : > { %611 = vst.msk [vmem:[#allocation2 + $0x108] sm:$0xff] %vm6642_vm1, %v572_v34 }
 0x14d   : > { %v1351_v48 = vpop.f32.mrf.mxu2  ;;  %v1031_v49 = vunpack.c.l.b16 %v967_v45  ;;  %v2652_v22 = vpack.c.b16 %v2621_v36, %v4875_v25  ;;  %v937_v45 = vld [vmem:[#allocation2 + $0xd8] sm:$0xff] }
 0x14e   : > { %v5294_v28 = vadd.f32 %v1351_v48, %v1131_v57  ;;  %v1133_v58 = vpop.f32.mrf.mxu1  ;;  %v5299_v18 = vpop.f32.mrf.mxu0 }
 0x14f   : > { %6755 = vst [vmem:[#allocation36_spill] sm:$0xff] %v5299_v18  ;;  %v539_v0 = vpop.f32.mrf.mxu3 }
 0x150   : > { %6754 = vst [vmem:[#allocation35_spill] sm:$0xff] %v5294_v28  ;;  %v540_v46 = vadd.f32 %v4697_v12, %v539_v0  ;;  %v635_v12 = vadd.s32 168, %v4786_v10  ;;  %v1910_v0 = vpack.c.bf16 %v1878_v42, %v1878_v42 }
 0x151   : > { %4478 = vmatmul.msk.bf16.gmra.mxu0 %vm6642_vm1, %v1996_v5  ;;  %v639_v5 = vadd.s32 200, %v4786_v10 }
 0x152   : > { %v936_v43 = vld [vmem:[#allocation2 + $0xd0] sm:$0xff]  ;;  %v573_v57 = vmax.f32 %v540_v46, 0.0  ;;  %v667_v17 = vand.u32 15, %v635_v12  ;;  %v669_v46 = vand.u32 15, %v637_v52  ;;  %v5333_v12 = vld [vmem:[#allocation2 + $0xc1] sm:$0xff]  ;;  %v6762_v52 = vmov 0 }
 0x153   : > { %v968_v2 = vpack.c.bf16 %v936_v43, %v936_v43 }
 0x154   : > { %612 = vst.msk [vmem:[#allocation2 + $0x110] sm:$0xff] %vm6642_vm1, %v573_v57  ;;  %v938_v57 = vld [vmem:[#allocation2 + $0xe0] sm:$0xff]  ;;  %vm5335_vm6 = vcmp.ne.s32.totalorder %v669_v46, 15 }
 0x155   : > { %v1353_v39 = vpop.f32.mrf.mxu2  ;;  %v1032_v34 = vunpack.c.l.b16 %v968_v2  ;;  %v671_v2 = vand.u32 15, %v639_v5  ;;  %v6763_v52 = vsel %vm5335_vm6, 4294967295, %v6762_v52  ;;  %v970_v5 = vpack.c.bf16 %v938_v57, %v938_v57 }
 0x156   : > { %v5304_v9 = vadd.f32 %v1353_v39, %v1133_v58  ;;  %v1136_v48 = vpop.f32.mrf.mxu1  ;;  %v5306_v18 = vpop.f32.mrf.mxu0  ;;  %v641_v58 = vadd.s32 216, %v4786_v10 }
 0x157   : > { %6757 = vst [vmem:[#allocation38_spill] sm:$0xff] %v5306_v18  ;;  %v1051_v21 = vpack.c.b16 %v1032_v34, %v1031_v49  ;;  %v1974_v49 = vunpack.c.l.b16 %v1910_v0  ;;  %v2559_v34 = vpack.c.bf16 %v2527_v32, %v2527_v32  ;;  %v5327_v18 = vld [vmem:[#allocation2 + $0xb1] sm:$0xff]  ;;  %vm5342_vm11 = vcmp.ne.s32.totalorder %v671_v2, 15 }
 0x158   : > { %6756 = vst [vmem:[#allocation37_spill] sm:$0xff] %v5304_v9  ;;  %v673_v39 = vand.u32 15, %v641_v58  ;;  %v2514_v58 = vld [vmem:[#allocation2 + $0xc9] sm:$0xff]  ;;  %v1535_v2 = vsel %vm5335_vm6, %v5333_v12, 0.0  ;;  %vm6786_vm6 = vcmask 1041408  }
 0x159   : > { %4434 = vmatmul.msk.bf16.vlgmr.msrb.gmra.mxu3 %vm6642_vm1, %v1051_v21  ;;  %4486 = vmatmul.msk.bf16.vlgmr.msrb.gmra.mxu1 %vm6642_vm1, %v4844_v4  ;;  %v2510_v21 = vld [vmem:[#allocation2 + $0xa9] sm:$0xff]  ;;  %v2512_v4 = vld [vmem:[#allocation2 + $0xb9] sm:$0xff]  ;;  %v1567_v53 = vpack.c.bf16 %v1535_v2, %v1535_v2 }
 0x15a   : > { %4502 = vmatmul.msk.bf16.vlgmr.msrb.gmra.mxu2 %vm6642_vm1, %v2652_v22  ;;  %v969_v22 = vpack.c.bf16 %v937_v45, %v937_v45  ;;  %vm5329_vm1 = vcmp.ne.s32.totalorder %v667_v17, 15  ;;  %v2574_v0 = vpack.c.bf16 %v2510_v21, %v2510_v21  ;;  %v2576_v32 = vpack.c.bf16 %v2512_v4, %v2512_v4  ;;  %v2516_v17 = vld [vmem:[#allocation2 + $0xd9] sm:$0xff] }
 0x15b   : > { %v6764_v45 = vmov 0  ;;  %vm5348_vm3 = vcmp.ne.s32.totalorder %v673_v39, 15  ;;  %v1533_v57 = vsel %vm5329_vm1, %v5327_v18, 0.0  ;;  %v2578_v21 = vpack.c.bf16 %v2514_v58, %v2514_v58 }
 0x15c   : > { %v6765_v45 = vsel %vm5342_vm11, 4294967295, %v6764_v45  ;;  %v1565_v4 = vpack.c.bf16 %v1533_v57, %v1533_v57  ;;  %v2580_v39 = vpack.c.bf16 %v2516_v17, %v2516_v17  ;;  %v5365_v28 = vunpack.c.l.b16 %v2574_v0 }
 0x15d   : > { %v1356_v43 = vpop.f32.mrf.mxu2  ;;  %v5367_v23 = vunpack.c.l.b16 %v2576_v32  ;;  %v643_v17 = vadd.s32 232, %v4786_v10  ;;  %v5381_v11 = vunpack.c.l.b16 %v2578_v21 }
 0x15e   : > { %v5323_v36 = vadd.f32 %v1356_v43, %v1136_v48  ;;  %v1138_v42 = vpop.f32.mrf.mxu1  ;;  %v5325_v27 = vpop.f32.mrf.mxu0  ;;  %v1997_v48 = vpack.c.b16 %v5249_v6, %v1974_v49  ;;  %v5340_v43 = vld [vmem:[#allocation2 + $0xd1] sm:$0xff]  ;;  %v2623_v6 = vunpack.c.l.b16 %v2559_v34  ;;  %v1033_v49 = vunpack.c.l.b16 %v969_v22 }
 0x15f   : > { %6759 = vst [vmem:[#allocation40_spill] sm:$0xff] %v5325_v27  ;;  %v5346_v27 = vld [vmem:[#allocation2 + $0xe1] sm:$0xff]  ;;  %v1537_v9 = vsel %vm5342_vm11, %v5340_v43, 0.0  ;;  %v5369_v62 = vunpack.c.l.b16 %v1565_v4  ;;  %v5371_v22 = vunpack.c.l.b16 %v1567_v53  ;;  %v5387_v4 = vunpack.c.l.b16 %v2580_v39 }
 0x160   : > { %6758 = vst [vmem:[#allocation39_spill] sm:$0xff] %v5323_v36  ;;  %v1034_v36 = vunpack.c.l.b16 %v970_v5  ;;  %v1539_v34 = vsel %vm5348_vm3, %v5346_v27, 0.0  ;;  %v1880_v5 = vsel %vm5208_vm4, %v5265_v41, 0.0  ;;  %v1569_v32 = vpack.c.bf16 %v1537_v9, %v1537_v9  ;;  %vm6773_vm4 = vmmov %vm6768_vm5  ;;  %v2518_v9 = vld [vmem:[#allocation2 + $0xe9] sm:$0xff] }
 0x161   : > { %4479 = vmatmul.msk.bf16.gmra.mxu0 %vm6768_vm5, %v1997_v48  ;;  %6769 = vst [vmem:[#allocation41_spill] sm:$0xff] %v5371_v22  ;;  %v2653_v41 = vpack.c.b16 %v2623_v6, %v4927_v7  ;;  %v1912_v21 = vpack.c.bf16 %v1880_v5, %v1880_v5  ;;  %vm6775_vm11 = vmmov %vm6773_vm4  ;;  %v939_v39 = vld [vmem:[#allocation2 + $0xe8] sm:$0xff] }
 0x162   : > { %v5390_v13 = vunpack.c.l.b16 %v1569_v32  ;;  %v5407_v32 = vld [vmem:[#allocation2 + $0xf1] sm:$0xff]  ;;  %v971_v53 = vpack.c.bf16 %v939_v39, %v939_v39 }
 0x163   : > { %v1851_v39 = vld [vmem:[#allocation2 + $0xcf] sm:$0xff] }
 0x164   : > { %6772 = vst [vmem:[#allocation44_spill] sm:$0xff] %v5390_v13 }
 0x165   : > { %v1358_v48 = vpop.f32.mrf.mxu2 }
 0x166   : > { %v5373_v58 = vadd.f32 %v1358_v48, %v1138_v42  ;;  %v1141_v57 = vpop.f32.mrf.mxu1  ;;  %v5379_v2 = vpop.f32.mrf.mxu0  ;;  %v1052_v42 = vpack.c.b16 %v1034_v36, %v1033_v49  ;;  %v1571_v48 = vpack.c.bf16 %v1539_v34, %v1539_v34  ;;  %v940_v34 = vld [vmem:[#allocation2 + $0xf0] sm:$0xff] }
 0x167   : > { %6771 = vst [vmem:[#allocation43_spill] sm:$0xff] %v5379_v2  ;;  %v675_v2 = vand.u32 15, %v643_v17  ;;  %v1976_v17 = vunpack.c.l.b16 %v1912_v21  ;;  %v1035_v21 = vunpack.c.l.b16 %v971_v53 }
 0x168   : > { %6770 = vst [vmem:[#allocation42_spill] sm:$0xff] %v5373_v58  ;;  %v5395_v0 = vunpack.c.l.b16 %v1571_v48 }
 0x169   : > { %4435 = vmatmul.msk.bf16.gmra.mxu3 %vm6768_vm5, %v1052_v42  ;;  %4487 = vmatmul.msk.bf16.gmra.mxu1 %vm6773_vm4, %v4891_v50  ;;  %v2529_v50 = vsel %vm4915_vm9, %v4951_v47, 0.0  ;;  %v2582_v42 = vpack.c.bf16 %v2518_v9, %v2518_v9  ;;  %vm5409_vm4 = vcmp.ne.s32.totalorder %v675_v2, 15  ;;  %v1998_v6 = vpack.c.b16 %v5281_v33, %v1976_v17  ;;  %vm6785_vm9 = vmmov %vm6768_vm5 }
 0x16a   : > { %6774 = vst [vmem:[#allocation45_spill] sm:$0xff] %v5395_v0  ;;  %4503 = vmatmul.msk.bf16.gmra.mxu2 %vm6775_vm11, %v2653_v41  ;;  %v972_v0 = vpack.c.bf16 %v940_v34, %v940_v34  ;;  %v2561_v58 = vpack.c.bf16 %v2529_v50, %v2529_v50  ;;  %v1541_v47 = vsel %vm5409_vm4, %v5407_v32, 0.0  ;;  %vm6780_vm11 = vmmov %vm6768_vm5  ;;  %v645_v50 = vadd.s32 248, %v4786_v10 }
 0x16b   : > { %v1573_v2 = vpack.c.bf16 %v1541_v47, %v1541_v47  ;;  %v1915_v47 = vpack.c.bf16 %v1851_v39, %v1851_v39  ;;  %v941_v39 = vld [vmem:[#allocation2 + $0xf8] sm:$0xff] }
 0x16c   : > { %v1036_v9 = vunpack.c.l.b16 %v972_v0  ;;  %v2625_v33 = vunpack.c.l.b16 %v2561_v58 }
 0x16d   : > { %v1361_v49 = vpop.f32.mrf.mxu2 }
 0x16e   : > { %v5405_v5 = vadd.f32 %v1361_v49, %v1141_v57  ;;  %v1143_v41 = vpop.f32.mrf.mxu1  ;;  %v5413_v36 = vpop.f32.mrf.mxu0  ;;  %v5420_v57 = vunpack.c.l.b16 %v2582_v42  ;;  %v5422_v49 = vld [vmem:[#allocation2 + $0xc7] sm:$0xff]  ;;  %v1053_v53 = vpack.c.b16 %v1036_v9, %v1035_v21  ;;  %v5445_v21 = vunpack.c.l.b16 %v1915_v47 }
 0x16f   : > { %6779 = vst [vmem:[#allocation47_spill] sm:$0xff] %v5413_v36  ;;  %v1882_v0 = vsel %vm5261_vm2, %v5422_v49, 0.0  ;;  %v638_v9 = vadd.s32 192, %v4786_v10 }
 0x170   : > { %6776 = vst [vmem:[#allocation46_spill] sm:$0xff] %v5405_v5  ;;  %v5424_v5 = vunpack.c.l.b16 %v1573_v2  ;;  %v2654_v2 = vpack.c.b16 %v2625_v33, %v4972_v3  ;;  %v1914_v58 = vpack.c.bf16 %v1882_v0, %v1882_v0 }
 0x171   : > { %4480 = vmatmul.msk.bf16.gmra.mxu0 %vm6780_vm11, %v1998_v6  ;;  %vm6784_vm11 = vmmov %vm6768_vm5  ;;  %v670_v22 = vand.u32 15, %v638_v9 }
 0x172   : > { %6781 = vst [vmem:[#allocation48_spill] sm:$0xff] %v5424_v5 }
 0x175   : > { %v1363_v36 = vpop.f32.mrf.mxu2 }
 0x176   : > { %v5426_v34 = vadd.f32 %v1363_v36, %v1143_v41  ;;  %v1146_v6 = vpop.f32.mrf.mxu1  ;;  %v5431_v42 = vpop.f32.mrf.mxu0  ;;  %v744_v36 = vld [vmem:[%s6612_s3 + $0x4] sm:$0x3]  ;;  %v677_v41 = vand.u32 15, %v645_v50  ;;  %v1978_v50 = vunpack.c.l.b16 %v1914_v58 }
 0x177   : > { %6783 = vst [vmem:[#allocation50_spill] sm:$0xff] %v5431_v42  ;;  %v1705_v17 = vsel %vm6786_vm6, %v744_v36, 0  ;;  %v5453_v42 = vld [vmem:[#allocation2 + $0x101] sm:$0xff]  ;;  %v6788_v36 = vmov 0 }
 0x178   : > { %6782 = vst [vmem:[#allocation49_spill] sm:$0xff] %v5426_v34  ;;  %1714 = vmatpush.bf16.msrb.mxu3 %v1705_v17  ;;  %vm5455_vm6 = vcmp.ne.s32.totalorder %v677_v41, 15  ;;  %v1999_v17 = vpack.c.b16 %v5445_v21, %v1978_v50  ;;  %v973_v34 = vpack.c.bf16 %v941_v39, %v941_v39 }
 0x179   : > { %4436 = vmatmul.msk.bf16.gmra.mxu3 %vm6768_vm5, %v1053_v53  ;;  %4488 = vmatmul.msk.bf16.gmra.mxu1 %vm6784_vm11, %v4945_v38  ;;  %v942_v53 = vld [vmem:[#allocation2 + $0x100] sm:$0xff]  ;;  %v2531_v38 = vsel %vm4953_vm10, %v4994_v51, 0.0  ;;  %v6789_v36 = vsel %vm5455_vm6, 4294967295, %v6788_v36  ;;  %v1543_v51 = vsel %vm5455_vm6, %v5453_v42, 0.0 }
 0x17a   : > { %4504 = vmatmul.msk.bf16.gmra.mxu2 %vm6785_vm9, %v2654_v2  ;;  %v2584_v2 = vpack.c.bf16 %v2520_v19, %v2520_v19  ;;  %6790 = vst [vmem:[#allocation52_spill] sm:$0xff] %v6789_v36  ;;  %v974_v13 = vpack.c.bf16 %v942_v53, %v942_v53  ;;  %v2563_v44 = vpack.c.bf16 %v2531_v38, %v2531_v38  ;;  %vm6792_vm9 = vmmov %vm6768_vm5  ;;  %v5466_v19 = vld [vmem:[#allocation2 + $0xd7] sm:$0xff]  ;;  %v1037_v41 = vunpack.c.l.b16 %v973_v34  ;;  %v1853_v38 = vld [vmem:[#allocation2 + $0xdf] sm:$0xff] }
 0x17b   : > { %v1575_v58 = vpack.c.bf16 %v1543_v51, %v1543_v51  ;;  %vm5470_vm5 = vcmp.ne.s32.totalorder %v670_v22, 0  ;;  %vm6799_vm11 = vmmov %vm6792_vm9 }
 0x17c   : > { %v2627_v53 = vunpack.c.l.b16 %v2563_v44  ;;  %v1884_v50 = vsel %vm5470_vm5, %v5466_v19, 0.0  ;;  %vm6800_vm2 = vmmov %vm6792_vm9 }
 0x17d   : > { %v1366_v33 = vpop.f32.mrf.mxu2  ;;  %v5474_v39 = vunpack.c.l.b16 %v1575_v58  ;;  %v1916_v51 = vpack.c.bf16 %v1884_v50, %v1884_v50 }
 0x17e   : > { %v5451_v0 = vadd.f32 %v1366_v33, %v1146_v6  ;;  %v1148_v47 = vpop.f32.mrf.mxu1  ;;  %v5459_v5 = vpop.f32.mrf.mxu0  ;;  %v5468_v6 = vunpack.c.l.b16 %v2584_v2  ;;  %v1038_v33 = vunpack.c.l.b16 %v974_v13  ;;  %v2655_v58 = vpack.c.b16 %v2627_v53, %v5015_v16  ;;  %v2184_v53 = vld [vmem:[#allocation2 + $0x58] sm:$0xff] }
 0x17f   : > { %6791 = vst [vmem:[#allocation53_spill] sm:$0xff] %v5459_v5  ;;  %v6793_v5 = vmov 0  ;;  %v1980_v44 = vunpack.c.l.b16 %v1916_v51 }
 0x180   : > { %6787 = vst [vmem:[#allocation51_spill] sm:$0xff] %v5451_v0  ;;  %v6794_v5 = vsel %vm5470_vm5, 4294967295, %v6793_v5  ;;  %v1054_v22 = vpack.c.b16 %v1038_v33, %v1037_v41  ;;  %v1917_v0 = vpack.c.bf16 %v1853_v38, %v1853_v38  ;;  %v2533_v41 = vsel %vm4996_vm12, %v5034_v8, 0.0 }
 0x181   : > { %4481 = vmatmul.msk.bf16.gmra.mxu0 %vm6792_vm9, %v1999_v17  ;;  %6795 = vst [vmem:[#allocation54_spill] sm:$0xff] %v6794_v5  ;;  %v3563_v33 = vsel %vm5348_vm3, %v5453_v42, 0.0  ;;  %v2565_v51 = vpack.c.bf16 %v2533_v41, %v2533_v41 }
 0x182   : > { %6796 = vst [vmem:[#allocation55_spill] sm:$0xff] %v5474_v39  ;;  %v2185_v39 = vld [vmem:[#allocation2 + $0x60] sm:$0xff]  ;;  %v3595_v38 = vpack.c.bf16 %v3563_v33, %v3563_v33  ;;  %v6804_v33 = vmov 0 }
 0x185   : > { %v1368_v9 = vpop.f32.mrf.mxu2 }
 0x186   : > { %v5479_v17 = vadd.f32 %v1368_v9, %v1148_v47  ;;  %v1151_v34 = vpop.f32.mrf.mxu1  ;;  %v5483_v13 = vpop.f32.mrf.mxu0  ;;  %v5490_v47 = vunpack.c.l.b16 %v1917_v0  ;;  %v640_v9 = vadd.s32 208, %v4786_v10  ;;  %v871_v0 = vsel %vm5470_vm5, %v5422_v49, 0.0  ;;  %vm6809_vm5 = vmmov %vm6800_vm2 }
 0x187   : > { %6798 = vst [vmem:[#allocation57_spill] sm:$0xff] %v5483_v13  ;;  %v903_v8 = vpack.c.bf16 %v871_v0, %v871_v0 }
 0x188   : > { %6797 = vst [vmem:[#allocation56_spill] sm:$0xff] %v5479_v17  ;;  %v1854_v17 = vld [vmem:[#allocation2 + $0xe7] sm:$0xff] }
 0x189   : > { %4437 = vmatmul.msk.bf16.gmra.mxu3 %vm6799_vm11, %v1054_v22  ;;  %4489 = vmatmul.msk.bf16.gmra.mxu1 %vm6792_vm9, %v4988_v37  ;;  %v672_v22 = vand.u32 15, %v640_v9  ;;  %vm6808_vm9 = vmmov %vm6800_vm2  ;;  %v6977_v36 = vld [vmem:[#allocation55_spill] sm:$0xff] }
 0x18a   : > { %4505 = vmatmul.msk.bf16.gmra.mxu2 %vm6800_vm2, %v2655_v58  ;;  %v5507_v58 = vunpack.c.l.b16 %v3595_v38  ;;  %v1252_v38 = vunpack.c.l.b16 %v903_v8  ;;  %v2187_v8 = vld [vmem:[#allocation2 + $0x70] sm:$0xff] }
 0x18b   : > { %vm5512_vm11 = vcmp.ne.s32.totalorder %v672_v22, 0 }
 0x18c   : > { %6803 = vst [vmem:[#allocation60_spill] sm:$0xff] %v5507_v58  ;;  %v6805_v33 = vsel %vm5512_vm11, 4294967295, %v6804_v33  ;;  %v1886_v9 = vsel %vm5512_vm11, %v1854_v17, 0.0 }
 0x18d   : > { %v1371_v2 = vpop.f32.mrf.mxu2  ;;  %6806 = vst [vmem:[#allocation61_spill] sm:$0xff] %v6805_v33  ;;  %v5543_v33 = vld [vmem:[#allocation2 + $0xf7] sm:$0xff] }
 0x18e   : > { %v5493_v13 = vadd.f32 %v1371_v2, %v1151_v34  ;;  %v1153_v37 = vpop.f32.mrf.mxu1  ;;  %v5504_v50 = vpop.f32.mrf.mxu0  ;;  %v2000_v2 = vpack.c.b16 %v5490_v47, %v1980_v44  ;;  %v2217_v34 = vpack.c.bf16 %v2185_v39, %v2185_v39  ;;  %v2629_v44 = vunpack.c.l.b16 %v2565_v51  ;;  %v1855_v39 = vld [vmem:[#allocation2 + $0xef] sm:$0xff] }
 0x18f   : > { %6802 = vst [vmem:[#allocation59_spill] sm:$0xff] %v5504_v50  ;;  %v1919_v22 = vpack.c.bf16 %v1855_v39, %v1855_v39  ;;  %v873_v51 = vsel %vm5512_vm11, %v5466_v19, 0.0  ;;  %vm6818_vm11 = vmmov %vm6800_vm2 }
 0x190   : > { %6801 = vst [vmem:[#allocation58_spill] sm:$0xff] %v5493_v13  ;;  %v2216_v13 = vpack.c.bf16 %v2184_v53, %v2184_v53  ;;  %v2281_v49 = vunpack.c.l.b16 %v2217_v34  ;;  %v1918_v34 = vpack.c.bf16 %v1886_v9, %v1886_v9  ;;  %v2656_v5 = vpack.c.b16 %v2629_v44, %v5055_v35  ;;  %v2186_v9 = vld [vmem:[#allocation2 + $0x68] sm:$0xff] }
 0x191   : > { %4482 = vmatmul.msk.bf16.gmra.mxu0 %vm6800_vm2, %v2000_v2  ;;  %v1272_v2 = vpack.c.b16 %v5445_v21, %v1252_v38  ;;  %v642_v21 = vadd.s32 224, %v4786_v10  ;;  %v2535_v44 = vsel %vm5036_vm14, %v5074_v61, 0.0  ;;  %v905_v38 = vpack.c.bf16 %v873_v51, %v873_v51 }
 0x192   : > { %v2280_v0 = vunpack.c.l.b16 %v2216_v13  ;;  %v5530_v13 = vunpack.c.l.b16 %v1919_v22  ;;  %v2218_v22 = vpack.c.bf16 %v2186_v9, %v2186_v9 }
 0x194   : > { %v5521_v14 = vpack.c.b16 %v2281_v49, %v2280_v0  ;;  %v2219_v0 = vpack.c.bf16 %v2187_v8, %v2187_v8  ;;  %v2282_v8 = vunpack.c.l.b16 %v2218_v22  ;;  %v644_v22 = vadd.s32 240, %v4786_v10 }
 0x195   : > { %v1373_v50 = vpop.f32.mrf.mxu2 }
 0x196   : > { %v5518_v41 = vadd.f32 %v1373_v50, %v1153_v37  ;;  %v1156_v53 = vpop.f32.mrf.mxu1  ;;  %v5524_v58 = vpop.f32.mrf.mxu0  ;;  %v1982_v37 = vunpack.c.l.b16 %v1918_v34  ;;  %v2567_v34 = vpack.c.bf16 %v2535_v44, %v2535_v44 }
 0x197   : > { %6807 = vst [vmem:[#allocation62_spill] sm:$0xff] %v5524_v58  ;;  %v6813_v58 = vmov 0 }
 0x199   : > { %4450 = vmatmul.msk.bf16.vlgmr.msra.gmra.mxu3 %vm6808_vm9, %v1272_v2  ;;  %4490 = vmatmul.msk.bf16.gmra.mxu1 %vm6800_vm2, %v5521_v14  ;;  %v674_v2 = vand.u32 15, %v642_v21 }
 0x19a   : > { %4506 = vmatmul.msk.bf16.gmra.mxu2 %vm6809_vm5, %v2656_v5  ;;  %v2001_v5 = vpack.c.b16 %v5530_v13, %v1982_v37  ;;  %vm6811_vm5 = vmmov %vm6800_vm2  ;;  %v1857_v37 = vld [vmem:[#allocation2 + $0xff] sm:$0xff] }
 0x19b   : > { %vm5547_vm9 = vcmp.ne.s32.totalorder %v674_v2, 0 }
 0x19c   : > { %v6814_v58 = vsel %vm5547_vm9, 4294967295, %v6813_v58  ;;  %v1888_v21 = vsel %vm5547_vm9, %v5543_v33, 0.0 }
 0x19d   : > { %v1376_v50 = vpop.f32.mrf.mxu2  ;;  %6815 = vst [vmem:[#allocation65_spill] sm:$0xff] %v6814_v58  ;;  %v1858_v58 = vld [vmem:[#allocation2 + $0x107] sm:$0xff] }
 0x19e   : > { %v5536_v49 = vadd.f32 %v1376_v50, %v1156_v53  ;;  %v1158_v39 = vpop.f32.mrf.mxu1  ;;  %v5545_v19 = vpop.f32.mrf.mxu0  ;;  %v1254_v53 = vunpack.c.l.b16 %v905_v38  ;;  %v2283_v50 = vunpack.c.l.b16 %v2219_v0  ;;  %v1920_v38 = vpack.c.bf16 %v1888_v21, %v1888_v21  ;;  %v749_v21 = vld [vmem:[%s6612_s3 + $0xe] sm:$0x3] }
 0x19f   : > { %6812 = vst [vmem:[#allocation64_spill] sm:$0xff] %v5545_v19  ;;  %v1921_v0 = vpack.c.bf16 %v1857_v37, %v1857_v37  ;;  %v2537_v37 = vsel %vm5076_vm0, %v5120_v29, 0.0  ;;  %v6822_v19 = vmov 0  ;;  %vm6828_vm0 = vcmask 1041408  }
 0x1a0   : > { %6810 = vst [vmem:[#allocation63_spill] sm:$0xff] %v5536_v49  ;;  %v2631_v49 = vunpack.c.l.b16 %v2567_v34  ;;  %v1273_v9 = vpack.c.b16 %v5490_v47, %v1254_v53  ;;  %v1984_v34 = vunpack.c.l.b16 %v1920_v38  ;;  %v875_v47 = vsel %vm5547_vm9, %v1854_v17, 0.0  ;;  %v2189_v53 = vld [vmem:[#allocation2 + $0x80] sm:$0xff]  ;;  %vm6827_vm9 = vmmov %vm6800_vm2 }
 0x1a1   : > { %4483 = vmatmul.msk.bf16.gmra.mxu0 %vm6811_vm5, %v2001_v5  ;;  %v5557_v5 = vpack.c.b16 %v2283_v50, %v2282_v8  ;;  %vm6817_vm5 = vmmov %vm6800_vm2  ;;  %v907_v17 = vpack.c.bf16 %v875_v47, %v875_v47 }
 0x1a2   : > { %v2657_v2 = vpack.c.b16 %v2631_v49, %v5097_v54 }
 0x1a3   : > { %v1256_v29 = vunpack.c.l.b16 %v907_v17 }
 0x1a5   : > { %v1378_v61 = vpop.f32.mrf.mxu2 }
 0x1a6   : > { %v5554_v51 = vadd.f32 %v1378_v61, %v1158_v39  ;;  %v1161_v44 = vpop.f32.mrf.mxu1  ;;  %v5564_v39 = vunpack.c.l.b16 %v1921_v0  ;;  %v5569_v50 = vpop.f32.mrf.mxu0  ;;  %v2221_v0 = vpack.c.bf16 %v2189_v53, %v2189_v53 }
 0x1a7   : > { %6819 = vst [vmem:[#allocation67_spill] sm:$0xff] %v5569_v50 }
 0x1a8   : > { %6816 = vst [vmem:[#allocation66_spill] sm:$0xff] %v5554_v51  ;;  %v2002_v38 = vpack.c.b16 %v5564_v39, %v1984_v34  ;;  %v2285_v50 = vunpack.c.l.b16 %v2221_v0 }
 0x1a9   : > { %4451 = vmatmul.msk.bf16.gmra.mxu3 %vm6800_vm2, %v1273_v9  ;;  %4491 = vmatmul.msk.bf16.gmra.mxu1 %vm6817_vm5, %v5557_v5  ;;  %v2188_v9 = vld [vmem:[#allocation2 + $0x78] sm:$0xff] }
 0x1aa   : > { %4507 = vmatmul.msk.bf16.gmra.mxu2 %vm6818_vm11, %v2657_v2  ;;  %vm6821_vm11 = vcmask 1041408   ;;  %v676_v2 = vand.u32 15, %v644_v22 }
 0x1ab   : > { %v3381_v10 = vsel %vm6821_vm11, %v749_v21, 0  ;;  %v1859_v21 = vld [vmem:[#allocation2 + $0x10f] sm:$0xff]  ;;  %vm6826_vm11 = vmmov %vm6800_vm2 }
 0x1ac   : > { %3390 = vmatpush.bf16.msra.mxu0 %v3381_v10  ;;  %vm5582_vm5 = vcmp.ne.s32.totalorder %v676_v2, 0  ;;  %v1923_v17 = vpack.c.bf16 %v1859_v21, %v1859_v21  ;;  %v2191_v2 = vld [vmem:[#allocation2 + $0x90] sm:$0xff]  ;;  %v2190_v21 = vld [vmem:[#allocation2 + $0x88] sm:$0xff] }
 0x1ad   : > { %v1381_v61 = vpop.f32.mrf.mxu2  ;;  %v6823_v19 = vsel %vm5582_vm5, 4294967295, %v6822_v19  ;;  %v1890_v34 = vsel %vm5582_vm5, %v1858_v58, 0.0  ;;  %v748_v58 = vld [vmem:[%s6612_s3 + $0xc] sm:$0x3] }
 0x1ae   : > { %v5571_v49 = vadd.f32 %v1381_v61, %v1161_v44  ;;  %v1163_v8 = vpop.f32.mrf.mxu1  ;;  %v2569_v44 = vpack.c.bf16 %v2537_v37, %v2537_v37  ;;  %v2220_v61 = vpack.c.bf16 %v2188_v9, %v2188_v9  ;;  %6824 = vst [vmem:[#allocation69_spill] sm:$0xff] %v6823_v19  ;;  %v5590_v37 = vpop.f32.mrf.mxu0  ;;  %v1274_v9 = vpack.c.b16 %v5530_v13, %v1256_v29 }
 0x1af   : > { %6825 = vst [vmem:[#allocation70_spill] sm:$0xff] %v5590_v37  ;;  %v3065_v13 = vsel %vm6828_vm0, %v748_v58, 0  ;;  %vm6831_vm0 = vmmov %vm6800_vm2  ;;  %v1417_v37 = vld [vmem:[#allocation2 + $0x11] sm:$0xff] }
 0x1b0   : > { %6820 = vst [vmem:[#allocation68_spill] sm:$0xff] %v5571_v49  ;;  %v2633_v51 = vunpack.c.l.b16 %v2569_v44  ;;  %v2284_v22 = vunpack.c.l.b16 %v2220_v61  ;;  %3074 = vmatpush.bf16.msra.mxu3 %v3065_v13  ;;  %v2539_v61 = vsel %vm5122_vm8, %v5168_v1, 0.0 }
 0x1b1   : > { %4484 = vmatmul.msk.bf16.gmra.mxu0 %vm6800_vm2, %v2002_v38  ;;  %v1922_v38 = vpack.c.bf16 %v1890_v34, %v1890_v34 }
 0x1b2   : > { %v5593_v10 = vpack.c.b16 %v2285_v50, %v2284_v22  ;;  %v2658_v0 = vpack.c.b16 %v2633_v51, %v5141_v30  ;;  %v877_v51 = vsel %vm5582_vm5, %v5543_v33, 0.0  ;;  %v750_v33 = vld [vmem:[%s6612_s3 + $0x10] sm:$0x3] }
 0x1b3   : > { %v909_v22 = vpack.c.bf16 %v877_v51, %v877_v51 }
 0x1b5   : > { %v1383_v49 = vpop.f32.mrf.mxu2  ;;  %v1258_v58 = vunpack.c.l.b16 %v909_v22 }
 0x1b6   : > { %v5588_v47 = vadd.f32 %v1383_v49, %v1163_v8  ;;  %v1166_v53 = vpop.f32.mrf.mxu1  ;;  %v1986_v49 = vunpack.c.l.b16 %v1922_v38  ;;  %v1987_v8 = vunpack.c.l.b16 %v1923_v17  ;;  %v2571_v38 = vpack.c.bf16 %v2539_v61, %v2539_v61  ;;  %v5612_v17 = vpop.f32.mrf.mxu0  ;;  %v3188_v61 = vld [vmem:[#allocation2 + $0x28] sm:$0xff] }
 0x1b7   : > { %6830 = vst [vmem:[#allocation72_spill] sm:$0xff] %v5612_v17  ;;  %v3220_v22 = vpack.c.bf16 %v3188_v61, %v3188_v61 }
 0x1b8   : > { %v2003_v34 = vpack.c.b16 %v1987_v8, %v1986_v49  ;;  %v3189_v49 = vld [vmem:[#allocation2 + $0x30] sm:$0xff] }
 0x1b9   : > { %4452 = vmatmul.msk.bf16.gmra.mxu3 %vm6826_vm11, %v1274_v9  ;;  %4492 = vmatmul.msk.bf16.gmra.mxu1 %vm6800_vm2, %v5593_v10  ;;  %v2223_v9 = vpack.c.bf16 %v2191_v2, %v2191_v2  ;;  %v3221_v19 = vpack.c.bf16 %v3189_v49, %v3189_v49  ;;  %vm6834_vm11 = vmmov %vm6831_vm0 }
 0x1ba   : > { %4508 = vmatmul.msk.bf16.gmra.mxu2 %vm6827_vm9, %v2658_v0  ;;  %v2222_v0 = vpack.c.bf16 %v2190_v21, %v2190_v21  ;;  %vm6832_vm9 = vcmask 1041408   ;;  %vm6835_vm2 = vmmov %vm6831_vm0 }
 0x1bb   : > { %v2287_v13 = vunpack.c.l.b16 %v2223_v9  ;;  %v3285_v9 = vunpack.c.l.b16 %v3221_v19 }
 0x1bc   : > { %v2286_v51 = vunpack.c.l.b16 %v2222_v0  ;;  %v1416_v0 = vld [vmem:[#allocation2 + $0x9] sm:$0xff] }
 0x1bd   : > { %v1386_v50 = vpop.f32.mrf.mxu2 }
 0x1be   : > { %v5607_v44 = vadd.f32 %v1386_v50, %v1166_v53  ;;  %v1168_v29 = vpop.f32.mrf.mxu1  ;;  %v3729_v53 = vsel %vm6832_vm9, %v750_v33, 0  ;;  %v2635_v50 = vunpack.c.l.b16 %v2571_v38  ;;  %v5622_v21 = vpack.c.b16 %v2287_v13, %v2286_v51  ;;  %v2193_v33 = vld [vmem:[#allocation2 + $0xa0] sm:$0xff]  ;;  %vm6838_vm9 = vmmov %vm6831_vm0 }
 0x1bf   : > { %3738 = vmatpush.bf16.msra.mxu1 %v3729_v53  ;;  %v2541_v13 = vsel %vm5170_vm13, %v5216_v20, 0.0  ;;  %v1544_v51 = vpack.c.bf16 %v1416_v0, %v1416_v0  ;;  %v2225_v61 = vpack.c.bf16 %v2193_v33, %v2193_v33 }
 0x1c0   : > { %6829 = vst [vmem:[#allocation71_spill] sm:$0xff] %v5607_v44  ;;  %v2659_v17 = vpack.c.b16 %v2635_v50, %v5191_v24  ;;  %v2192_v50 = vld [vmem:[#allocation2 + $0x98] sm:$0xff]  ;;  %v2573_v19 = vpack.c.bf16 %v2541_v13, %v2541_v13 }
 0x1c1   : > { %4485 = vmatmul.msk.bf16.gmra.mxu0 %vm6831_vm0, %v2003_v34  ;;  %v1275_v34 = vpack.c.b16 %v5564_v39, %v1258_v58  ;;  %v1513_v39 = vsel %vm4897_vm7, %v1417_v37, 0.0  ;;  %v3284_v58 = vunpack.c.l.b16 %v3220_v22  ;;  %v2224_v55 = vpack.c.bf16 %v2192_v50, %v2192_v50  ;;  %v3191_v22 = vld [vmem:[#allocation2 + $0x40] sm:$0xff]  ;;  %vm6840_vm7 = vmmov %vm6831_vm0 }
 0x1c2   : > { %v1545_v49 = vpack.c.bf16 %v1513_v39, %v1513_v39  ;;  %v1608_v37 = vunpack.c.l.b16 %v1544_v51  ;;  %v3223_v33 = vpack.c.bf16 %v3191_v22, %v3191_v22 }
 0x1c3   : > { %v2288_v20 = vunpack.c.l.b16 %v2224_v55 }
 0x1c5   : > { %v1388_v1 = vpop.f32.mrf.mxu2 }
 0x1c6   : > { %v5619_v8 = vadd.f32 %v1388_v1, %v1168_v29  ;;  %v1171_v2 = vpop.f32.mrf.mxu1  ;;  %v5629_v29 = vpop.f32.mrf.mxu0 }
 0x1c7   : > { %6836 = vst [vmem:[#allocation74_spill] sm:$0xff] %v5629_v29  ;;  %v2289_v29 = vunpack.c.l.b16 %v2225_v61  ;;  %v2194_v61 = vld [vmem:[#allocation2 + $0xa8] sm:$0xff] }
 0x1c8   : > { %6833 = vst [vmem:[#allocation73_spill] sm:$0xff] %v5619_v8 }
 0x1c9   : > { %4453 = vmatmul.msk.bf16.gmra.mxu3 %vm6834_vm11, %v1275_v34  ;;  %4493 = vmatmul.msk.bf16.gmra.mxu1 %vm6835_vm2, %v5622_v21  ;;  %v1609_v34 = vunpack.c.l.b16 %v1545_v49  ;;  %v5645_v0 = vpack.c.b16 %v2289_v29, %v2288_v20  ;;  %vm6841_vm11 = vmmov %vm6831_vm0  ;;  %v2195_v49 = vld [vmem:[#allocation2 + $0xb0] sm:$0xff]  ;;  %v2543_v29 = vsel %vm5218_vm15, %v5327_v18, 0.0  ;;  %v3192_v18 = vld [vmem:[#allocation2 + $0x48] sm:$0xff] }
 0x1ca   : > { %4509 = vmatmul.msk.bf16.gmra.mxu2 %vm6831_vm0, %v2659_v17  ;;  %v3316_v17 = vpack.c.b16 %v3285_v9, %v3284_v58  ;;  %v3190_v9 = vld [vmem:[#allocation2 + $0x38] sm:$0xff]  ;;  %vm6842_vm2 = vmmov %vm6831_vm0 }
 0x1cb   : > { %v1640_v39 = vpack.c.b16 %v1609_v34, %v1608_v37  ;;  %v3222_v13 = vpack.c.bf16 %v3190_v9, %v3190_v9  ;;  %v2227_v37 = vpack.c.bf16 %v2195_v49, %v2195_v49  ;;  %v2575_v34 = vpack.c.bf16 %v2543_v29, %v2543_v29  ;;  %v3193_v9 = vld [vmem:[#allocation2 + $0x50] sm:$0xff] }
 0x1cc   : > { %v5669_v49 = vld [vmem:[#allocation2 + $0x111] sm:$0xff] }
 0x1cd   : > { %v1391_v38 = vpop.f32.mrf.mxu2  ;;  %v2639_v20 = vunpack.c.l.b16 %v2575_v34 }
 0x1ce   : > { %v5633_v53 = vadd.f32 %v1391_v38, %v1171_v2  ;;  %v1173_v1 = vpop.f32.mrf.mxu1  ;;  %v2637_v38 = vunpack.c.l.b16 %v2573_v19 }
 0x1d0   : > { %6837 = vst [vmem:[#allocation75_spill] sm:$0xff] %v5633_v53  ;;  %v5639_v53 = vpop.f32.mrf.mxu0  ;;  %v2660_v58 = vpack.c.b16 %v2637_v38, %v5237_v26  ;;  %v2291_v38 = vunpack.c.l.b16 %v2227_v37  ;;  %v3224_v37 = vpack.c.bf16 %v3192_v18, %v3192_v18  ;;  %v2196_v18 = vld [vmem:[#allocation2 + $0xb8] sm:$0xff] }
 0x1d1   : > { %4534 = vmatmul.msk.bf16.vlgmr.msra.gmra.mxu0 %vm6838_vm9, %v3316_v17  ;;  %6839 = vst [vmem:[#allocation76_spill] sm:$0xff] %v5639_v53  ;;  %v3286_v17 = vunpack.c.l.b16 %v3222_v13  ;;  %v3225_v53 = vpack.c.bf16 %v3193_v9, %v3193_v9  ;;  %vm6849_vm9 = vmmov %vm6831_vm0 }
 0x1d3   : > { %v3289_v34 = vunpack.c.l.b16 %v3225_v53 }
 0x1d5   : > { %v1393_v2 = vpop.f32.mrf.mxu2 }
 0x1d6   : > { %v5641_v8 = vadd.f32 %v1393_v2, %v1173_v1  ;;  %v5643_v44 = vpop.f32.mrf.mxu1  ;;  %v3287_v1 = vunpack.c.l.b16 %v3223_v33  ;;  %v2226_v2 = vpack.c.bf16 %v2194_v61, %v2194_v61  ;;  %v2522_v33 = vld [vmem:[#allocation2 + $0x109] sm:$0xff] }
 0x1d7   : > { %v6847_v61 = vld [vmem:[#allocation7_spill] sm:$0xff] }
 0x1d8   : > { %v5659_v19 = vpop.f32.mrf.mxu0  ;;  %v3317_v55 = vpack.c.b16 %v3287_v1, %v3286_v17  ;;  %v2661_v1 = vpack.c.b16 %v2639_v20, %v5365_v28  ;;  %v2586_v17 = vpack.c.bf16 %v2522_v33, %v2522_v33  ;;  %v2197_v20 = vld [vmem:[#allocation2 + $0xc0] sm:$0xff]  ;;  %v2545_v33 = vsel %vm5329_vm1, %v5333_v12, 0.0 }
 0x1d9   : > { %4454 = vmatmul.msk.bf16.vlgmr.msrb.gmra.mxu3 %vm6840_vm7, %v1640_v39  ;;  %4494 = vmatmul.msk.bf16.gmra.mxu1 %vm6841_vm11, %v5645_v0  ;;  %6844 = vst [vmem:[#allocation78_spill] sm:$0xff] %v5659_v19  ;;  %v2290_v39 = vunpack.c.l.b16 %v2226_v2  ;;  %vm6850_vm7 = vmmov %vm6831_vm0  ;;  %v3565_v2 = vsel %vm5409_vm4, %v5669_v49, 0.0 }
 0x1da   : > { %4510 = vmatmul.msk.bf16.gmra.mxu2 %vm6842_vm2, %v2660_v58  ;;  %vm6851_vm11 = vmmov %vm6831_vm0  ;;  %v5685_v9 = vunpack.c.l.b16 %v2586_v17  ;;  %v2228_v17 = vpack.c.bf16 %v2196_v18, %v2196_v18 }
 0x1db   : > { %v5666_v13 = vpack.c.b16 %v2291_v38, %v2290_v39  ;;  %v3597_v39 = vpack.c.bf16 %v3565_v2, %v3565_v2  ;;  %vm6853_vm2 = vmmov %vm6831_vm0 }
 0x1dc   : > { %v5652_v50 = vpop.f32.mrf.mxu3 }
 0x1de   : > { %v5657_v51 = vpop.f32.mrf.mxu1 }
 0x1df   : > { %6843 = vst [vmem:[#allocation77_spill] sm:$0xff] %v5657_v51  ;;  %v2292_v51 = vunpack.c.l.b16 %v2228_v17 }
 0x1e0   : > { %v5671_v29 = vpop.f32.mrf.mxu0 }
 0x1e1   : > { %4535 = vmatmul.msk.bf16.gmra.mxu0 %vm6831_vm0, %v3317_v55  ;;  %6846 = vst [vmem:[#allocation80_spill] sm:$0xff] %v5671_v29  ;;  %v6848_v55 = vpack.c.b16 %v6847_v61, %v4875_v25  ;;  %v3288_v25 = vunpack.c.l.b16 %v3224_v37  ;;  %v2577_v29 = vpack.c.bf16 %v2545_v33, %v2545_v33 }
 0x1e3   : > { %v3318_v53 = vpack.c.b16 %v3289_v34, %v3288_v25  ;;  %v2641_v12 = vunpack.c.l.b16 %v2577_v29  ;;  %v2199_v29 = vld [vmem:[#allocation2 + $0xd0] sm:$0xff] }
 0x1e4   : > { %v5662_v22 = vpop.f32.mrf.mxu3 }
 0x1e5   : > { %v2662_v34 = vpack.c.b16 %v2641_v12, %v5367_v23 }
 0x1e6   : > { %v5664_v58 = vpop.f32.mrf.mxu1 }
 0x1e7   : > { %6845 = vst [vmem:[#allocation79_spill] sm:$0xff] %v5664_v58 }
 0x1e8   : > { %v5697_v2 = vpop.f32.mrf.mxu0 }
 0x1e9   : > { %4455 = vmatmul.msk.bf16.gmra.mxu3 %vm6849_vm9, %v6848_v55  ;;  %4495 = vmatmul.msk.bf16.gmra.mxu1 %vm6850_vm7, %v5666_v13  ;;  %v2229_v55 = vpack.c.bf16 %v2197_v20, %v2197_v20  ;;  %6854 = vst [vmem:[#allocation81_spill] sm:$0xff] %v5697_v2  ;;  %v6856_v20 = vld [vmem:[#allocation10_spill] sm:$0xff]  ;;  %vm6858_vm9 = vmmov %vm6831_vm0 }
 0x1ea   : > { %4511 = vmatmul.msk.bf16.gmra.mxu2 %vm6851_vm11, %v2661_v1  ;;  %v5692_v1 = vunpack.c.l.b16 %v3597_v39  ;;  %v6857_v25 = vpack.c.b16 %v6856_v20, %v4927_v7  ;;  %vm6859_vm7 = vmmov %vm6831_vm0  ;;  %vm6861_vm11 = vnez %v6763_v52  ;;  %v2231_v7 = vpack.c.bf16 %v2199_v29, %v2199_v29 }
 0x1eb   : > { %v2293_v37 = vunpack.c.l.b16 %v2229_v55  ;;  %v2198_v55 = vld [vmem:[#allocation2 + $0xc8] sm:$0xff] }
 0x1ec   : > { %v5683_v38 = vpop.f32.mrf.mxu3  ;;  %v2295_v12 = vunpack.c.l.b16 %v2231_v7  ;;  %v2201_v7 = vld [vmem:[#allocation2 + $0xe0] sm:$0xff] }
 0x1ed   : > { %v5703_v39 = vpack.c.b16 %v2293_v37, %v2292_v51  ;;  %v2547_v51 = vsel %vm6861_vm11, %v5340_v43, 0.0  ;;  %v2230_v37 = vpack.c.bf16 %v2198_v55, %v2198_v55  ;;  %v2200_v55 = vld [vmem:[#allocation2 + $0xd8] sm:$0xff] }
 0x1ee   : > { %v5690_v61 = vpop.f32.mrf.mxu1  ;;  %v2579_v17 = vpack.c.bf16 %v2547_v51, %v2547_v51  ;;  %v6866_v51 = vld [vmem:[#allocation13_spill] sm:$0xff] }
 0x1ef   : > { %6852 = vst [vmem:[#allocation7_spill] sm:$0xff] %v5690_v61  ;;  %v2294_v19 = vunpack.c.l.b16 %v2230_v37 }
 0x1f0   : > { %v5715_v18 = vpop.f32.mrf.mxu0 }
 0x1f1   : > { %4536 = vmatmul.msk.bf16.gmra.mxu0 %vm6853_vm2, %v3318_v53  ;;  %6860 = vst [vmem:[#allocation10_spill] sm:$0xff] %v5715_v18  ;;  %vm6863_vm2 = vmmov %vm6831_vm0  ;;  %v5732_v43 = vpack.c.b16 %v2295_v12, %v2294_v19  ;;  %v2233_v12 = vpack.c.bf16 %v2201_v7, %v2201_v7  ;;  %v6875_v7 = vld [vmem:[#allocation16_spill] sm:$0xff] }
 0x1f4   : > { %v5699_v58 = vpop.f32.mrf.mxu3 }
 0x1f6   : > { %v5701_v61 = vpop.f32.mrf.mxu1 }
 0x1f7   : > { %6855 = vst [vmem:[#allocation82_spill] sm:$0xff] %v5701_v61 }
 0x1f8   : > { %v5730_v2 = vpop.f32.mrf.mxu0 }
 0x1f9   : > { %4456 = vmatmul.msk.bf16.gmra.mxu3 %vm6831_vm0, %v6857_v25  ;;  %4496 = vmatmul.msk.bf16.gmra.mxu1 %vm6858_vm9, %v5703_v39  ;;  %v2643_v25 = vunpack.c.l.b16 %v2579_v17  ;;  %6865 = vst [vmem:[#allocation85_spill] sm:$0xff] %v5730_v2  ;;  %vm6868_vm9 = vmmov %vm6831_vm0 }
 0x1fa   : > { %4512 = vmatmul.msk.bf16.gmra.mxu2 %vm6859_vm7, %v2662_v34  ;;  %v5724_v34 = vpop.f32.mrf.mxu2  ;;  %vm6869_vm7 = vmmov %vm6831_vm0 }
 0x1fb   : > { %v2663_v29 = vpack.c.b16 %v2643_v25, %v5381_v11 }
 0x1fc   : > { %v5713_v33 = vpop.f32.mrf.mxu3 }
 0x1fe   : > { %v5720_v53 = vpop.f32.mrf.mxu1 }
 0x1ff   : > { %6862 = vst [vmem:[#allocation83_spill] sm:$0xff] %v5720_v53  ;;  %v6867_v53 = vpack.c.b16 %v6866_v51, %v4972_v3  ;;  %v2232_v3 = vpack.c.bf16 %v2200_v55, %v2200_v55  ;;  %v2297_v51 = vunpack.c.l.b16 %v2233_v12  ;;  %v2202_v12 = vld [vmem:[#allocation2 + $0xe8] sm:$0xff] }
 0x200   : > { %v5751_v25 = vpop.f32.mrf.mxu0 }
 0x201   : > { %4537 = vmatmul.msk.bf16.gmra.mxu0 %vm6863_vm2, %v5521_v14  ;;  %vm6870_vm2 = vnez %v6765_v45  ;;  %6873 = vst [vmem:[#allocation87_spill] sm:$0xff] %v5751_v25 }
 0x202   : > { %v2549_v19 = vsel %vm6870_vm2, %v5346_v27, 0.0  ;;  %v5747_v17 = vpop.f32.mrf.mxu2 }
 0x203   : > { %6871 = vst [vmem:[#allocation13_spill] sm:$0xff] %v5747_v17 }
 0x204   : > { %v5726_v20 = vpop.f32.mrf.mxu3 }
 0x206   : > { %v5728_v18 = vpop.f32.mrf.mxu1 }
 0x207   : > { %6864 = vst [vmem:[#allocation84_spill] sm:$0xff] %v5728_v18 }
 0x209   : > { %4457 = vmatmul.msk.bf16.gmra.mxu3 %vm6831_vm0, %v6867_v53  ;;  %4497 = vmatmul.msk.bf16.gmra.mxu1 %vm6868_vm9, %v5732_v43  ;;  %v2581_v53 = vpack.c.bf16 %v2549_v19, %v2549_v19  ;;  %v6876_v19 = vpack.c.b16 %v6875_v7, %v5015_v16  ;;  %vm6877_vm9 = vmmov %vm6831_vm0  ;;  %v2234_v16 = vpack.c.bf16 %v2202_v12, %v2202_v12  ;;  %v6882_v12 = vld [vmem:[#allocation18_spill] sm:$0xff] }
 0x20a   : > { %4513 = vmatmul.msk.bf16.gmra.mxu2 %vm6869_vm7, %v2663_v29  ;;  %v2296_v29 = vunpack.c.l.b16 %v2232_v3  ;;  %v5761_v17 = vpop.f32.mrf.mxu2  ;;  %vm6878_vm7 = vmmov %vm6831_vm0 }
 0x20b   : > { %v2645_v18 = vunpack.c.l.b16 %v2581_v53  ;;  %v2203_v53 = vld [vmem:[#allocation2 + $0xf0] sm:$0xff] }
 0x20c   : > { %v5742_v14 = vpop.f32.mrf.mxu3  ;;  %v5759_v27 = vpack.c.b16 %v2297_v51, %v2296_v29  ;;  %v2235_v51 = vpack.c.bf16 %v2203_v53, %v2203_v53  ;;  %v6883_v53 = vpack.c.b16 %v6882_v12, %v5055_v35  ;;  %v2553_v35 = vsel %vm5409_vm4, %v5453_v42, 0.0  ;;  %vm6893_vm4 = vmmov %vm6831_vm0 }
 0x20d   : > { %v2664_v55 = vpack.c.b16 %v2645_v18, %v5387_v4  ;;  %v2551_v18 = vsel %vm5348_vm3, %v5407_v32, 0.0  ;;  %vm6884_vm3 = vmmov %vm6831_vm0 }
 0x20e   : > { %v5749_v37 = vpop.f32.mrf.mxu1  ;;  %v2583_v7 = vpack.c.bf16 %v2551_v18, %v2551_v18  ;;  %v2299_v25 = vunpack.c.l.b16 %v2235_v51 }
 0x20f   : > { %6872 = vst [vmem:[#allocation86_spill] sm:$0xff] %v5749_v37 }
 0x210   : > { %v2647_v37 = vunpack.c.l.b16 %v2583_v7  ;;  %v2585_v7 = vpack.c.bf16 %v2553_v35, %v2553_v35  ;;  %v2206_v35 = vld [vmem:[#allocation2 + $0x108] sm:$0xff] }
 0x211   : > { %4538 = vmatmul.msk.bf16.gmra.mxu0 %vm6831_vm0, %v5557_v5  ;;  %v5771_v5 = vpop.f32.mrf.mxu0 }
 0x212   : > { %6879 = vst [vmem:[#allocation16_spill] sm:$0xff] %v5771_v5  ;;  %v2298_v5 = vunpack.c.l.b16 %v2234_v16  ;;  %v2665_v32 = vpack.c.b16 %v2647_v37, %v5420_v57 }
 0x214   : > { %v5755_v2 = vpop.f32.mrf.mxu3  ;;  %v5790_v46 = vpack.c.b16 %v2299_v25, %v2298_v5  ;;  %v2205_v25 = vld [vmem:[#allocation2 + $0x100] sm:$0xff] }
 0x215   : > { %v2237_v51 = vpack.c.bf16 %v2205_v25, %v2205_v25  ;;  %v6891_v25 = vld [vmem:[#allocation21_spill] sm:$0xff] }
 0x216   : > { %v5757_v61 = vpop.f32.mrf.mxu1 }
 0x217   : > { %6874 = vst [vmem:[#allocation88_spill] sm:$0xff] %v5757_v61  ;;  %v2301_v12 = vunpack.c.l.b16 %v2237_v51 }
 0x219   : > { %4458 = vmatmul.msk.bf16.gmra.mxu3 %vm6877_vm9, %v6876_v19  ;;  %4498 = vmatmul.msk.bf16.gmra.mxu1 %vm6878_vm7, %v5759_v27  ;;  %vm6880_vm9 = vmmov %vm6831_vm0 }
 0x21a   : > { %4514 = vmatmul.msk.bf16.gmra.mxu2 %vm6831_vm0, %v2664_v55  ;;  %v5783_v55 = vpop.f32.mrf.mxu2  ;;  %vm6885_vm7 = vmmov %vm6831_vm0 }
 0x21c   : > { %v1396_v3 = vpop.f32.mrf.mxu3 }
 0x21d   : > { %v5774_v29 = vadd.f32 %v1396_v3, %v5652_v50  ;;  %v5785_v50 = vpop.f32.mrf.mxu0 }
 0x21e   : > { %v5779_v19 = vpop.f32.mrf.mxu1  ;;  %6881 = vst [vmem:[#allocation89_spill] sm:$0xff] %v5785_v50  ;;  %v2649_v50 = vunpack.c.l.b16 %v2585_v7 }
 0x220   : > { %v2666_v42 = vpack.c.b16 %v2649_v50, %v5468_v6  ;;  %v2555_v50 = vsel %vm5455_vm6, %v5669_v49, 0.0 }
 0x221   : > { %4539 = vmatmul.msk.bf16.gmra.mxu0 %vm6880_vm9, %v5593_v10  ;;  %vm6888_vm9 = vmmov %vm6831_vm0 }
 0x222   : > { %v5802_v18 = vpop.f32.mrf.mxu2 }
 0x224   : > { %v1398_v61 = vpop.f32.mrf.mxu3 }
 0x225   : > { %v5788_v3 = vadd.f32 %v1398_v61, %v5662_v22  ;;  %v2204_v61 = vld [vmem:[#allocation2 + $0xf8] sm:$0xff]  ;;  %v5810_v37 = vpop.f32.mrf.mxu0 }
 0x226   : > { %v5800_v10 = vpop.f32.mrf.mxu1  ;;  %6887 = vst [vmem:[#allocation90_spill] sm:$0xff] %v5810_v37  ;;  %v2236_v16 = vpack.c.bf16 %v2204_v61, %v2204_v61  ;;  %v6899_v37 = vld [vmem:[#allocation23_spill] sm:$0xff] }
 0x227   : > { %6886 = vst [vmem:[#allocation18_spill] sm:$0xff] %v5800_v10 }
 0x229   : > { %4459 = vmatmul.msk.bf16.gmra.mxu3 %vm6884_vm3, %v6883_v53  ;;  %4499 = vmatmul.msk.bf16.gmra.mxu1 %vm6885_vm7, %v5790_v46  ;;  %vm6894_vm3 = vmmov %vm6831_vm0 }
 0x22a   : > { %4515 = vmatmul.msk.bf16.gmra.mxu2 %vm6831_vm0, %v2665_v32  ;;  %v2300_v32 = vunpack.c.l.b16 %v2236_v16  ;;  %vm6895_vm7 = vmmov %vm6831_vm0  ;;  %v2207_v16 = vld [vmem:[#allocation2 + $0x110] sm:$0xff] }
 0x22c   : > { %v1401_v22 = vpop.f32.mrf.mxu3  ;;  %v5821_v48 = vpack.c.b16 %v2301_v12, %v2300_v32  ;;  %v2239_v32 = vpack.c.bf16 %v2207_v16, %v2207_v16 }
 0x22d   : > { %v5805_v5 = vadd.f32 %v1401_v22, %v5683_v38  ;;  %v5819_v22 = vpop.f32.mrf.mxu2  ;;  %v5824_v61 = vpop.f32.mrf.mxu0 }
 0x22e   : > { %v5814_v10 = vpop.f32.mrf.mxu1  ;;  %6890 = vst [vmem:[#allocation92_spill] sm:$0xff] %v5824_v61 }
 0x22f   : > { %6889 = vst [vmem:[#allocation91_spill] sm:$0xff] %v5814_v10  ;;  %v6978_v10 = vpack.c.b16 %v6977_v36, %v5468_v6  ;;  %v3520_v36 = vld [vmem:[#allocation2 + $0xa9] sm:$0xff] }
 0x231   : > { %4540 = vmatmul.msk.bf16.gmra.mxu0 %vm6888_vm9, %v5622_v21  ;;  %v6892_v21 = vpack.c.b16 %v6891_v25, %v5097_v54  ;;  %v2238_v54 = vpack.c.bf16 %v2206_v35, %v2206_v35  ;;  %vm6901_vm9 = vmmov %vm6831_vm0 }
 0x233   : > { %v2302_v25 = vunpack.c.l.b16 %v2238_v54 }
 0x234   : > { %v1403_v53 = vpop.f32.mrf.mxu3 }
 0x235   : > { %v5817_v38 = vadd.f32 %v1403_v53, %v5699_v58  ;;  %v5841_v12 = vpop.f32.mrf.mxu2  ;;  %v2587_v53 = vpack.c.bf16 %v2555_v50, %v2555_v50  ;;  %v6900_v50 = vpack.c.b16 %v6899_v37, %v5141_v30  ;;  %v3936_v37 = vld [vmem:[%s6614_s5] sm:$0x3] }
 0x236   : > { %v5839_v7 = vpop.f32.mrf.mxu1 }
 0x237   : > { %6896 = vst [vmem:[#allocation21_spill] sm:$0xff] %v5839_v7  ;;  %v6957_v7 = vld [vmem:[#allocation45_spill] sm:$0xff] }
 0x239   : > { %4460 = vmatmul.msk.bf16.gmra.mxu3 %vm6893_vm4, %v6892_v21  ;;  %4500 = vmatmul.msk.bf16.gmra.mxu1 %vm6894_vm3, %v5821_v48  ;;  %v2303_v21 = vunpack.c.l.b16 %v2239_v32  ;;  %vm6902_vm4 = vmmov %vm6831_vm0 }
 0x23a   : > { %4516 = vmatmul.msk.bf16.gmra.mxu2 %vm6895_vm7, %v2666_v42  ;;  %v5845_v42 = vpop.f32.mrf.mxu0  ;;  %vm6903_vm3 = vmmov %vm6831_vm0 }
 0x23b   : > { %6897 = vst [vmem:[#allocation93_spill] sm:$0xff] %v5845_v42  ;;  %v5850_v49 = vpack.c.b16 %v2303_v21, %v2302_v25  ;;  %v6905_v25 = vld [vmem:[#allocation9_spill] sm:$0xff]  ;;  %vm6906_vm7 = vmmov %vm6831_vm0 }
 0x23c   : > { %v1406_v58 = vpop.f32.mrf.mxu3  ;;  %v3569_v21 = vpack.c.bf16 %v6905_v25, %v6905_v25 }
 0x23d   : > { %v5834_v51 = vadd.f32 %v1406_v58, %v5713_v33  ;;  %v2651_v58 = vunpack.c.l.b16 %v2587_v53  ;;  %v3504_v53 = vld [vmem:[#allocation2 + $0x29] sm:$0xff] }
 0x23e   : > { %v5853_v16 = vpop.f32.mrf.mxu1  ;;  %v3568_v30 = vpack.c.bf16 %v3504_v53, %v3504_v53 }
 0x23f   : > { %v2667_v35 = vpack.c.b16 %v2651_v58, %v5685_v9  ;;  %6898 = vst [vmem:[#allocation94_spill] sm:$0xff] %v5853_v16 }
 0x241   : > { %4541 = vmatmul.msk.bf16.gmra.mxu0 %vm6831_vm0, %v5645_v0  ;;  %v5861_v0 = vpop.f32.mrf.mxu2  ;;  %vm6907_vm0 = vcmask 1041408  }
 0x242   : > { %v5864_v54 = vpop.f32.mrf.mxu0 }
 0x243   : > { %6904 = vst [vmem:[#allocation23_spill] sm:$0xff] %v5864_v54 }
 0x244   : > { %v1408_v33 = vpop.f32.mrf.mxu3 }
 0x245   : > { %v5848_v61 = vadd.f32 %v1408_v33, %v5726_v20  ;;  %v4054_v33 = vsel %vm6907_vm0, %v3936_v37, 0  ;;  %v3507_v37 = vld [vmem:[#allocation2 + $0x41] sm:$0xff] }
 0x246   : > { %v5877_v58 = vpop.f32.mrf.mxu1  ;;  %4063 = vmatpush.bf16.msra.mxu2 %v4054_v33 }
 0x247   : > { %6908 = vst [vmem:[#allocation9_spill] sm:$0xff] %v5877_v58  ;;  %v6914_v58 = vld [vmem:[#allocation5_spill] sm:$0xff] }
 0x249   : > { %4461 = vmatmul.msk.bf16.gmra.mxu3 %vm6901_vm9, %v6900_v50  ;;  %4501 = vmatmul.msk.bf16.gmra.mxu1 %vm6902_vm4, %v5850_v49  ;;  %vm6912_vm9 = vmmov %vm6903_vm3 }
 0x24a   : > { %4517 = vmatmul.msk.bf16.gmra.mxu2 %vm6903_vm3, %v2667_v35  ;;  %v3633_v35 = vunpack.c.l.b16 %v3569_v21  ;;  %v5882_v25 = vpop.f32.mrf.mxu0  ;;  %vm6913_vm4 = vmmov %vm6903_vm3  ;;  %vm6915_vm3 = vnez %v6914_v58 }
 0x24b   : > { %6909 = vst [vmem:[#allocation95_spill] sm:$0xff] %v5882_v25  ;;  %v3539_v21 = vsel %vm6915_vm3, %v3507_v37, 0.0  ;;  %v6921_v37 = vld [vmem:[#allocation30_spill] sm:$0xff]  ;;  %vm6923_vm0 = vmmov %vm6913_vm4 }
 0x24c   : > { %v1411_v20 = vpop.f32.mrf.mxu3  ;;  %v3571_v25 = vpack.c.bf16 %v3539_v21, %v3539_v21  ;;  %vm6929_vm3 = vmmov %vm6923_vm0 }
 0x24d   : > { %v5867_v32 = vadd.f32 %v1411_v20, %v5742_v14  ;;  %v3632_v20 = vunpack.c.l.b16 %v3568_v30  ;;  %v3506_v30 = vld [vmem:[#allocation2 + $0x39] sm:$0xff] }
 0x24e   : > { %v5891_v33 = vpop.f32.mrf.mxu1 }
 0x24f   : > { %v3664_v54 = vpack.c.b16 %v3633_v35, %v3632_v20  ;;  %v3635_v20 = vunpack.c.l.b16 %v3571_v25  ;;  %v6927_v25 = vld [vmem:[#allocation29_spill] sm:$0xff] }
 0x251   : > { %4542 = vmatmul.msk.bf16.gmra.mxu0 %vm6906_vm7, %v5666_v13  ;;  %v6910_v13 = vld [vmem:[#allocation26_spill] sm:$0xff]  ;;  %vm6919_vm7 = vmmov %vm6913_vm4 }
 0x252   : > { %v6911_v53 = vpack.c.b16 %v6910_v13, %v5191_v24  ;;  %6916 = vst [vmem:[#allocation26_spill] sm:$0xff] %v5891_v33  ;;  %v5896_v35 = vpop.f32.mrf.mxu0  ;;  %v3570_v24 = vpack.c.bf16 %v3506_v30, %v3506_v30  ;;  %v6922_v33 = vpack.c.b16 %v6921_v37, %v5237_v26  ;;  %v6931_v37 = vld [vmem:[#allocation31_spill] sm:$0xff] }
 0x253   : > { %6918 = vst [vmem:[#allocation5_spill] sm:$0xff] %v5896_v35 }
 0x254   : > { %v1413_v14 = vpop.f32.mrf.mxu3  ;;  %v3634_v13 = vunpack.c.l.b16 %v3570_v24  ;;  %v3508_v24 = vld [vmem:[#allocation2 + $0x49] sm:$0xff] }
 0x255   : > { %v5880_v50 = vadd.f32 %v1413_v14, %v5755_v2  ;;  %v6917_v2 = vld [vmem:[#allocation20_spill] sm:$0xff]  ;;  %v3572_v26 = vpack.c.bf16 %v3508_v24, %v3508_v24 }
 0x256   : > { %v3665_v58 = vpack.c.b16 %v3635_v20, %v3634_v13 }
 0x259   : > { %4462 = vmatmul.msk.bf16.gmra.mxu3 %vm6912_vm9, %v6911_v53  ;;  %4550 = vmatmul.msk.bf16.vlgmr.msra.gmra.mxu1 %vm6913_vm4, %v3664_v54  ;;  %v5902_v53 = vpop.f32.mrf.mxu1  ;;  %vm6924_vm9 = vmmov %vm6923_vm0  ;;  %vm6926_vm4 = vnez %v6696_v60  ;;  %v3636_v60 = vunpack.c.l.b16 %v3572_v26 }
 0x25a   : > { %6920 = vst [vmem:[#allocation20_spill] sm:$0xff] %v5902_v53  ;;  %v5909_v21 = vpop.f32.mrf.mxu0 }
 0x25b   : > { %6925 = vst [vmem:[#allocation30_spill] sm:$0xff] %v5909_v21 }
 0x25c   : > { %v1716_v42 = vpop.f32.mrf.mxu3 }
 0x25d   : > { %v5894_v14 = vadd.f32 %v1716_v42, %v6917_v2  ;;  %v3509_v42 = vld [vmem:[#allocation2 + $0x51] sm:$0xff] }
 0x261   : > { %4543 = vmatmul.msk.bf16.gmra.mxu0 %vm6919_vm7, %v5703_v39  ;;  %v3541_v39 = vsel %vm6926_vm4, %v3509_v42, 0.0  ;;  %v5916_v20 = vpop.f32.mrf.mxu1  ;;  %vm6933_vm7 = vmmov %vm6923_vm0 }
 0x262   : > { %v3573_v35 = vpack.c.bf16 %v3541_v39, %v3541_v39  ;;  %6928 = vst [vmem:[#allocation29_spill] sm:$0xff] %v5916_v20  ;;  %v3511_v39 = vld [vmem:[#allocation2 + $0x61] sm:$0xff]  ;;  %vm6943_vm4 = vmmov %vm6923_vm0 }
 0x263   : > { %v3543_v24 = vsel %vm4953_vm10, %v3511_v39, 0.0  ;;  %vm6942_vm10 = vmmov %vm6923_vm0 }
 0x264   : > { %v5900_v54 = vpop.f32.mrf.mxu3 }
 0x269   : > { %4463 = vmatmul.msk.bf16.gmra.mxu3 %vm6923_vm0, %v6922_v33  ;;  %4551 = vmatmul.msk.bf16.gmra.mxu1 %vm6924_vm9, %v3665_v58  ;;  %v3637_v33 = vunpack.c.l.b16 %v3573_v35  ;;  %v5920_v58 = vpop.f32.mrf.mxu0  ;;  %vm6937_vm9 = vmmov %vm6923_vm0 }
 0x26a   : > { %6930 = vst [vmem:[#allocation96_spill] sm:$0xff] %v5920_v58  ;;  %v6936_v58 = vld [vmem:[#allocation33_spill] sm:$0xff] }
 0x26b   : > { %v3666_v42 = vpack.c.b16 %v3637_v33, %v3636_v60  ;;  %v3575_v33 = vpack.c.bf16 %v3543_v24, %v3543_v24 }
 0x26c   : > { %v1721_v2 = vpop.f32.mrf.mxu3 }
 0x26d   : > { %v5914_v30 = vadd.f32 %v1721_v2, %v6927_v25  ;;  %v6932_v2 = vpack.c.b16 %v5369_v62, %v5365_v28  ;;  %v5930_v25 = vpop.f32.mrf.mxu1  ;;  %v3639_v28 = vunpack.c.l.b16 %v3575_v33 }
 0x26e   : > { %6934 = vst [vmem:[#allocation31_spill] sm:$0xff] %v5930_v25 }
 0x271   : > { %4544 = vmatmul.msk.bf16.gmra.mxu0 %vm6929_vm3, %v5732_v43  ;;  %v5937_v26 = vpop.f32.mrf.mxu0  ;;  %vm6947_vm3 = vmmov %vm6923_vm0 }
 0x274   : > { %v1723_v13 = vpop.f32.mrf.mxu3 }
 0x275   : > { %v5923_v21 = vadd.f32 %v1723_v13, %v6931_v37  ;;  %v3510_v13 = vld [vmem:[#allocation2 + $0x59] sm:$0xff]  ;;  %v5941_v60 = vpop.f32.mrf.mxu1 }
 0x276   : > { %v3574_v62 = vpack.c.bf16 %v3510_v13, %v3510_v13  ;;  %6938 = vst [vmem:[#allocation11_spill] sm:$0xff] %v5941_v60  ;;  %v6945_v60 = vld [vmem:[#allocation35_spill] sm:$0xff] }
 0x278   : > { %v3638_v35 = vunpack.c.l.b16 %v3574_v62 }
 0x279   : > { %4464 = vmatmul.msk.bf16.gmra.mxu3 %vm6933_vm7, %v6932_v2  ;;  %4552 = vmatmul.msk.bf16.gmra.mxu1 %vm6923_vm0, %v3666_v42  ;;  %v6939_v42 = vld [vmem:[#allocation34_spill] sm:$0xff]  ;;  %v5946_v25 = vpop.f32.mrf.mxu0  ;;  %vm6953_vm7 = vmmov %vm6923_vm0 }
 0x27a   : > { %v3667_v39 = vpack.c.b16 %v3639_v28, %v3638_v35 }
 0x27c   : > { %v1726_v43 = vpop.f32.mrf.mxu3 }
 0x27d   : > { %v5935_v20 = vadd.f32 %v1726_v43, %v6936_v58  ;;  %v6940_v58 = vld [vmem:[#allocation41_spill] sm:$0xff]  ;;  %v5958_v62 = vpop.f32.mrf.mxu1 }
 0x27e   : > { %v6941_v43 = vpack.c.b16 %v6940_v58, %v5367_v23  ;;  %6946 = vst [vmem:[#allocation33_spill] sm:$0xff] %v5958_v62  ;;  %v6948_v58 = vld [vmem:[#allocation37_spill] sm:$0xff] }
 0x281   : > { %4545 = vmatmul.msk.bf16.gmra.mxu0 %vm6937_vm9, %v5759_v27  ;;  %v3513_v27 = vld [vmem:[#allocation2 + $0x71] sm:$0xff]  ;;  %vm6960_vm9 = vmmov %vm6923_vm0 }
 0x282   : > { %v3545_v33 = vsel %vm4996_vm12, %v3513_v27, 0.0  ;;  %vm6952_vm12 = vmmov %vm6923_vm0 }
 0x283   : > { %v3577_v28 = vpack.c.bf16 %v3545_v33, %v3545_v33 }
 0x284   : > { %v1728_v37 = vpop.f32.mrf.mxu3 }
 0x285   : > { %v5944_v2 = vadd.f32 %v1728_v37, %v6939_v42  ;;  %v3512_v37 = vld [vmem:[#allocation2 + $0x69] sm:$0xff]  ;;  %v5962_v42 = vpop.f32.mrf.mxu0  ;;  %v3641_v35 = vunpack.c.l.b16 %v3577_v28  ;;  %v5967_v16 = vpop.f32.mrf.mxu1 }
 0x286   : > { %v3576_v23 = vpack.c.bf16 %v3512_v37, %v3512_v37  ;;  %6949 = vst [vmem:[#allocation34_spill] sm:$0xff] %v5967_v16 }
 0x288   : > { %v3640_v13 = vunpack.c.l.b16 %v3576_v23  ;;  %v3514_v23 = vld [vmem:[#allocation2 + $0x79] sm:$0xff] }
 0x289   : > { %4465 = vmatmul.msk.bf16.gmra.mxu3 %vm6942_vm10, %v6941_v43  ;;  %4553 = vmatmul.msk.bf16.gmra.mxu1 %vm6943_vm4, %v3667_v39  ;;  %vm6961_vm10 = vnez %v6719_v63  ;;  %vm6964_vm4 = vmmov %vm6923_vm0 }
 0x28a   : > { %v3668_v27 = vpack.c.b16 %v3641_v35, %v3640_v13 }
 0x28c   : > { %v1731_v24 = vpop.f32.mrf.mxu3 }
 0x28d   : > { %v5956_v53 = vadd.f32 %v1731_v24, %v6945_v60  ;;  %v6950_v60 = vld [vmem:[#allocation44_spill] sm:$0xff]  ;;  %v5976_v28 = vpop.f32.mrf.mxu0  ;;  %v5983_v13 = vpop.f32.mrf.mxu1 }
 0x28e   : > { %v6951_v24 = vpack.c.b16 %v6950_v60, %v5381_v11  ;;  %v3578_v11 = vpack.c.bf16 %v3514_v23, %v3514_v23  ;;  %6955 = vst [vmem:[#allocation41_spill] sm:$0xff] %v5983_v13  ;;  %v6968_v13 = vld [vmem:[#allocation48_spill] sm:$0xff] }
 0x290   : > { %v3642_v15 = vunpack.c.l.b16 %v3578_v11  ;;  %v3516_v11 = vld [vmem:[#allocation2 + $0x89] sm:$0xff] }
 0x291   : > { %4546 = vmatmul.msk.bf16.gmra.mxu0 %vm6947_vm3, %v5790_v46  ;;  %v3515_v46 = vld [vmem:[#allocation2 + $0x81] sm:$0xff]  ;;  %vm6970_vm3 = vmmov %vm6923_vm0 }
 0x292   : > { %v3547_v37 = vsel %vm5036_vm14, %v3515_v46, 0.0  ;;  %vm6959_vm14 = vmmov %vm6923_vm0 }
 0x293   : > { %v3579_v35 = vpack.c.bf16 %v3547_v37, %v3547_v37 }
 0x294   : > { %v1733_v39 = vpop.f32.mrf.mxu3 }
 0x295   : > { %v5965_v43 = vadd.f32 %v1733_v39, %v6948_v58  ;;  %v6954_v39 = vld [vmem:[#allocation39_spill] sm:$0xff]  ;;  %v3643_v60 = vunpack.c.l.b16 %v3579_v35  ;;  %v5988_v46 = vpop.f32.mrf.mxu0  ;;  %v5997_v23 = vpop.f32.mrf.mxu1  ;;  %v6963_v35 = vld [vmem:[#allocation46_spill] sm:$0xff] }
 0x296   : > { %6962 = vst [vmem:[#allocation14_spill] sm:$0xff] %v5997_v23 }
 0x297   : > { %v3669_v62 = vpack.c.b16 %v3643_v60, %v3642_v15  ;;  %v6965_v15 = vld [vmem:[#allocation49_spill] sm:$0xff] }
 0x299   : > { %4466 = vmatmul.msk.bf16.gmra.mxu3 %vm6952_vm12, %v6951_v24  ;;  %4554 = vmatmul.msk.bf16.gmra.mxu1 %vm6953_vm7, %v3668_v27  ;;  %v6956_v24 = vld [vmem:[#allocation42_spill] sm:$0xff]  ;;  %vm6971_vm12 = vmmov %vm6923_vm0 }
 0x29a   : > { %vm6979_vm7 = vmmov %vm6923_vm0 }
 0x29c   : > { %v1736_v33 = vpop.f32.mrf.mxu3 }
 0x29d   : > { %v5979_v58 = vadd.f32 %v1736_v33, %v6954_v39  ;;  %v6958_v33 = vpack.c.b16 %v6957_v7, %v5387_v4  ;;  %v6002_v60 = vpop.f32.mrf.mxu0  ;;  %v3580_v4 = vpack.c.bf16 %v3516_v11, %v3516_v11  ;;  %v6972_v11 = vld [vmem:[#allocation51_spill] sm:$0xff] }
 0x29f   : > { %v3644_v63 = vunpack.c.l.b16 %v3580_v4 }
 0x2a1   : > { %4547 = vmatmul.msk.bf16.gmra.mxu0 %vm6923_vm0, %v5821_v48  ;;  %v3517_v48 = vld [vmem:[#allocation2 + $0x91] sm:$0xff] }
 0x2a2   : > { %v3549_v39 = vsel %vm6961_vm10, %v3517_v48, 0.0  ;;  %v6009_v48 = vpop.f32.mrf.mxu1  ;;  %vm6997_vm10 = vmmov %vm6970_vm3 }
 0x2a3   : > { %6967 = vst [vmem:[#allocation37_spill] sm:$0xff] %v6009_v48 }
 0x2a4   : > { %v1738_v27 = vpop.f32.mrf.mxu3 }
 0x2a5   : > { %v5986_v16 = vadd.f32 %v1738_v27, %v6956_v24  ;;  %v3581_v24 = vpack.c.bf16 %v3549_v39, %v3549_v39  ;;  %v3519_v39 = vld [vmem:[#allocation2 + $0xa1] sm:$0xff] }
 0x2a7   : > { %v3645_v7 = vunpack.c.l.b16 %v3581_v24 }
 0x2a9   : > { %4467 = vmatmul.msk.bf16.gmra.mxu3 %vm6959_vm14, %v6958_v33  ;;  %4555 = vmatmul.msk.bf16.gmra.mxu1 %vm6960_vm9, %v3669_v62  ;;  %v3670_v23 = vpack.c.b16 %v3645_v7, %v3644_v63  ;;  %vm6988_vm14 = vmmov %vm6970_vm3 }
 0x2ac   : > { %v1741_v37 = vpop.f32.mrf.mxu3 }
 0x2ad   : > { %v6000_v27 = vadd.f32 %v1741_v37, %v6963_v35  ;;  %v6969_v37 = vpack.c.b16 %v6968_v13, %v5420_v57  ;;  %v6975_v57 = vld [vmem:[#allocation56_spill] sm:$0xff] }
 0x2b1   : > { %4548 = vmatmul.msk.bf16.gmra.mxu0 %vm6964_vm4, %v5850_v49  ;;  %v3551_v49 = vsel %vm5122_vm8, %v3519_v39, 0.0  ;;  %vm6980_vm8 = vmmov %vm6923_vm0 }
 0x2b2   : > { %v3583_v4 = vpack.c.bf16 %v3551_v49, %v3551_v49 }
 0x2b4   : > { %v1743_v62 = vpop.f32.mrf.mxu3  ;;  %v3647_v63 = vunpack.c.l.b16 %v3583_v4 }
 0x2b5   : > { %v6007_v33 = vadd.f32 %v1743_v62, %v6965_v15  ;;  %v3518_v62 = vld [vmem:[#allocation2 + $0x99] sm:$0xff]  ;;  %v6021_v15 = vpop.f32.mrf.mxu1 }
 0x2b6   : > { %6974 = vst [vmem:[#allocation39_spill] sm:$0xff] %v6021_v15  ;;  %v3582_v7 = vpack.c.bf16 %v3518_v62, %v3518_v62  ;;  %v3553_v62 = vsel %vm5170_vm13, %v3521_v31, 0.0  ;;  %vm6987_vm13 = vmmov %vm6970_vm3 }
 0x2b7   : > { %6966 = vst [vmem:[#allocation35_spill] sm:$0xff] %v6007_v33 }
 0x2b9   : > { %4468 = vmatmul.msk.bf16.gmra.mxu3 %vm6970_vm3, %v6969_v37  ;;  %4556 = vmatmul.msk.bf16.gmra.mxu1 %vm6971_vm12, %v3670_v23  ;;  %v3646_v37 = vunpack.c.l.b16 %v3582_v7  ;;  %v6983_v7 = vld [vmem:[#allocation3_spill] sm:$0xff] }
 0x2ba   : > { %vm6984_vm0 = vnez %v6983_v7  ;;  %v2843_v7 = vld [vmem:[#allocation2 + $0x3f] sm:$0xff] }
 0x2bb   : > { %v3671_v23 = vpack.c.b16 %v3647_v63, %v3646_v37 }
 0x2bc   : > { %v1746_v35 = vpop.f32.mrf.mxu3 }
 0x2bd   : > { %v6019_v24 = vadd.f32 %v1746_v35, %v6972_v11  ;;  %v6031_v39 = vpop.f32.mrf.mxu1  ;;  %v2840_v35 = vld [vmem:[#allocation2 + $0x27] sm:$0xff]  ;;  %v2841_v11 = vld [vmem:[#allocation2 + $0x2f] sm:$0xff] }
 0x2be   : > { %6981 = vst [vmem:[#allocation45_spill] sm:$0xff] %v6031_v39  ;;  %v2872_v63 = vsel %vm6984_vm0, %v2840_v35, 0.0  ;;  %v3523_v35 = vld [vmem:[#allocation2 + $0xc1] sm:$0xff] }
 0x2bf   : > { %6973 = vst [vmem:[#allocation44_spill] sm:$0xff] %v6019_v24  ;;  %v2904_v37 = vpack.c.bf16 %v2872_v63, %v2872_v63  ;;  %v3555_v63 = vsel %vm5218_vm15, %v3523_v35, 0.0  ;;  %vm6996_vm15 = vmmov %vm6970_vm3 }
 0x2c1   : > { %v2968_v40 = vunpack.c.l.b16 %v2904_v37  ;;  %v3587_v37 = vpack.c.bf16 %v3555_v63, %v3555_v63 }
 0x2c4   : > { %v1748_v48 = vpop.f32.mrf.mxu3 }
 0x2c5   : > { %v6024_v13 = vadd.f32 %v1748_v48, %v6975_v57  ;;  %v6982_v48 = vld [vmem:[#allocation58_spill] sm:$0xff]  ;;  %v2905_v57 = vpack.c.bf16 %v2841_v11, %v2841_v11  ;;  %v6040_v24 = vpop.f32.mrf.mxu1  ;;  %v2842_v11 = vld [vmem:[#allocation2 + $0x37] sm:$0xff] }
 0x2c6   : > { %6985 = vst [vmem:[#allocation46_spill] sm:$0xff] %v6040_v24  ;;  %v6994_v24 = vld [vmem:[#allocation66_spill] sm:$0xff] }
 0x2c7   : > { %6976 = vst [vmem:[#allocation42_spill] sm:$0xff] %v6024_v13  ;;  %v2969_v15 = vunpack.c.l.b16 %v2905_v57 }
 0x2c9   : > { %4469 = vmatmul.msk.bf16.gmra.mxu3 %vm6979_vm7, %v6978_v10  ;;  %4557 = vmatmul.msk.bf16.gmra.mxu1 %vm6980_vm8, %v3671_v23  ;;  %v3585_v10 = vpack.c.bf16 %v3553_v62, %v3553_v62  ;;  %v3584_v23 = vpack.c.bf16 %v3520_v36, %v3520_v36  ;;  %v6989_v36 = vld [vmem:[#allocation63_spill] sm:$0xff] }
 0x2cb   : > { %v3649_v13 = vunpack.c.l.b16 %v3585_v10  ;;  %v3648_v31 = vunpack.c.l.b16 %v3584_v23  ;;  %v3522_v10 = vld [vmem:[#allocation2 + $0xb9] sm:$0xff] }
 0x2cc   : > { %v1751_v49 = vpop.f32.mrf.mxu3 }
 0x2cd   : > { %v6036_v4 = vadd.f32 %v1751_v49, %v6982_v48  ;;  %v3000_v49 = vpack.c.b16 %v2969_v15, %v2968_v40  ;;  %v3672_v48 = vpack.c.b16 %v3649_v13, %v3648_v31  ;;  %v6054_v15 = vpop.f32.mrf.mxu1  ;;  %v2907_v13 = vpack.c.bf16 %v2843_v7, %v2843_v7  ;;  %v2844_v7 = vld [vmem:[#allocation2 + $0x47] sm:$0xff] }
 0x2ce   : > { %6993 = vst [vmem:[#allocation51_spill] sm:$0xff] %v6054_v15  ;;  %v3586_v40 = vpack.c.bf16 %v3522_v10, %v3522_v10 }
 0x2cf   : > { %v2971_v31 = vunpack.c.l.b16 %v2907_v13 }
 0x2d0   : > { %v3650_v35 = vunpack.c.l.b16 %v3586_v40 }
 0x2d4   : > { %v1753_v39 = vpop.f32.mrf.mxu3 }
 0x2d5   : > { %v6043_v33 = vadd.f32 %v1753_v39, %v5518_v41  ;;  %v6991_v41 = vld [vmem:[#allocation4_spill] sm:$0xff] }
 0x2d6   : > { %vm6992_vm9 = vnez %v6991_v41  ;;  %v2845_v41 = vld [vmem:[#allocation2 + $0x4f] sm:$0xff] }
 0x2d7   : > { %6986 = vst [vmem:[#allocation49_spill] sm:$0xff] %v6043_v33  ;;  %v2874_v39 = vsel %vm6992_vm9, %v2842_v11, 0.0  ;;  %v3525_v11 = vld [vmem:[#allocation2 + $0xd1] sm:$0xff]  ;;  %v2909_v40 = vpack.c.bf16 %v2845_v41, %v2845_v41 }
 0x2d8   : > { %v2906_v23 = vpack.c.bf16 %v2874_v39, %v2874_v39  ;;  %v3524_v39 = vld [vmem:[#allocation2 + $0xc9] sm:$0xff]  ;;  %v3557_v10 = vsel %vm5329_vm1, %v3525_v11, 0.0  ;;  %vm7003_vm1 = vmmov %vm6970_vm3  ;;  %v2846_v41 = vld [vmem:[#allocation2 + $0x57] sm:$0xff] }
 0x2d9   : > { %4518 = vmatmul.msk.bf16.vlgmr.msra.gmra.mxu3 %vm6987_vm13, %v3000_v49  ;;  %4558 = vmatmul.msk.bf16.gmra.mxu1 %vm6988_vm14, %v3672_v48  ;;  %v3651_v49 = vunpack.c.l.b16 %v3587_v37  ;;  %v6999_v37 = vld [vmem:[#allocation6_spill] sm:$0xff]  ;;  %vm7004_vm3 = vmmov %vm7003_vm1 }
 0x2da   : > { %v2970_v59 = vunpack.c.l.b16 %v2906_v23  ;;  %vm7000_vm4 = vnez %v6999_v37  ;;  %vm7013_vm7 = vmmov %vm7003_vm1 }
 0x2db   : > { %v2876_v23 = vsel %vm7000_vm4, %v2844_v7, 0.0  ;;  %v3527_v7 = vld [vmem:[#allocation2 + $0xe1] sm:$0xff]  ;;  %vm7019_vm0 = vmmov %vm7003_vm1 }
 0x2dc   : > { %v1756_v62 = vpop.f32.mrf.mxu3  ;;  %v3559_v37 = vsel %vm6861_vm11, %v3527_v7, 0.0  ;;  %v6089_v7 = vpop.f32.mrf.mxu2  ;;  %vm7012_vm11 = vmmov %vm7003_vm1 }
 0x2dd   : > { %v6050_v57 = vadd.f32 %v1756_v62, %v6989_v36  ;;  %v3001_v62 = vpack.c.b16 %v2971_v31, %v2970_v59  ;;  %v3673_v36 = vpack.c.b16 %v3651_v49, %v3650_v35  ;;  %v3588_v31 = vpack.c.bf16 %v3524_v39, %v3524_v39  ;;  %vm7024_vm14 = vmmov %vm7019_vm0 }
 0x2de   : > { %v3589_v49 = vpack.c.bf16 %v3557_v10, %v3557_v10  ;;  %v2973_v35 = vunpack.c.l.b16 %v2909_v40  ;;  %v2847_v10 = vld [vmem:[#allocation2 + $0x5f] sm:$0xff]  ;;  %v7006_v40 = vld [vmem:[#allocation71_spill] sm:$0xff]  ;;  %vm7027_vm9 = vmmov %vm7019_vm0 }
 0x2df   : > { %6990 = vst [vmem:[#allocation48_spill] sm:$0xff] %v6050_v57  ;;  %v6059_v57 = vpop.f32.mrf.mxu1  ;;  %vm7034_vm4 = vmmov %vm7019_vm0 }
 0x2e0   : > { %6995 = vst [vmem:[#allocation56_spill] sm:$0xff] %v6059_v57 }
 0x2e4   : > { %v1758_v48 = vpop.f32.mrf.mxu3 }
 0x2e5   : > { %v6057_v33 = vadd.f32 %v1758_v48, %v6994_v24  ;;  %v6998_v24 = vld [vmem:[#allocation68_spill] sm:$0xff]  ;;  %v2908_v48 = vpack.c.bf16 %v2876_v23, %v2876_v23 }
 0x2e7   : > { %v6070_v59 = vpop.f32.mrf.mxu1  ;;  %v2972_v56 = vunpack.c.l.b16 %v2908_v48 }
 0x2e8   : > { %7001 = vst [vmem:[#allocation55_spill] sm:$0xff] %v6070_v59  ;;  %v7010_v59 = vld [vmem:[#allocation73_spill] sm:$0xff] }
 0x2e9   : > { %4519 = vmatmul.msk.bf16.gmra.mxu3 %vm6996_vm15, %v3001_v62  ;;  %4559 = vmatmul.msk.bf16.gmra.mxu1 %vm6997_vm10, %v3673_v36  ;;  %v3652_v62 = vunpack.c.l.b16 %v3588_v31  ;;  %v3653_v36 = vunpack.c.l.b16 %v3589_v49  ;;  %v3002_v11 = vpack.c.b16 %v2973_v35, %v2972_v56  ;;  %v2911_v49 = vpack.c.bf16 %v2847_v10, %v2847_v10  ;;  %v2848_v10 = vld [vmem:[#allocation2 + $0x67] sm:$0xff]  ;;  %vm7032_vm10 = vmmov %vm7019_vm0 }
 0x2ea   : > { %v3591_v35 = vpack.c.bf16 %v3559_v37, %v3559_v37  ;;  %v2849_v37 = vld [vmem:[#allocation2 + $0x6f] sm:$0xff] }
 0x2ec   : > { %v1761_v63 = vpop.f32.mrf.mxu3 }
 0x2ed   : > { %v6066_v13 = vadd.f32 %v1761_v63, %v6998_v24  ;;  %v3674_v63 = vpack.c.b16 %v3653_v36, %v3652_v62  ;;  %v3526_v24 = vld [vmem:[#allocation2 + $0xd9] sm:$0xff]  ;;  %v2975_v36 = vunpack.c.l.b16 %v2911_v49 }
 0x2ee   : > { %v3590_v48 = vpack.c.bf16 %v3526_v24, %v3526_v24 }
 0x2ef   : > { %v6079_v23 = vpop.f32.mrf.mxu1 }
 0x2f0   : > { %7005 = vst [vmem:[#allocation3_spill] sm:$0xff] %v6079_v23  ;;  %v3654_v56 = vunpack.c.l.b16 %v3590_v48  ;;  %v7015_v48 = vld [vmem:[#allocation12_spill] sm:$0xff] }
 0x2f1   : > { %vm7016_vm8 = vnez %v7015_v48  ;;  %v2851_v48 = vld [vmem:[#allocation2 + $0x7f] sm:$0xff] }
 0x2f4   : > { %v1763_v57 = vpop.f32.mrf.mxu3 }
 0x2f5   : > { %v6073_v15 = vadd.f32 %v1763_v57, %v5588_v47  ;;  %v7008_v57 = vld [vmem:[#allocation8_spill] sm:$0xff] }
 0x2f6   : > { %vm7009_vm12 = vnez %v7008_v57  ;;  %v3528_v57 = vld [vmem:[#allocation2 + $0xe9] sm:$0xff] }
 0x2f7   : > { %7002 = vst [vmem:[#allocation58_spill] sm:$0xff] %v6073_v15  ;;  %v2878_v31 = vsel %vm7009_vm12, %v2846_v41, 0.0  ;;  %v6091_v23 = vpop.f32.mrf.mxu1  ;;  %v3529_v41 = vld [vmem:[#allocation2 + $0xf1] sm:$0xff] }
 0x2f8   : > { %v2910_v62 = vpack.c.bf16 %v2878_v31, %v2878_v31  ;;  %v7014_v31 = vld [vmem:[#allocation75_spill] sm:$0xff] }
 0x2f9   : > { %4520 = vmatmul.msk.bf16.gmra.mxu3 %vm7003_vm1, %v3002_v11  ;;  %4560 = vmatmul.msk.bf16.gmra.mxu1 %vm7004_vm3, %v3674_v63  ;;  %v3655_v11 = vunpack.c.l.b16 %v3591_v35  ;;  %v2880_v35 = vsel %vm7016_vm8, %v2848_v10, 0.0  ;;  %vm7039_vm3 = vmmov %vm7019_vm0 }
 0x2fa   : > { %v2974_v52 = vunpack.c.l.b16 %v2910_v62  ;;  %v2913_v62 = vpack.c.bf16 %v2849_v37, %v2849_v37  ;;  %vm7054_vm8 = vmmov %vm7019_vm0 }
 0x2fc   : > { %v1766_v39 = vpop.f32.mrf.mxu3 }
 0x2fd   : > { %v6082_v47 = vadd.f32 %v1766_v39, %v7006_v40  ;;  %v3003_v39 = vpack.c.b16 %v2975_v36, %v2974_v52  ;;  %v3675_v40 = vpack.c.b16 %v3655_v11, %v3654_v56  ;;  %v3592_v36 = vpack.c.bf16 %v3528_v57, %v3528_v57  ;;  %v6102_v11 = vpop.f32.mrf.mxu2  ;;  %v2850_v57 = vld [vmem:[#allocation2 + $0x77] sm:$0xff] }
 0x2fe   : > { %v2912_v52 = vpack.c.bf16 %v2880_v35, %v2880_v35 }
 0x2ff   : > { %7007 = vst [vmem:[#allocation63_spill] sm:$0xff] %v6082_v47 }
 0x304   : > { %v1768_v63 = vpop.f32.mrf.mxu3 }
 0x305   : > { %v6087_v15 = vadd.f32 %v1768_v63, %v7010_v59  ;;  %v3561_v59 = vsel %vm6870_vm2, %v3529_v41, 0.0  ;;  %v6104_v63 = vpop.f32.mrf.mxu1  ;;  %v2976_v41 = vunpack.c.l.b16 %v2912_v52  ;;  %vm7018_vm2 = vmmov %vm7003_vm1  ;;  %v6111_v10 = vpop.f32.mrf.mxu2 }
 0x306   : > { %v3593_v56 = vpack.c.bf16 %v3561_v59, %v3561_v59 }
 0x307   : > { %7011 = vst [vmem:[#allocation4_spill] sm:$0xff] %v6087_v15 }
 0x308   : > { %v3657_v15 = vunpack.c.l.b16 %v3593_v56 }
 0x309   : > { %4521 = vmatmul.msk.bf16.gmra.mxu3 %vm7012_vm11, %v3003_v39  ;;  %4561 = vmatmul.msk.bf16.gmra.mxu1 %vm7013_vm7, %v3675_v40  ;;  %v2977_v39 = vunpack.c.l.b16 %v2913_v62  ;;  %v3656_v40 = vunpack.c.l.b16 %v3592_v36  ;;  %v7021_v62 = vld [vmem:[#allocation15_spill] sm:$0xff]  ;;  %vm7046_vm11 = vmmov %vm7019_vm0 }
 0x30a   : > { %vm7022_vm13 = vnez %v7021_v62 }
 0x30c   : > { %v1771_v24 = vpop.f32.mrf.mxu3 }
 0x30d   : > { %v6098_v49 = vadd.f32 %v1771_v24, %v7014_v31  ;;  %v3004_v24 = vpack.c.b16 %v2977_v39, %v2976_v41  ;;  %v3676_v31 = vpack.c.b16 %v3657_v15, %v3656_v40  ;;  %v6113_v37 = vpop.f32.mrf.mxu1  ;;  %v6120_v56 = vpop.f32.mrf.mxu2 }
 0x314   : > { %v1773_v47 = vpop.f32.mrf.mxu3 }
 0x315   : > { %v6107_v45 = vadd.f32 %v1773_v47, %v5641_v8  ;;  %v2882_v8 = vsel %vm7022_vm13, %v2850_v57, 0.0  ;;  %v2915_v47 = vpack.c.bf16 %v2851_v48, %v2851_v48  ;;  %v6122_v39 = vpop.f32.mrf.mxu1  ;;  %v2852_v57 = vld [vmem:[#allocation2 + $0x87] sm:$0xff]  ;;  %v2853_v48 = vld [vmem:[#allocation2 + $0x8f] sm:$0xff]  ;;  %vm7061_vm13 = vmmov %vm7019_vm0 }
 0x316   : > { %v2914_v36 = vpack.c.bf16 %v2882_v8, %v2882_v8  ;;  %v6135_v8 = vpop.f32.mrf.mxu2 }
 0x317   : > { %7017 = vst [vmem:[#allocation66_spill] sm:$0xff] %v6107_v45  ;;  %v2979_v15 = vunpack.c.l.b16 %v2915_v47  ;;  %v7029_v47 = vld [vmem:[#allocation17_spill] sm:$0xff] }
 0x318   : > { %v2978_v41 = vunpack.c.l.b16 %v2914_v36  ;;  %vm7030_vm15 = vnez %v7029_v47  ;;  %v2855_v47 = vld [vmem:[#allocation2 + $0x9f] sm:$0xff] }
 0x319   : > { %4522 = vmatmul.msk.bf16.gmra.mxu3 %vm7018_vm2, %v3004_v24  ;;  %4562 = vmatmul.msk.bf16.gmra.mxu1 %vm7019_vm0, %v3676_v31 }
 0x31a   : > { %v3005_v24 = vpack.c.b16 %v2979_v15, %v2978_v41  ;;  %v2917_v15 = vpack.c.bf16 %v2853_v48, %v2853_v48 }
 0x31c   : > { %v1776_v59 = vpop.f32.mrf.mxu3  ;;  %v2981_v41 = vunpack.c.l.b16 %v2917_v15 }
 0x31d   : > { %v6116_v35 = vadd.f32 %v1776_v59, %v5774_v29  ;;  %v7025_v29 = vld [vmem:[#allocation60_spill] sm:$0xff]  ;;  %v6139_v36 = vpop.f32.mrf.mxu1 }
 0x31e   : > { %v7026_v31 = vpack.c.b16 %v7025_v29, %v5468_v6 }
 0x31f   : > { %7020 = vst [vmem:[#allocation68_spill] sm:$0xff] %v6116_v35 }
 0x324   : > { %v1778_v52 = vpop.f32.mrf.mxu3 }
 0x325   : > { %v6125_v40 = vadd.f32 %v1778_v52, %v5788_v3  ;;  %v2884_v3 = vsel %vm7030_vm15, %v2852_v57, 0.0  ;;  %v7033_v57 = vpack.c.b16 %v5692_v1, %v5685_v9  ;;  %vm7069_vm15 = vmmov %vm7019_vm0 }
 0x326   : > { %v2916_v52 = vpack.c.bf16 %v2884_v3, %v2884_v3 }
 0x327   : > { %7023 = vst [vmem:[#allocation6_spill] sm:$0xff] %v6125_v40  ;;  %v6144_v40 = vpop.f32.mrf.mxu2 }
 0x328   : > { %v2980_v29 = vunpack.c.l.b16 %v2916_v52  ;;  %v2919_v52 = vpack.c.bf16 %v2855_v47, %v2855_v47  ;;  %v7040_v47 = vld [vmem:[#allocation22_spill] sm:$0xff] }
 0x329   : > { %4523 = vmatmul.msk.bf16.gmra.mxu3 %vm7024_vm14, %v3005_v24  ;;  %4563 = vmatmul.msk.bf16.gmra.mxu1 %vm7027_vm9, %v7026_v31  ;;  %vm7041_vm12 = vnez %v7040_v47  ;;  %vm7066_vm9 = vmmov %vm7019_vm0 }
 0x32a   : > { %v3006_v31 = vpack.c.b16 %v2981_v41, %v2980_v29  ;;  %v2983_v29 = vunpack.c.l.b16 %v2919_v52 }
 0x32c   : > { %v1781_v59 = vpop.f32.mrf.mxu3 }
 0x32d   : > { %v6133_v62 = vadd.f32 %v1781_v59, %v5805_v5  ;;  %v6146_v5 = vpop.f32.mrf.mxu1  ;;  %v2854_v59 = vld [vmem:[#allocation2 + $0x97] sm:$0xff] }
 0x32f   : > { %7028 = vst [vmem:[#allocation71_spill] sm:$0xff] %v6133_v62 }
 0x334   : > { %v1783_v24 = vpop.f32.mrf.mxu3 }
 0x335   : > { %v6142_v6 = vadd.f32 %v1783_v24, %v5817_v38  ;;  %v7036_v38 = vld [vmem:[#allocation19_spill] sm:$0xff]  ;;  %v6158_v24 = vpop.f32.mrf.mxu2 }
 0x336   : > { %vm7037_vm1 = vnez %v7036_v38 }
 0x337   : > { %7031 = vst [vmem:[#allocation8_spill] sm:$0xff] %v6142_v6  ;;  %v2886_v15 = vsel %vm7037_vm1, %v2854_v59, 0.0  ;;  %vm7077_vm1 = vmmov %vm7019_vm0 }
 0x338   : > { %v2918_v41 = vpack.c.bf16 %v2886_v15, %v2886_v15 }
 0x339   : > { %4524 = vmatmul.msk.bf16.gmra.mxu3 %vm7032_vm10, %v3006_v31  ;;  %4564 = vmatmul.msk.bf16.gmra.mxu1 %vm7034_vm4, %v7033_v57  ;;  %v2856_v57 = vld [vmem:[#allocation2 + $0xa7] sm:$0xff]  ;;  %vm7074_vm4 = vmmov %vm7019_vm0 }
 0x33a   : > { %v2982_v9 = vunpack.c.l.b16 %v2918_v41  ;;  %v2888_v38 = vsel %vm7041_vm12, %v2856_v57, 0.0  ;;  %vm7081_vm12 = vmmov %vm7019_vm0 }
 0x33b   : > { %v2920_v52 = vpack.c.bf16 %v2888_v38, %v2888_v38  ;;  %v2858_v38 = vld [vmem:[#allocation2 + $0xb7] sm:$0xff] }
 0x33c   : > { %v1786_v48 = vpop.f32.mrf.mxu3  ;;  %v3007_v1 = vpack.c.b16 %v2983_v29, %v2982_v9  ;;  %v7043_v9 = vld [vmem:[#allocation25_spill] sm:$0xff] }
 0x33d   : > { %v6154_v3 = vadd.f32 %v1786_v48, %v5834_v51  ;;  %v6164_v62 = vpop.f32.mrf.mxu2  ;;  %v2857_v48 = vld [vmem:[#allocation2 + $0xaf] sm:$0xff]  ;;  %v2984_v35 = vunpack.c.l.b16 %v2920_v52  ;;  %v7048_v52 = vld [vmem:[#allocation24_spill] sm:$0xff] }
 0x33e   : > { %v2921_v15 = vpack.c.bf16 %v2857_v48, %v2857_v48  ;;  %v7047_v48 = vld [vmem:[#allocation38_spill] sm:$0xff]  ;;  %vm7049_vm7 = vnez %v7048_v52 }
 0x33f   : > { %7035 = vst [vmem:[#allocation73_spill] sm:$0xff] %v6154_v3 }
 0x340   : > { %v2985_v41 = vunpack.c.l.b16 %v2921_v15 }
 0x344   : > { %v1788_v31 = vpop.f32.mrf.mxu3 }
 0x345   : > { %v6161_v6 = vadd.f32 %v1788_v31, %v5848_v61  ;;  %v7042_v61 = vld [vmem:[#allocation36_spill] sm:$0xff]  ;;  %v6178_v45 = vpop.f32.mrf.mxu2 }
 0x346   : > { %v2144_v31 = vadd.f32 %v7042_v61, %v5894_v14  ;;  %v2859_v61 = vld [vmem:[#allocation2 + $0xbf] sm:$0xff] }
 0x347   : > { %7038 = vst [vmem:[#allocation75_spill] sm:$0xff] %v6161_v6 }
 0x348   : > { %v2460_v57 = vadd.f32 %v5643_v44, %v2144_v31  ;;  %v2923_v44 = vpack.c.bf16 %v2859_v61, %v2859_v61 }
 0x349   : > { %4525 = vmatmul.msk.bf16.gmra.mxu3 %vm7039_vm3, %v3007_v1  ;;  %v7044_v1 = vld [vmem:[#allocation27_spill] sm:$0xff] }
 0x34a   : > { %v1339_v6 = vadd.f32 %v7044_v1, %v7043_v9  ;;  %v2808_v47 = vadd.f32 %v5724_v34, %v2460_v57  ;;  %v6185_v9 = vpop.f32.mrf.mxu0  ;;  %v6189_v1 = vpop.f32.mrf.mxu1  ;;  %v7051_v34 = vld [vmem:[#allocation40_spill] sm:$0xff] }
 0x34c   : > { %v1791_v51 = vpop.f32.mrf.mxu3 }
 0x34d   : > { %v6167_v59 = vadd.f32 %v1791_v51, %v5867_v32  ;;  %v1797_v32 = vadd.f32 %v5900_v54, %v1339_v6  ;;  %v3008_v51 = vpack.c.b16 %v2985_v41, %v2984_v35  ;;  %v7050_v54 = vld [vmem:[#allocation77_spill] sm:$0xff]  ;;  %v6192_v6 = vpop.f32.mrf.mxu2 }
 0x34f   : > { %v2145_v14 = vadd.f32 %v7047_v48, %v1797_v32  ;;  %v2146_v32 = vadd.f32 %v7051_v34, %v5914_v30  ;;  %v2987_v48 = vunpack.c.l.b16 %v2923_v44 }
 0x351   : > { %v2461_v35 = vadd.f32 %v7050_v54, %v2145_v14 }
 0x352   : > { %v6204_v52 = vpop.f32.mrf.mxu0  ;;  %v6208_v54 = vpop.f32.mrf.mxu1 }
 0x354   : > { %v1793_v29 = vpop.f32.mrf.mxu3 }
 0x355   : > { %v6176_v3 = vadd.f32 %v1793_v29, %v5880_v50  ;;  %v2890_v29 = vsel %vm7049_vm7, %v2858_v38, 0.0  ;;  %v6202_v38 = vld [vmem:[%s6613_s4] ss:$0 sm:$0xff]  ;;  %v6213_v44 = vpop.f32.mrf.mxu2 }
 0x356   : > { %v2922_v41 = vpack.c.bf16 %v2890_v29, %v2890_v29  ;;  %v7053_v29 = vld [vmem:[#allocation79_spill] sm:$0xff] }
 0x357   : > { %7045 = vst [vmem:[#allocation12_spill] sm:$0xff] %v6176_v3  ;;  %v2462_v30 = vadd.f32 %v7053_v29, %v2146_v32  ;;  %v2861_v32 = vld [vmem:[#allocation2 + $0xcf] sm:$0xff] }
 0x358   : > { %v2986_v61 = vunpack.c.l.b16 %v2922_v41  ;;  %v2925_v29 = vpack.c.bf16 %v2861_v32, %v2861_v32 }
 0x359   : > { %4526 = vmatmul.msk.bf16.gmra.mxu3 %vm7046_vm11, %v3008_v51  ;;  %v7052_v51 = vld [vmem:[#allocation13_spill] sm:$0xff]  ;;  %vm7084_vm11 = vmmov %vm7019_vm0 }
 0x35a   : > { %v2809_v57 = vadd.f32 %v7052_v51, %v2461_v35  ;;  %v2860_v51 = vld [vmem:[#allocation2 + $0xc7] sm:$0xff]  ;;  %v6222_v3 = vpop.f32.mrf.mxu0 }
 0x35c   : > { %v3076_v15 = vpop.f32.mrf.mxu3 }
 0x35d   : > { %v3156_v50 = vadd.f32 %v3076_v15, %v2808_v47 }
 0x35f   : > { %v3472_v31 = vadd.f32 %v5937_v26, %v3156_v50  ;;  %v3009_v50 = vpack.c.b16 %v2987_v48, %v2986_v61 }
 0x361   : > { %v3820_v15 = vadd.f32 %v6091_v23, %v3472_v31  ;;  %v7055_v31 = vld [vmem:[#allocation43_spill] sm:$0xff] }
 0x362   : > { %v2147_v41 = vadd.f32 %v7055_v31, %v5923_v21 }
 0x363   : > { %v3856_v35 = vadd.f32 %v6202_v38, %v3820_v15  ;;  %v7056_v15 = vld [vmem:[#allocation28_spill] sm:$0xff] }
 0x364   : > { %v3078_v47 = vpop.f32.mrf.mxu3  ;;  %vm7057_vm2 = vnez %v7056_v15 }
 0x365   : > { %v3157_v14 = vadd.f32 %v3078_v47, %v2809_v57  ;;  %v3888_v48 = vmax.f32 %v3856_v35, 0.0  ;;  %v6228_v35 = vpop.f32.mrf.mxu1 }
 0x367   : > { %v3473_v26 = vadd.f32 %v5946_v25, %v3157_v14  ;;  %v2810_v25 = vadd.f32 %v5761_v17, %v2462_v30  ;;  %v7059_v30 = vld [vmem:[#allocation47_spill] sm:$0xff] }
 0x369   : > { %v3821_v23 = vadd.f32 %v6104_v63, %v3473_v26  ;;  %4527 = vmatmul.msk.bf16.gmra.mxu3 %vm7054_vm8, %v3009_v50  ;;  %v2892_v63 = vsel %vm7057_vm2, %v2860_v51, 0.0  ;;  %v7058_v26 = vld [vmem:[#allocation7_spill] sm:$0xff]  ;;  %vm7091_vm8 = vmmov %vm7019_vm0 }
 0x36a   : > { %v2463_v50 = vadd.f32 %v7058_v26, %v2147_v41  ;;  %v2924_v17 = vpack.c.bf16 %v2892_v63, %v2892_v63  ;;  %v7062_v63 = vld [vmem:[#allocation50_spill] sm:$0xff]  ;;  %v6241_v26 = vpop.f32.mrf.mxu0  ;;  %vm7095_vm2 = vmmov %vm7019_vm0 }
 0x36b   : > { %v3857_v34 = vadd.f32 %v6202_v38, %v3821_v23  ;;  %v2148_v23 = vadd.f32 %v7059_v30, %v5935_v20 }
 0x36c   : > { %v3081_v57 = vpop.f32.mrf.mxu3  ;;  %v2811_v31 = vadd.f32 %v5783_v55, %v2463_v50  ;;  %v2988_v32 = vunpack.c.l.b16 %v2924_v17  ;;  %v2862_v55 = vld [vmem:[#allocation2 + $0xd7] sm:$0xff] }
 0x36d   : > { %v3889_v47 = vmax.f32 %v3857_v34, 0.0  ;;  %v3158_v14 = vadd.f32 %v3081_v57, %v2810_v25  ;;  %v2989_v34 = vunpack.c.l.b16 %v2925_v29  ;;  %v6231_v25 = vpop.f32.mrf.mxu2  ;;  %v2863_v29 = vld [vmem:[#allocation2 + $0xdf] sm:$0xff]  ;;  %v6247_v30 = vpop.f32.mrf.mxu1 }
 0x36f   : > { %v3920_v61 = vpack.c.bf16 %v3889_v47, %v3888_v48  ;;  %v3474_v21 = vadd.f32 %v5962_v42, %v3158_v14  ;;  %v3010_v48 = vpack.c.b16 %v2989_v34, %v2988_v32  ;;  %v7060_v47 = vld [vmem:[#allocation82_spill] sm:$0xff]  ;;  %v2927_v32 = vpack.c.bf16 %v2863_v29, %v2863_v29 }
 0x370   : > { %v2464_v14 = vadd.f32 %v7060_v47, %v2148_v23 }
 0x371   : > { %4566 = vmatmul.msk.bf16.vlgmr.msra.gmra.mxu2 %vm7019_vm0, %v3920_v61  ;;  %v3822_v41 = vadd.f32 %v6113_v37, %v3474_v21  ;;  %v2149_v61 = vadd.f32 %v7062_v63, %v5944_v2  ;;  %v7063_v21 = vld [vmem:[#allocation32_spill] sm:$0xff]  ;;  %v7065_v2 = vld [vmem:[#allocation83_spill] sm:$0xff] }
 0x372   : > { %v2812_v50 = vadd.f32 %v5802_v18, %v2464_v14  ;;  %vm7064_vm14 = vnez %v7063_v21  ;;  %v7067_v18 = vld [vmem:[#allocation53_spill] sm:$0xff] }
 0x373   : > { %v3858_v15 = vadd.f32 %v6202_v38, %v3822_v41  ;;  %v2894_v17 = vsel %vm7064_vm14, %v2862_v55, 0.0  ;;  %v2465_v41 = vadd.f32 %v7065_v2, %v2149_v61  ;;  %v6257_v55 = vpop.f32.mrf.mxu0  ;;  %v7071_v2 = vld [vmem:[#allocation54_spill] sm:$0xff]  ;;  %vm7108_vm14 = vmmov %vm7019_vm0 }
 0x374   : > { %v3083_v51 = vpop.f32.mrf.mxu3  ;;  %vm7072_vm10 = vnez %v7071_v2 }
 0x375   : > { %v3159_v57 = vadd.f32 %v3083_v51, %v2811_v31  ;;  %v6249_v34 = vpop.f32.mrf.mxu2  ;;  %v2813_v47 = vadd.f32 %v5819_v22, %v2465_v41  ;;  %v6260_v61 = vpop.f32.mrf.mxu1 }
 0x377   : > { %v3475_v42 = vadd.f32 %v5976_v28, %v3159_v57  ;;  %v2926_v57 = vpack.c.bf16 %v2894_v17, %v2894_v17  ;;  %v2864_v17 = vld [vmem:[#allocation2 + $0xe7] sm:$0xff] }
 0x378   : > { %v2896_v41 = vsel %vm7072_vm10, %v2864_v17, 0.0  ;;  %vm4241_vm10 = vcmask 125952  }
 0x379   : > { %v3823_v20 = vadd.f32 %v6122_v39, %v3475_v42  ;;  %4528 = vmatmul.msk.bf16.gmra.mxu3 %vm7061_vm13, %v3010_v48  ;;  %v3890_v39 = vmax.f32 %v3858_v15, 0.0  ;;  %v2150_v48 = vadd.f32 %v7067_v18, %v5956_v53  ;;  %v2990_v14 = vunpack.c.l.b16 %v2926_v57  ;;  %vm7101_vm13 = vmmov %vm7019_vm0 }
 0x37a   : > { %v2991_v15 = vunpack.c.l.b16 %v2927_v32 }
 0x37b   : > { %v3859_v37 = vadd.f32 %v6202_v38, %v3823_v20  ;;  %v6275_v18 = vpop.f32.mrf.mxu0 }
 0x37c   : > { %v3086_v28 = vpop.f32.mrf.mxu3 }
 0x37d   : > { %v3891_v23 = vmax.f32 %v3859_v37, 0.0  ;;  %v3160_v31 = vadd.f32 %v3086_v28, %v2812_v50  ;;  %v7068_v28 = vld [vmem:[#allocation84_spill] sm:$0xff]  ;;  %v6264_v21 = vpop.f32.mrf.mxu2 }
 0x37e   : > { %v2466_v29 = vadd.f32 %v7068_v28, %v2150_v48  ;;  %v7073_v48 = vld [vmem:[#allocation86_spill] sm:$0xff] }
 0x37f   : > { %v3921_v51 = vpack.c.bf16 %v3891_v23, %v3890_v39  ;;  %v3476_v42 = vadd.f32 %v5988_v46, %v3160_v31  ;;  %v3011_v46 = vpack.c.b16 %v2991_v15, %v2990_v14  ;;  %v7070_v39 = vld [vmem:[#allocation57_spill] sm:$0xff]  ;;  %v2928_v14 = vpack.c.bf16 %v2896_v41, %v2896_v41 }
 0x380   : > { %v2814_v31 = vadd.f32 %v5841_v12, %v2466_v29 }
 0x381   : > { %4567 = vmatmul.msk.bf16.gmra.mxu2 %vm7066_vm9, %v3921_v51  ;;  %v3824_v63 = vadd.f32 %v6139_v36, %v3476_v42  ;;  %v2151_v36 = vadd.f32 %v7070_v39, %v5965_v43  ;;  %v2865_v51 = vld [vmem:[#allocation2 + $0xef] sm:$0xff]  ;;  %v6278_v43 = vpop.f32.mrf.mxu1  ;;  %vm7114_vm9 = vmmov %vm7019_vm0 }
 0x382   : > { %v2929_v15 = vpack.c.bf16 %v2865_v51, %v2865_v51 }
 0x383   : > { %v3860_v53 = vadd.f32 %v6202_v38, %v3824_v63  ;;  %v7075_v63 = vld [vmem:[#allocation59_spill] sm:$0xff] }
 0x384   : > { %v3088_v20 = vpop.f32.mrf.mxu3  ;;  %v2993_v28 = vunpack.c.l.b16 %v2929_v15 }
 0x385   : > { %v3161_v37 = vadd.f32 %v3088_v20, %v2813_v47  ;;  %v3892_v57 = vmax.f32 %v3860_v53, 0.0  ;;  %v2467_v47 = vadd.f32 %v7073_v48, %v2151_v36  ;;  %v6282_v12 = vpop.f32.mrf.mxu2  ;;  %v7076_v36 = vld [vmem:[#allocation88_spill] sm:$0xff] }
 0x387   : > { %v3477_v50 = vadd.f32 %v6002_v60, %v3161_v37  ;;  %v2152_v37 = vadd.f32 %v7075_v63, %v5979_v58  ;;  %v7078_v58 = vld [vmem:[#allocation62_spill] sm:$0xff] }
 0x388   : > { %v2153_v51 = vadd.f32 %v7078_v58, %v5986_v16  ;;  %v7086_v58 = vld [vmem:[#allocation67_spill] sm:$0xff] }
 0x389   : > { %v3825_v22 = vadd.f32 %v6146_v5, %v3477_v50  ;;  %4529 = vmatmul.msk.bf16.gmra.mxu3 %vm7069_vm15, %v3011_v46  ;;  %v2815_v50 = vadd.f32 %v5861_v0, %v2467_v47  ;;  %v2992_v46 = vunpack.c.l.b16 %v2928_v14  ;;  %v2866_v0 = vld [vmem:[#allocation2 + $0xf7] sm:$0xff]  ;;  %v6297_v2 = vpop.f32.mrf.mxu1  ;;  %vm7120_vm15 = vmmov %vm7019_vm0 }
 0x38a   : > { %v2469_v15 = vadd.f32 %v5779_v19, %v2153_v51 }
 0x38b   : > { %v3861_v23 = vadd.f32 %v6202_v38, %v3825_v22  ;;  %v3012_v39 = vpack.c.b16 %v2993_v28, %v2992_v46 }
 0x38c   : > { %v3091_v60 = vpop.f32.mrf.mxu3  ;;  %v2817_v46 = vadd.f32 %v6102_v11, %v2469_v15 }
 0x38d   : > { %v3893_v32 = vmax.f32 %v3861_v23, 0.0  ;;  %v3162_v42 = vadd.f32 %v3091_v60, %v2814_v31  ;;  %v6290_v23 = vpop.f32.mrf.mxu0  ;;  %v6301_v41 = vpop.f32.mrf.mxu2 }
 0x38f   : > { %v3922_v5 = vpack.c.bf16 %v3893_v32, %v3892_v57  ;;  %v3478_v20 = vadd.f32 %v6185_v9, %v3162_v42  ;;  %v2468_v9 = vadd.f32 %v7076_v36, %v2152_v37  ;;  %v2867_v32 = vld [vmem:[#allocation2 + $0xff] sm:$0xff] }
 0x390   : > { %v7079_v42 = vld [vmem:[#allocation61_spill] sm:$0xff] }
 0x391   : > { %4568 = vmatmul.msk.bf16.gmra.mxu2 %vm7074_vm4, %v3922_v5  ;;  %v3826_v53 = vadd.f32 %v6189_v1, %v3478_v20  ;;  %vm7080_vm3 = vnez %v7079_v42  ;;  %v2931_v20 = vpack.c.bf16 %v2867_v32, %v2867_v32  ;;  %v2869_v32 = vld [vmem:[#allocation2 + $0x10f] sm:$0xff]  ;;  %vm7127_vm4 = vmmov %vm7019_vm0 }
 0x392   : > { %v2898_v5 = vsel %vm7080_vm3, %v2866_v0, 0.0  ;;  %v7085_v0 = vld [vmem:[#allocation35_spill] sm:$0xff]  ;;  %vm7140_vm3 = vmmov %vm7019_vm0 }
 0x393   : > { %v3862_v31 = vadd.f32 %v6202_v38, %v3826_v53  ;;  %v2930_v16 = vpack.c.bf16 %v2898_v5, %v2898_v5  ;;  %v2155_v51 = vadd.f32 %v7086_v58, %v7085_v0  ;;  %v7092_v0 = vld [vmem:[#allocation44_spill] sm:$0xff]  ;;  %v7093_v58 = vld [vmem:[#allocation70_spill] sm:$0xff] }
 0x394   : > { %v3093_v29 = vpop.f32.mrf.mxu3 }
 0x395   : > { %v3163_v22 = vadd.f32 %v3093_v29, %v2815_v50  ;;  %v6310_v50 = vpop.f32.mrf.mxu0  ;;  %v2994_v28 = vunpack.c.l.b16 %v2930_v16  ;;  %v2995_v29 = vunpack.c.l.b16 %v2931_v20 }
 0x397   : > { %v3479_v17 = vadd.f32 %v6204_v52, %v3163_v22  ;;  %v2816_v52 = vadd.f32 %v6089_v7, %v2468_v9  ;;  %v7082_v7 = vld [vmem:[#allocation64_spill] sm:$0xff]  ;;  %v6313_v22 = vpop.f32.mrf.mxu1  ;;  %v3013_v36 = vpack.c.b16 %v2995_v29, %v2994_v28  ;;  %v7083_v9 = vld [vmem:[#allocation18_spill] sm:$0xff]  ;;  %v2933_v29 = vpack.c.bf16 %v2869_v32, %v2869_v32 }
 0x398   : > { %v2154_v37 = vadd.f32 %v7082_v7, %v6000_v27  ;;  %v2868_v27 = vld [vmem:[#allocation2 + $0x107] sm:$0xff] }
 0x399   : > { %v3827_v60 = vadd.f32 %v6208_v54, %v3479_v17  ;;  %4530 = vmatmul.msk.bf16.gmra.mxu3 %vm7077_vm1, %v3012_v39  ;;  %v3894_v54 = vmax.f32 %v3862_v31, 0.0  ;;  %v6316_v39 = vpop.f32.mrf.mxu2  ;;  %vm7133_vm1 = vmmov %vm7019_vm0 }
 0x39a   : > { %v2470_v31 = vadd.f32 %v7083_v9, %v2154_v37 }
 0x39b   : > { %v3863_v1 = vadd.f32 %v6202_v38, %v3827_v60 }
 0x39c   : > { %v3096_v57 = vpop.f32.mrf.mxu3 }
 0x39d   : > { %v3895_v48 = vmax.f32 %v3863_v1, 0.0  ;;  %v3164_v47 = vadd.f32 %v3096_v57, %v2816_v52  ;;  %v2818_v1 = vadd.f32 %v6111_v10, %v2470_v31  ;;  %v7087_v52 = vld [vmem:[#allocation65_spill] sm:$0xff]  ;;  %v6329_v42 = vpop.f32.mrf.mxu0 }
 0x39e   : > { %vm7088_vm7 = vnez %v7087_v52  ;;  %v2997_v52 = vunpack.c.l.b16 %v2933_v29  ;;  %v7107_v29 = vld [vmem:[#allocation26_spill] sm:$0xff] }
 0x39f   : > { %v3923_v14 = vpack.c.bf16 %v3895_v48, %v3894_v54  ;;  %v3480_v63 = vadd.f32 %v6222_v3, %v3164_v47  ;;  %v3219_v47 = vld [vmem:[#allocation2 + $0x120] sm:$0xff]  ;;  %v6331_v37 = vpop.f32.mrf.mxu1 }
 0x3a0   : > { %v3251_v20 = vpack.c.bf16 %v3219_v47, %v3219_v47 }
 0x3a1   : > { %4569 = vmatmul.msk.bf16.gmra.mxu2 %vm7081_vm12, %v3923_v14  ;;  %v3828_v19 = vadd.f32 %v6228_v35, %v3480_v63  ;;  %v3534_v14 = vld [vmem:[#allocation2 + $0x119] sm:$0xff]  ;;  %v3535_v63 = vld [vmem:[#allocation2 + $0x121] sm:$0xff]  ;;  %vm7147_vm12 = vmmov %vm7019_vm0 }
 0x3a2   : > { %v3598_v7 = vpack.c.bf16 %v3534_v14, %v3534_v14 }
 0x3a3   : > { %v3864_v60 = vadd.f32 %v6202_v38, %v3828_v19  ;;  %v3567_v19 = vsel %vm5455_vm6, %v3535_v63, 0.0  ;;  %vm7094_vm6 = vmmov %vm7019_vm0  ;;  %v7098_v63 = vld [vmem:[#allocation72_spill] sm:$0xff] }
 0x3a4   : > { %v3098_v53 = vpop.f32.mrf.mxu3  ;;  %v3599_v9 = vpack.c.bf16 %v3567_v19, %v3567_v19  ;;  %v3662_v31 = vunpack.c.l.b16 %v3598_v7 }
 0x3a5   : > { %v3165_v17 = vadd.f32 %v3098_v53, %v2817_v46  ;;  %v3896_v5 = vmax.f32 %v3864_v60, 0.0  ;;  %v7089_v46 = vld [vmem:[#allocation91_spill] sm:$0xff] }
 0x3a6   : > { %v2471_v28 = vadd.f32 %v7089_v46, %v2155_v51 }
 0x3a7   : > { %v3481_v3 = vadd.f32 %v6241_v26, %v3165_v17  ;;  %v2900_v26 = vsel %vm7088_vm7, %v2868_v27, 0.0  ;;  %v6336_v17 = vpop.f32.mrf.mxu2  ;;  %v3777_v14 = vpop.f32.mrf.mxu1  ;;  %vm7160_vm7 = vmmov %vm7019_vm0 }
 0x3a8   : > { %v2932_v15 = vpack.c.bf16 %v2900_v26, %v2900_v26  ;;  %v2819_v51 = vadd.f32 %v6120_v56, %v2471_v28  ;;  %v2871_v28 = vld [vmem:[#allocation2 + $0x11f] sm:$0xff] }
 0x3a9   : > { %v3829_v11 = vadd.f32 %v6247_v30, %v3481_v3  ;;  %4531 = vmatmul.msk.bf16.gmra.mxu3 %vm7084_vm11, %v3013_v36  ;;  %v3218_v30 = vld [vmem:[#allocation2 + $0x118] sm:$0xff]  ;;  %v3315_v36 = vunpack.c.l.b16 %v3251_v20  ;;  %vm7154_vm11 = vmmov %vm7019_vm0 }
 0x3aa   : > { %v3250_v16 = vpack.c.bf16 %v3218_v30, %v3218_v30  ;;  %v7096_v30 = vld [vmem:[#allocation21_spill] sm:$0xff] }
 0x3ab   : > { %v3865_v35 = vadd.f32 %v6202_v38, %v3829_v11  ;;  %v3663_v11 = vunpack.c.l.b16 %v3599_v9  ;;  %v7100_v9 = vld [vmem:[#allocation94_spill] sm:$0xff] }
 0x3ac   : > { %v3101_v57 = vpop.f32.mrf.mxu3  ;;  %v3314_v3 = vunpack.c.l.b16 %v3250_v16  ;;  %v2870_v16 = vld [vmem:[#allocation2 + $0x117] sm:$0xff] }
 0x3ad   : > { %v3897_v54 = vmax.f32 %v3865_v35, 0.0  ;;  %v3166_v48 = vadd.f32 %v3101_v57, %v2818_v1  ;;  %v2156_v35 = vadd.f32 %v7093_v58, %v7092_v0  ;;  %v2996_v1 = vunpack.c.l.b16 %v2932_v15 }
 0x3ae   : > { %v3331_v60 = vpack.c.b16 %v3315_v36, %v3314_v3  ;;  %v3679_v57 = vpack.c.b16 %v3663_v11, %v3662_v31  ;;  %v2902_v53 = vsel %vm5582_vm5, %v2870_v16, 0.0  ;;  %vm7104_vm5 = vmmov %vm7019_vm0 }
 0x3af   : > { %v3924_v10 = vpack.c.bf16 %v3897_v54, %v3896_v5  ;;  %v3482_v27 = vadd.f32 %v6257_v55, %v3166_v48  ;;  %v3429_v55 = vpop.f32.mrf.mxu0  ;;  %v3014_v48 = vpack.c.b16 %v2997_v52, %v2996_v1  ;;  %v2472_v47 = vadd.f32 %v7096_v30, %v2156_v35  ;;  %v6351_v20 = vpop.f32.mrf.mxu2 }
 0x3b0   : > { %4549 = vmatmul.msk.bf16.gmra.mxu0 %vm7094_vm6, %v3331_v60  ;;  %4565 = vmatmul.msk.bf16.gmra.mxu1 %vm7095_vm2, %v3679_v57  ;;  %v2935_v60 = vpack.c.bf16 %v2871_v28, %v2871_v28  ;;  %v3780_v35 = vpop.f32.mrf.mxu1 }
 0x3b1   : > { %4570 = vmatmul.msk.bf16.gmra.mxu2 %vm7091_vm8, %v3924_v10  ;;  %v3830_v32 = vadd.f32 %v6260_v61, %v3482_v27  ;;  %v7097_v61 = vld [vmem:[#allocation42_spill] sm:$0xff]  ;;  %v2934_v27 = vpack.c.bf16 %v2902_v53, %v2902_v53  ;;  %vm7161_vm8 = vmmov %vm7019_vm0 }
 0x3b2   : > { %v2157_v7 = vadd.f32 %v7098_v63, %v7097_v61  ;;  %v2999_v52 = vunpack.c.l.b16 %v2935_v60 }
 0x3b3   : > { %v3866_v56 = vadd.f32 %v6202_v38, %v3830_v32  ;;  %v2998_v1 = vunpack.c.l.b16 %v2934_v27 }
 0x3b4   : > { %v3103_v26 = vpop.f32.mrf.mxu3  ;;  %v2473_v31 = vadd.f32 %v7100_v9, %v2157_v7 }
 0x3b5   : > { %v3167_v5 = vadd.f32 %v3103_v26, %v2819_v51  ;;  %v3898_v19 = vmax.f32 %v3866_v56, 0.0  ;;  %v7106_v56 = vld [vmem:[#allocation76_spill] sm:$0xff] }
 0x3b6   : > { %v2821_v51 = vadd.f32 %v6144_v40, %v2473_v31  ;;  %v7105_v40 = vld [vmem:[#allocation49_spill] sm:$0xff] }
 0x3b7   : > { %v3483_v54 = vadd.f32 %v6275_v18, %v3167_v5  ;;  %v2820_v18 = vadd.f32 %v6135_v8, %v2472_v47  ;;  %v3432_v11 = vpop.f32.mrf.mxu0  ;;  %v7102_v8 = vld [vmem:[#allocation74_spill] sm:$0xff]  ;;  %v6365_v26 = vpop.f32.mrf.mxu2 }
 0x3b8   : > { %v2158_v58 = vadd.f32 %v7102_v8, %v6036_v4  ;;  %v3782_v7 = vpop.f32.mrf.mxu1  ;;  %v7111_v8 = vld [vmem:[#allocation20_spill] sm:$0xff] }
 0x3b9   : > { %v3831_v15 = vadd.f32 %v6278_v43, %v3483_v54  ;;  %4532 = vmatmul.msk.bf16.gmra.mxu3 %vm7019_vm0, %v3014_v48  ;;  %v3015_v48 = vpack.c.b16 %v2999_v52, %v2998_v1  ;;  %v7112_v52 = vld [vmem:[#allocation80_spill] sm:$0xff] }
 0x3bb   : > { %v3867_v10 = vadd.f32 %v6202_v38, %v3831_v15  ;;  %v2159_v15 = vadd.f32 %v7106_v56, %v7105_v40 }
 0x3bc   : > { %v3106_v46 = vpop.f32.mrf.mxu3 }
 0x3bd   : > { %v3899_v3 = vmax.f32 %v3867_v10, 0.0  ;;  %v3168_v43 = vadd.f32 %v3106_v46, %v2820_v18 }
 0x3bf   : > { %v3925_v36 = vpack.c.bf16 %v3899_v3, %v3898_v19  ;;  %v3484_v0 = vadd.f32 %v6290_v23, %v3168_v43  ;;  %v7103_v23 = vld [vmem:[#allocation9_spill] sm:$0xff]  ;;  %v3434_v16 = vpop.f32.mrf.mxu0  ;;  %v6377_v46 = vpop.f32.mrf.mxu2  ;;  %v7109_v19 = vld [vmem:[#allocation48_spill] sm:$0xff]  ;;  %v7110_v3 = vld [vmem:[#allocation78_spill] sm:$0xff] }
 0x3c0   : > { %v2474_v30 = vadd.f32 %v7103_v23, %v2158_v58  ;;  %v2160_v43 = vadd.f32 %v7110_v3, %v7109_v19  ;;  %v3785_v60 = vpop.f32.mrf.mxu1 }
 0x3c1   : > { %4571 = vmatmul.msk.bf16.gmra.mxu2 %vm7101_vm13, %v3925_v36  ;;  %v3832_v32 = vadd.f32 %v6297_v2, %v3484_v0 }
 0x3c2   : > { %v2822_v2 = vadd.f32 %v6158_v24, %v2474_v30  ;;  %v2476_v58 = vadd.f32 %v7111_v8, %v2160_v43  ;;  %v7113_v30 = vld [vmem:[#allocation29_spill] sm:$0xff] }
 0x3c3   : > { %v3868_v47 = vadd.f32 %v6202_v38, %v3832_v32 }
 0x3c4   : > { %v3108_v57 = vpop.f32.mrf.mxu3 }
 0x3c5   : > { %v3169_v5 = vadd.f32 %v3108_v57, %v2821_v51  ;;  %v2161_v57 = vadd.f32 %v7112_v52, %v6057_v33  ;;  %v7115_v33 = vld [vmem:[#allocation81_spill] sm:$0xff] }
 0x3c6   : > { %v2162_v56 = vadd.f32 %v7115_v33, %v6066_v13 }
 0x3c7   : > { %v3485_v54 = vadd.f32 %v6310_v50, %v3169_v5  ;;  %v3900_v50 = vmax.f32 %v3868_v47, 0.0  ;;  %v3437_v9 = vpop.f32.mrf.mxu0  ;;  %v6387_v51 = vpop.f32.mrf.mxu2  ;;  %v2477_v47 = vadd.f32 %v7113_v30, %v2161_v57  ;;  %v7123_v30 = vld [vmem:[#allocation33_spill] sm:$0xff] }
 0x3c9   : > { %v3833_v4 = vadd.f32 %v6313_v22, %v3485_v54  ;;  %4533 = vmatmul.msk.bf16.gmra.mxu3 %vm7104_vm5, %v3015_v48  ;;  %v2475_v22 = vadd.f32 %v7107_v29, %v2159_v15  ;;  %v2825_v15 = vadd.f32 %v6192_v6, %v2477_v47  ;;  %v7117_v29 = vld [vmem:[#allocation58_spill] sm:$0xff] }
 0x3cb   : > { %v3869_v61 = vadd.f32 %v6202_v38, %v3833_v4  ;;  %v2823_v36 = vadd.f32 %v6164_v62, %v2475_v22  ;;  %v2824_v62 = vadd.f32 %v6178_v45, %v2476_v58  ;;  %v3787_v4 = vpop.f32.mrf.mxu1  ;;  %v7118_v22 = vld [vmem:[#allocation10_spill] sm:$0xff] }
 0x3cc   : > { %v3111_v63 = vpop.f32.mrf.mxu3 }
 0x3cd   : > { %v3901_v10 = vmax.f32 %v3869_v61, 0.0  ;;  %v3170_v18 = vadd.f32 %v3111_v63, %v2822_v2 }
 0x3cf   : > { %v3926_v28 = vpack.c.bf16 %v3901_v10, %v3900_v50  ;;  %v3486_v53 = vadd.f32 %v6329_v42, %v3170_v18  ;;  %v3439_v23 = vpop.f32.mrf.mxu0  ;;  %v7116_v50 = vld [vmem:[#allocation31_spill] sm:$0xff] }
 0x3d0   : > { %v2478_v10 = vadd.f32 %v7116_v50, %v2162_v56 }
 0x3d1   : > { %4572 = vmatmul.msk.bf16.gmra.mxu2 %vm7108_vm14, %v3926_v28  ;;  %v3834_v31 = vadd.f32 %v6331_v37, %v3486_v53  ;;  %v2163_v53 = vadd.f32 %v7118_v22, %v7117_v29 }
 0x3d2   : > { %v2826_v13 = vadd.f32 %v6213_v44, %v2478_v10  ;;  %v7121_v44 = vld [vmem:[#allocation63_spill] sm:$0xff] }
 0x3d3   : > { %v3870_v42 = vadd.f32 %v6202_v38, %v3834_v31  ;;  %v3790_v19 = vpop.f32.mrf.mxu1  ;;  %v7119_v31 = vld [vmem:[#allocation11_spill] sm:$0xff] }
 0x3d4   : > { %v3113_v24 = vpop.f32.mrf.mxu3 }
 0x3d5   : > { %v3171_v27 = vadd.f32 %v3113_v24, %v2823_v36  ;;  %v3902_v54 = vmax.f32 %v3870_v42, 0.0  ;;  %v7122_v42 = vld [vmem:[#allocation85_spill] sm:$0xff] }
 0x3d7   : > { %v3487_v0 = vadd.f32 %v3429_v55, %v3171_v27  ;;  %v3442_v18 = vpop.f32.mrf.mxu0  ;;  %v2479_v27 = vadd.f32 %v7119_v31, %v2163_v53 }
 0x3d9   : > { %v3835_v1 = vadd.f32 %v3777_v14, %v3487_v0  ;;  %v6396_v14 = vpop.f32.mrf.mxu2  ;;  %v4604_v0 = vld [vmem:[%s4767_s8] sm:$0xff]   ;;  %v2827_v52 = vadd.f32 %v6231_v25, %v2479_v27 }
 0x3da   : > { %v4605_v57 = vunpack.c.l.bf16 %v4604_v0 }
 0x3db   : > { %v3871_v32 = vadd.f32 %v6202_v38, %v3835_v1  ;;  %v2164_v1 = vadd.f32 %v7122_v42, %v7121_v44 }
 0x3dc   : > { %v3116_v5 = vpop.f32.mrf.mxu3 }
 0x3dd   : > { %v3903_v37 = vmax.f32 %v3871_v32, 0.0  ;;  %v3172_v48 = vadd.f32 %v3116_v5, %v2824_v62  ;;  %v3792_v5 = vpop.f32.mrf.mxu1  ;;  %v2480_v47 = vadd.f32 %v7123_v30, %v2164_v1 }
 0x3df   : > { %v3927_v55 = vpack.c.bf16 %v3903_v37, %v3902_v54  ;;  %v3488_v40 = vadd.f32 %v3432_v11, %v3172_v48  ;;  %v3444_v58 = vpop.f32.mrf.mxu0 }
 0x3e1   : > { %4573 = vmatmul.msk.bf16.gmra.mxu2 %vm7114_vm9, %v3927_v55  ;;  %v3836_v61 = vadd.f32 %v3780_v35, %v3488_v40  ;;  %v6407_v6 = vpop.f32.mrf.mxu2 }
 0x3e3   : > { %v3872_v28 = vadd.f32 %v6202_v38, %v3836_v61 }
 0x3e4   : > { %v3118_v45 = vpop.f32.mrf.mxu3 }
 0x3e5   : > { %v3173_v2 = vadd.f32 %v3118_v45, %v2825_v15  ;;  %v3904_v43 = vmax.f32 %v3872_v28, 0.0  ;;  %v7124_v15 = vld [vmem:[#allocation4_spill] sm:$0xff]  ;;  %v7125_v45 = vld [vmem:[#allocation87_spill] sm:$0xff]  ;;  %v3795_v22 = vpop.f32.mrf.mxu1 }
 0x3e6   : > { %v2165_v61 = vadd.f32 %v7125_v45, %v7124_v15 }
 0x3e7   : > { %v3489_v63 = vadd.f32 %v3434_v16, %v3173_v2  ;;  %v4606_v2 = vunpack.c.h.bf16 %v4604_v0  ;;  %v3447_v50 = vpop.f32.mrf.mxu0 }
 0x3e9   : > { %v3837_v11 = vadd.f32 %v3782_v7, %v3489_v63  ;;  %v6415_v7 = vld [vmem:[%s6615_s6] ss:$0 sm:$0xff] }
 0x3eb   : > { %v3873_v3 = vadd.f32 %v6202_v38, %v3837_v11 }
 0x3ec   : > { %v3121_v35 = vpop.f32.mrf.mxu3 }
 0x3ed   : > { %v3905_v16 = vmax.f32 %v3873_v3, 0.0  ;;  %v3174_v36 = vadd.f32 %v3121_v35, %v2826_v13  ;;  %v7126_v13 = vld [vmem:[#allocation34_spill] sm:$0xff] }
 0x3ee   : > { %v2481_v35 = vadd.f32 %v7126_v13, %v2165_v61 }
 0x3ef   : > { %v3928_v24 = vpack.c.bf16 %v3905_v16, %v3904_v43  ;;  %v3490_v8 = vadd.f32 %v3437_v9, %v3174_v36  ;;  %v4667_v43 = vld [vmem:[%s4767_s8 + $0x8] sm:$0xff]   ;;  %v7128_v36 = vld [vmem:[#allocation16_spill] sm:$0xff] }
 0x3f0   : > { %v2829_v27 = vadd.f32 %v6264_v21, %v2481_v35  ;;  %v4609_v0 = vunpack.c.l.bf16 %v4667_v43 }
 0x3f1   : > { %4574 = vmatmul.msk.bf16.gmra.mxu2 %vm7120_vm15, %v3928_v24  ;;  %v3838_v54 = vadd.f32 %v3785_v60, %v3490_v8  ;;  %v2166_v24 = vadd.f32 %v7128_v36, %v6098_v49 }
 0x3f3   : > { %v3874_v40 = vadd.f32 %v6202_v38, %v3838_v54 }
 0x3f4   : > { %v3123_v32 = vpop.f32.mrf.mxu3  ;;  %v4065_v62 = vpop.f32.mrf.mxu2 }
 0x3f5   : > { %v3175_v9 = vadd.f32 %v3123_v32, %v2827_v52  ;;  %v4066_v37 = vadd.f32 %v6415_v7, %v4065_v62  ;;  %v3906_v10 = vmax.f32 %v3874_v40, 0.0  ;;  %v7129_v62 = vld [vmem:[#allocation41_spill] sm:$0xff] }
 0x3f6   : > { %v2482_v54 = vadd.f32 %v7129_v62, %v2166_v24 }
 0x3f7   : > { %v3491_v48 = vadd.f32 %v3439_v23, %v3175_v9  ;;  %v4145_v55 = vadd.f32 %v4605_v57, %v4066_v37  ;;  %v2828_v23 = vadd.f32 %v6249_v34, %v2480_v47  ;;  %v3449_v57 = vpop.f32.mrf.mxu0  ;;  %v3797_v9 = vpop.f32.mrf.mxu1 }
 0x3f8   : > { %v2830_v40 = vadd.f32 %v6282_v12, %v2482_v54  ;;  %v7134_v12 = vld [vmem:[#allocation68_spill] sm:$0xff] }
 0x3f9   : > { %v3839_v33 = vadd.f32 %v3787_v4, %v3491_v48  ;;  %v4177_v56 = vmax.f32 %v4145_v55, 0.0  ;;  %v7130_v48 = vld [vmem:[#allocation66_spill] sm:$0xff]  ;;  %v7131_v55 = vld [vmem:[#allocation89_spill] sm:$0xff] }
 0x3fb   : > { %v3875_v25 = vadd.f32 %v6202_v38, %v3839_v33  ;;  %v4209_v60 = vpack.c.bf16 %v4177_v56, %v4177_v56  ;;  %v4610_v33 = vunpack.c.h.bf16 %v4667_v43 }
 0x3fc   : > { %v3126_v4 = vpop.f32.mrf.mxu3  ;;  %v4067_v63 = vpop.f32.mrf.mxu2 }
 0x3fd   : > { %v3907_v28 = vmax.f32 %v3875_v25, 0.0  ;;  %4242 = vst.msk [vmem:[%s6430_s20] sm:$0xf] %vm4241_vm10, %v4209_v60  ;;  %v3176_v11 = vadd.f32 %v3126_v4, %v2828_v23  ;;  %v4068_v29 = vadd.f32 %v6415_v7, %v4067_v63  ;;  %v7132_v23 = vld [vmem:[#allocation14_spill] sm:$0xff]  ;;  %v4668_v4 = vld [vmem:[%s4767_s8 + $0x10] sm:$0xff]  }
 0x3fe   : > { %v4613_v35 = vunpack.c.l.bf16 %v4668_v4  ;;  %v4614_v54 = vunpack.c.h.bf16 %v4668_v4 }
 0x3ff   : > { %v4146_v53 = vadd.f32 %v4606_v2, %v4068_v29  ;;  %v3929_v3 = vpack.c.bf16 %v3907_v28, %v3906_v10  ;;  %v3492_v16 = vadd.f32 %v3442_v18, %v3176_v11  ;;  %v3452_v63 = vpop.f32.mrf.mxu0  ;;  %v7135_v11 = vld [vmem:[#allocation90_spill] sm:$0xff] }
 0x400   : > { %v2168_v29 = vadd.f32 %v7135_v11, %v7134_v12 }
 0x401   : > { %v4178_v34 = vmax.f32 %v4146_v53, 0.0  ;;  %4575 = vmatmul.msk.bf16.gmra.mxu2 %vm7127_vm4, %v3929_v3  ;;  %v3840_v42 = vadd.f32 %v3790_v19, %v3492_v16  ;;  %v2167_v19 = vadd.f32 %v7131_v55, %v7130_v48  ;;  %v3800_v53 = vpop.f32.mrf.mxu1 }
 0x403   : > { %v4210_v31 = vpack.c.bf16 %v4178_v34, %v4178_v34  ;;  %v3876_v49 = vadd.f32 %v6202_v38, %v3840_v42  ;;  %v2483_v2 = vadd.f32 %v7132_v23, %v2167_v19 }
 0x404   : > { %v3128_v8 = vpop.f32.mrf.mxu3  ;;  %v4070_v44 = vpop.f32.mrf.mxu2 }
 0x405   : > { %4243 = vst.msk [vmem:[%s6430_s20 + $0x4] sm:$0xf] %vm4241_vm10, %v4210_v31  ;;  %v3177_v1 = vadd.f32 %v3128_v8, %v2829_v27  ;;  %v4071_v52 = vadd.f32 %v6415_v7, %v4070_v44  ;;  %v3908_v15 = vmax.f32 %v3876_v49, 0.0  ;;  %v2831_v13 = vadd.f32 %v6301_v41, %v2483_v2  ;;  %v7136_v27 = vld [vmem:[#allocation37_spill] sm:$0xff]  ;;  %v7138_v41 = vld [vmem:[#allocation92_spill] sm:$0xff] }
 0x407   : > { %v3493_v18 = vadd.f32 %v3444_v58, %v3177_v1  ;;  %v4147_v32 = vadd.f32 %v4609_v0, %v4071_v52  ;;  %v2484_v0 = vadd.f32 %v7136_v27, %v2168_v29  ;;  %v7137_v1 = vld [vmem:[#allocation6_spill] sm:$0xff]  ;;  %v7143_v29 = vld [vmem:[#allocation45_spill] sm:$0xff] }
 0x408   : > { %v2169_v52 = vadd.f32 %v7138_v41, %v7137_v1 }
 0x409   : > { %v3841_v37 = vadd.f32 %v3792_v5, %v3493_v18  ;;  %v4179_v21 = vmax.f32 %v4147_v32, 0.0  ;;  %v3454_v18 = vpop.f32.mrf.mxu0  ;;  %v2832_v62 = vadd.f32 %v6316_v39, %v2484_v0  ;;  %v7141_v39 = vld [vmem:[#allocation71_spill] sm:$0xff] }
 0x40b   : > { %v3877_v30 = vadd.f32 %v6202_v38, %v3841_v37  ;;  %v4211_v47 = vpack.c.bf16 %v4179_v21, %v4179_v21  ;;  %v3802_v37 = vpop.f32.mrf.mxu1 }
 0x40c   : > { %v3131_v58 = vpop.f32.mrf.mxu3  ;;  %v4072_v56 = vpop.f32.mrf.mxu2 }
 0x40d   : > { %v3909_v45 = vmax.f32 %v3877_v30, 0.0  ;;  %4244 = vst.msk [vmem:[%s6430_s20 + $0x8] sm:$0xf] %vm4241_vm10, %v4211_v47  ;;  %v3178_v61 = vadd.f32 %v3131_v58, %v2830_v40  ;;  %v4073_v5 = vadd.f32 %v6415_v7, %v4072_v56  ;;  %v7139_v47 = vld [vmem:[#allocation39_spill] sm:$0xff] }
 0x40e   : > { %v2485_v40 = vadd.f32 %v7139_v47, %v2169_v52 }
 0x40f   : > { %v4148_v25 = vadd.f32 %v4610_v33, %v4073_v5  ;;  %v3930_v60 = vpack.c.bf16 %v3909_v45, %v3908_v15  ;;  %v3494_v10 = vadd.f32 %v3447_v50, %v3178_v61  ;;  %v4669_v33 = vld [vmem:[%s4767_s8 + $0x18] sm:$0xff]   ;;  %v7142_v15 = vld [vmem:[#allocation93_spill] sm:$0xff] }
 0x410   : > { %v2170_v45 = vadd.f32 %v7142_v15, %v7141_v39  ;;  %v2833_v5 = vadd.f32 %v6336_v17, %v2485_v40 }
 0x411   : > { %v4180_v28 = vmax.f32 %v4148_v25, 0.0  ;;  %4576 = vmatmul.msk.bf16.gmra.mxu2 %vm7133_vm1, %v3930_v60  ;;  %v3842_v34 = vadd.f32 %v3795_v22, %v3494_v10  ;;  %v4617_v25 = vunpack.c.l.bf16 %v4669_v33  ;;  %v3457_v2 = vpop.f32.mrf.mxu0 }
 0x413   : > { %v4212_v3 = vpack.c.bf16 %v4180_v28, %v4180_v28  ;;  %v3878_v8 = vadd.f32 %v6202_v38, %v3842_v34 }
 0x414   : > { %v3133_v43 = vpop.f32.mrf.mxu3  ;;  %v4075_v16 = vpop.f32.mrf.mxu2 }
 0x415   : > { %4245 = vst.msk [vmem:[%s6430_s20 + $0xc] sm:$0xf] %vm4241_vm10, %v4212_v3  ;;  %v3179_v36 = vadd.f32 %v3133_v43, %v2831_v13  ;;  %v4076_v24 = vadd.f32 %v6415_v7, %v4075_v16  ;;  %v3910_v21 = vmax.f32 %v3878_v8, 0.0  ;;  %v2486_v3 = vadd.f32 %v7143_v29, %v2170_v45  ;;  %v7144_v43 = vld [vmem:[#allocation8_spill] sm:$0xff]  ;;  %v7145_v16 = vld [vmem:[#allocation23_spill] sm:$0xff] }
 0x416   : > { %v2171_v34 = vadd.f32 %v7145_v16, %v7144_v43  ;;  %v7153_v43 = vld [vmem:[#allocation56_spill] sm:$0xff] }
 0x417   : > { %v3495_v50 = vadd.f32 %v3449_v57, %v3179_v36  ;;  %v4149_v31 = vadd.f32 %v4613_v35, %v4076_v24  ;;  %v2834_v24 = vadd.f32 %v6351_v20, %v2486_v3 }
 0x419   : > { %v3843_v44 = vadd.f32 %v3797_v9, %v3495_v50  ;;  %v4181_v42 = vmax.f32 %v4149_v31, 0.0  ;;  %v4618_v50 = vunpack.c.h.bf16 %v4669_v33  ;;  %v3459_v1 = vpop.f32.mrf.mxu0 }
 0x41b   : > { %v3879_v22 = vadd.f32 %v6202_v38, %v3843_v44  ;;  %v4213_v32 = vpack.c.bf16 %v4181_v42, %v4181_v42 }
 0x41c   : > { %v3136_v57 = vpop.f32.mrf.mxu3  ;;  %v4077_v49 = vpop.f32.mrf.mxu2 }
 0x41d   : > { %v3911_v48 = vmax.f32 %v3879_v22, 0.0  ;;  %4246 = vst.msk [vmem:[%s6430_s20 + $0x10] sm:$0xf] %vm4241_vm10, %v4213_v32  ;;  %v3180_v9 = vadd.f32 %v3136_v57, %v2832_v62  ;;  %v4078_v55 = vadd.f32 %v6415_v7, %v4077_v49  ;;  %v4670_v32 = vld [vmem:[%s4767_s8 + $0x20] sm:$0xff]   ;;  %v7149_v49 = vld [vmem:[#allocation95_spill] sm:$0xff] }
 0x41e   : > { %v7148_v57 = vld [vmem:[#allocation73_spill] sm:$0xff] }
 0x41f   : > { %v4150_v19 = vadd.f32 %v4614_v54, %v4078_v55  ;;  %v3931_v30 = vpack.c.bf16 %v3911_v48, %v3910_v21  ;;  %v3496_v58 = vadd.f32 %v3452_v63, %v3180_v9  ;;  %v3805_v63 = vpop.f32.mrf.mxu1  ;;  %v4621_v9 = vunpack.c.l.bf16 %v4670_v32 }
 0x421   : > { %v4182_v56 = vmax.f32 %v4150_v19, 0.0  ;;  %4577 = vmatmul.msk.bf16.gmra.mxu2 %vm7140_vm3, %v3931_v30  ;;  %v3844_v4 = vadd.f32 %v3800_v53, %v3496_v58  ;;  %v3462_v15 = vpop.f32.mrf.mxu0 }
 0x423   : > { %v4214_v61 = vpack.c.bf16 %v4182_v56, %v4182_v56  ;;  %v3880_v13 = vadd.f32 %v6202_v38, %v3844_v4  ;;  %v7150_v56 = vld [vmem:[#allocation51_spill] sm:$0xff] }
 0x424   : > { %v3138_v60 = vpop.f32.mrf.mxu3  ;;  %v4080_v23 = vpop.f32.mrf.mxu2 }
 0x425   : > { %4247 = vst.msk [vmem:[%s6430_s20 + $0x14] sm:$0xf] %vm4241_vm10, %v4214_v61  ;;  %v3181_v10 = vadd.f32 %v3138_v60, %v2833_v5  ;;  %v4081_v28 = vadd.f32 %v6415_v7, %v4080_v23  ;;  %v3912_v0 = vmax.f32 %v3880_v13, 0.0 }
 0x427   : > { %v3497_v12 = vadd.f32 %v3454_v18, %v3181_v10  ;;  %v4151_v11 = vadd.f32 %v4617_v25, %v4081_v28  ;;  %v7146_v18 = vld [vmem:[#allocation46_spill] sm:$0xff]  ;;  %v3807_v62 = vpop.f32.mrf.mxu1  ;;  %v7152_v25 = vld [vmem:[#allocation5_spill] sm:$0xff]  ;;  %v4622_v28 = vunpack.c.h.bf16 %v4670_v32  ;;  %v7156_v32 = vld [vmem:[#allocation55_spill] sm:$0xff] }
 0x428   : > { %v2487_v22 = vadd.f32 %v7146_v18, %v2171_v34  ;;  %v4671_v34 = vld [vmem:[%s4767_s8 + $0x28] sm:$0xff]  }
 0x429   : > { %v3845_v35 = vadd.f32 %v3802_v37, %v3497_v12  ;;  %v4183_v17 = vmax.f32 %v4151_v11, 0.0  ;;  %v2172_v37 = vadd.f32 %v7149_v49, %v7148_v57  ;;  %v7158_v57 = vld [vmem:[#allocation96_spill] sm:$0xff] }
 0x42a   : > { %v2835_v48 = vadd.f32 %v6365_v26, %v2487_v22  ;;  %v7151_v26 = vld [vmem:[#allocation75_spill] sm:$0xff] }
 0x42b   : > { %v3881_v53 = vadd.f32 %v6202_v38, %v3845_v35  ;;  %v4215_v36 = vpack.c.bf16 %v4183_v17, %v4183_v17  ;;  %v2488_v39 = vadd.f32 %v7150_v56, %v2172_v37  ;;  %v2173_v60 = vadd.f32 %v7152_v25, %v7151_v26 }
 0x42c   : > { %v3141_v31 = vpop.f32.mrf.mxu3  ;;  %v4082_v27 = vpop.f32.mrf.mxu2 }
 0x42d   : > { %v3913_v8 = vmax.f32 %v3881_v53, 0.0  ;;  %4248 = vst.msk [vmem:[%s6430_s20 + $0x18] sm:$0xf] %vm4241_vm10, %v4215_v36  ;;  %v3182_v44 = vadd.f32 %v3141_v31, %v2834_v24  ;;  %v4083_v42 = vadd.f32 %v6415_v7, %v4082_v27  ;;  %v2836_v10 = vadd.f32 %v6377_v46, %v2488_v39  ;;  %v3464_v46 = vpop.f32.mrf.mxu0  ;;  %v7155_v24 = vld [vmem:[#allocation30_spill] sm:$0xff] }
 0x42e   : > { %v2489_v16 = vadd.f32 %v7153_v43, %v2173_v60 }
 0x42f   : > { %v4152_v41 = vadd.f32 %v4618_v50, %v4083_v42  ;;  %v3932_v52 = vpack.c.bf16 %v3913_v8, %v3912_v0  ;;  %v3498_v54 = vadd.f32 %v3457_v2, %v3182_v44  ;;  %v3810_v23 = vpop.f32.mrf.mxu1  ;;  %v2174_v50 = vadd.f32 %v7155_v24, %v6167_v59 }
 0x430   : > { %v2837_v27 = vadd.f32 %v6387_v51, %v2489_v16  ;;  %v4625_v0 = vunpack.c.l.bf16 %v4671_v34  ;;  %v7157_v51 = vld [vmem:[#allocation12_spill] sm:$0xff] }
 0x431   : > { %v4184_v20 = vmax.f32 %v4152_v41, 0.0  ;;  %4578 = vmatmul.msk.bf16.gmra.mxu2 %vm7147_vm12, %v3932_v52  ;;  %v3846_v30 = vadd.f32 %v3805_v63, %v3498_v54  ;;  %v2175_v49 = vadd.f32 %v7158_v57, %v7157_v51 }
 0x433   : > { %v4216_v21 = vpack.c.bf16 %v4184_v20, %v4184_v20  ;;  %v3882_v45 = vadd.f32 %v6202_v38, %v3846_v30 }
 0x434   : > { %v3143_v55 = vpop.f32.mrf.mxu3  ;;  %v4085_v19 = vpop.f32.mrf.mxu2 }
 0x435   : > { %4249 = vst.msk [vmem:[%s6430_s20 + $0x1c] sm:$0xf] %vm4241_vm10, %v4216_v21  ;;  %v3183_v47 = vadd.f32 %v3143_v55, %v2835_v48  ;;  %v4086_v40 = vadd.f32 %v6415_v7, %v4085_v19  ;;  %v3914_v11 = vmax.f32 %v3882_v45, 0.0  ;;  %v3467_v48 = vpop.f32.mrf.mxu0  ;;  %v4626_v55 = vunpack.c.h.bf16 %v4671_v34 }
 0x437   : > { %v3499_v33 = vadd.f32 %v3459_v1, %v3183_v47  ;;  %v4153_v58 = vadd.f32 %v4621_v9, %v4086_v40  ;;  %v3812_v52 = vpop.f32.mrf.mxu1 }
 0x439   : > { %v3847_v61 = vadd.f32 %v3807_v62, %v3499_v33  ;;  %v4185_v5 = vmax.f32 %v4153_v58, 0.0  ;;  %v2490_v62 = vadd.f32 %v7156_v32, %v2174_v50 }
 0x43b   : > { %v3883_v2 = vadd.f32 %v6202_v38, %v3847_v61  ;;  %v4217_v4 = vpack.c.bf16 %v4185_v5, %v4185_v5  ;;  %v2838_v9 = vadd.f32 %v6396_v14, %v2490_v62  ;;  %v4672_v61 = vld [vmem:[%s4767_s8 + $0x30] sm:$0xff]  }
 0x43c   : > { %v3146_v63 = vpop.f32.mrf.mxu3  ;;  %v4087_v12 = vpop.f32.mrf.mxu2  ;;  %v4629_v60 = vunpack.c.l.bf16 %v4672_v61  ;;  %v4630_v16 = vunpack.c.h.bf16 %v4672_v61 }
 0x43d   : > { %v3915_v29 = vmax.f32 %v3883_v2, 0.0  ;;  %4250 = vst.msk [vmem:[%s6430_s20 + $0x20] sm:$0xf] %vm4241_vm10, %v4217_v4  ;;  %v3184_v3 = vadd.f32 %v3146_v63, %v2836_v10  ;;  %v4088_v13 = vadd.f32 %v6415_v7, %v4087_v12  ;;  %v3469_v63 = vpop.f32.mrf.mxu0 }
 0x43f   : > { %v4154_v35 = vadd.f32 %v4622_v28, %v4088_v13  ;;  %v3933_v17 = vpack.c.bf16 %v3915_v29, %v3914_v11  ;;  %v3500_v53 = vadd.f32 %v3462_v15, %v3184_v3  ;;  %v3815_v56 = vpop.f32.mrf.mxu1  ;;  %v4698_v3 = vld [vmem:[%s6613_s4] ss:$0 sm:$0xff] }
 0x441   : > { %v4186_v36 = vmax.f32 %v4154_v35, 0.0  ;;  %4579 = vmatmul.msk.bf16.gmra.mxu2 %vm7154_vm11, %v3933_v17  ;;  %v3848_v42 = vadd.f32 %v3810_v23, %v3500_v53 }
 0x443   : > { %v4218_v31 = vpack.c.bf16 %v4186_v36, %v4186_v36  ;;  %v3884_v59 = vadd.f32 %v6202_v38, %v3848_v42 }
 0x444   : > { %v3148_v8 = vpop.f32.mrf.mxu3  ;;  %v4090_v44 = vpop.f32.mrf.mxu2 }
 0x445   : > { %4251 = vst.msk [vmem:[%s6430_s20 + $0x24] sm:$0xf] %vm4241_vm10, %v4218_v31  ;;  %v3185_v1 = vadd.f32 %v3148_v8, %v2837_v27  ;;  %v4091_v41 = vadd.f32 %v6415_v7, %v4090_v44  ;;  %v3916_v47 = vmax.f32 %v3884_v59, 0.0  ;;  %v4673_v31 = vld [vmem:[%s4767_s8 + $0x38] sm:$0xff]   ;;  %v4674_v59 = vld [vmem:[%s4767_s8 + $0x40] sm:$0xff]  }
 0x446   : > { %v4633_v8 = vunpack.c.l.bf16 %v4673_v31  ;;  %v4637_v51 = vunpack.c.l.bf16 %v4674_v59 }
 0x447   : > { %v3501_v18 = vadd.f32 %v3464_v46, %v3185_v1  ;;  %v4155_v22 = vadd.f32 %v4625_v0, %v4091_v41  ;;  %v3817_v29 = vpop.f32.mrf.mxu1 }
 0x449   : > { %v3849_v54 = vadd.f32 %v3812_v52, %v3501_v18  ;;  %v4187_v20 = vmax.f32 %v4155_v22, 0.0  ;;  %v4634_v18 = vunpack.c.h.bf16 %v4673_v31 }
 0x44b   : > { %v3885_v37 = vadd.f32 %v6202_v38, %v3849_v54  ;;  %v4219_v21 = vpack.c.bf16 %v4187_v20, %v4187_v20  ;;  %v7159_v38 = vld [vmem:[#allocation3_spill] sm:$0xff] }
 0x44c   : > { %v3151_v19 = vpop.f32.mrf.mxu3  ;;  %v4092_v30 = vpop.f32.mrf.mxu2  ;;  %v2491_v45 = vadd.f32 %v7159_v38, %v2175_v49 }
 0x44d   : > { %v3917_v40 = vmax.f32 %v3885_v37, 0.0  ;;  %4252 = vst.msk [vmem:[%s6430_s20 + $0x28] sm:$0xf] %vm4241_vm10, %v4219_v21  ;;  %v3186_v33 = vadd.f32 %v3151_v19, %v2838_v9  ;;  %v4093_v58 = vadd.f32 %v6415_v7, %v4092_v30  ;;  %v4638_v9 = vunpack.c.h.bf16 %v4674_v59 }
 0x44e   : > { %v2839_v25 = vadd.f32 %v6407_v6, %v2491_v45 }
 0x44f   : > { %v4156_v39 = vadd.f32 %v4626_v55, %v4093_v58  ;;  %v3934_v15 = vpack.c.bf16 %v3917_v40, %v3916_v47  ;;  %v3502_v5 = vadd.f32 %v3467_v48, %v3186_v33  ;;  %v4675_v47 = vld [vmem:[%s4767_s8 + $0x48] sm:$0xff]  }
 0x450   : > { %v4641_v58 = vunpack.c.l.bf16 %v4675_v47  ;;  %v4642_v61 = vunpack.c.h.bf16 %v4675_v47 }
 0x451   : > { %v4188_v26 = vmax.f32 %v4156_v39, 0.0  ;;  %4580 = vmatmul.msk.bf16.gmra.mxu2 %vm7160_vm7, %v3934_v15  ;;  %v3850_v4 = vadd.f32 %v3815_v56, %v3502_v5 }
 0x453   : > { %v4220_v14 = vpack.c.bf16 %v4188_v26, %v4188_v26  ;;  %v3886_v6 = vadd.f32 %v4698_v3, %v3850_v4 }
 0x454   : > { %v3153_v23 = vpop.f32.mrf.mxu3  ;;  %v4095_v2 = vpop.f32.mrf.mxu2 }
 0x455   : > { %4253 = vst.msk [vmem:[%s6430_s20 + $0x2c] sm:$0xf] %vm4241_vm10, %v4220_v14  ;;  %v3187_v10 = vadd.f32 %v3153_v23, %v2839_v25  ;;  %v4096_v28 = vadd.f32 %v6415_v7, %v4095_v2  ;;  %v3918_v53 = vmax.f32 %v3886_v6, 0.0  ;;  %v4676_v25 = vld [vmem:[%s4767_s8 + $0x50] sm:$0xff]  }
 0x456   : > { %v4645_v2 = vunpack.c.l.bf16 %v4676_v25 }
 0x457   : > { %v3503_v12 = vadd.f32 %v3469_v63, %v3187_v10  ;;  %v4157_v11 = vadd.f32 %v4629_v60, %v4096_v28 }
 0x459   : > { %v3851_v13 = vadd.f32 %v3817_v29, %v3503_v12  ;;  %v4189_v35 = vmax.f32 %v4157_v11, 0.0  ;;  %v4646_v11 = vunpack.c.h.bf16 %v4676_v25 }
 0x45b   : > { %v3887_v17 = vadd.f32 %v4698_v3, %v3851_v13  ;;  %v4221_v43 = vpack.c.bf16 %v4189_v35, %v4189_v35  ;;  %v4677_v13 = vld [vmem:[%s4767_s8 + $0x58] sm:$0xff]  }
 0x45c   : > { %v4097_v34 = vpop.f32.mrf.mxu2 }
 0x45d   : > { %v3919_v36 = vmax.f32 %v3887_v17, 0.0  ;;  %4254 = vst.msk [vmem:[%s6430_s20 + $0x30] sm:$0xf] %vm4241_vm10, %v4221_v43  ;;  %v4098_v46 = vadd.f32 %v6415_v7, %v4097_v34  ;;  %v4649_v43 = vunpack.c.l.bf16 %v4677_v13 }
 0x45f   : > { %v4158_v24 = vadd.f32 %v4630_v16, %v4098_v46  ;;  %v3935_v50 = vpack.c.bf16 %v3919_v36, %v3918_v53 }
 0x461   : > { %v4190_v27 = vmax.f32 %v4158_v24, 0.0  ;;  %4581 = vmatmul.msk.bf16.gmra.mxu2 %vm7161_vm8, %v3935_v50  ;;  %v4650_v24 = vunpack.c.h.bf16 %v4677_v13 }
 0x463   : > { %v4222_v0 = vpack.c.bf16 %v4190_v27, %v4190_v27 }
 0x464   : > { %v4100_v44 = vpop.f32.mrf.mxu2 }
 0x465   : > { %4255 = vst.msk [vmem:[%s6430_s20 + $0x34] sm:$0xf] %vm4241_vm10, %v4222_v0  ;;  %v4101_v42 = vadd.f32 %v6415_v7, %v4100_v44  ;;  %v4678_v0 = vld [vmem:[%s4767_s8 + $0x60] sm:$0xff]  }
 0x467   : > { %v4159_v1 = vadd.f32 %v4633_v8, %v4101_v42  ;;  %v4653_v42 = vunpack.c.l.bf16 %v4678_v0 }
 0x469   : > { %v4191_v41 = vmax.f32 %v4159_v1, 0.0 }
 0x46b   : > { %v4223_v52 = vpack.c.bf16 %v4191_v41, %v4191_v41 }
 0x46c   : > { %v4102_v22 = vpop.f32.mrf.mxu2 }
 0x46d   : > { %4256 = vst.msk [vmem:[%s6430_s20 + $0x38] sm:$0xf] %vm4241_vm10, %v4223_v52  ;;  %v4103_v32 = vadd.f32 %v6415_v7, %v4102_v22 }
 0x46f   : > { %v4160_v62 = vadd.f32 %v4634_v18, %v4103_v32  ;;  %v4654_v32 = vunpack.c.h.bf16 %v4678_v0 }
 0x471   : > { %v4192_v54 = vmax.f32 %v4160_v62, 0.0 }
 0x473   : > { %v4224_v20 = vpack.c.bf16 %v4192_v54, %v4192_v54 }
 0x474   : > { %v4105_v57 = vpop.f32.mrf.mxu2 }
 0x475   : > { %4257 = vst.msk [vmem:[%s6430_s20 + $0x3c] sm:$0xf] %vm4241_vm10, %v4224_v20  ;;  %v4106_v49 = vadd.f32 %v6415_v7, %v4105_v57  ;;  %v4679_v20 = vld [vmem:[%s4767_s8 + $0x68] sm:$0xff]  }
 0x477   : > { %v4161_v37 = vadd.f32 %v4637_v51, %v4106_v49  ;;  %v4657_v49 = vunpack.c.l.bf16 %v4679_v20 }
 0x479   : > { %v4193_v21 = vmax.f32 %v4161_v37, 0.0 }
 0x47b   : > { %v4225_v48 = vpack.c.bf16 %v4193_v21, %v4193_v21 }
 0x47c   : > { %v4107_v55 = vpop.f32.mrf.mxu2 }
 0x47d   : > { %4258 = vst.msk [vmem:[%s6430_s20 + $0x40] sm:$0xf] %vm4241_vm10, %v4225_v48  ;;  %v4108_v19 = vadd.f32 %v6415_v7, %v4107_v55 }
 0x47f   : > { %v4162_v30 = vadd.f32 %v4638_v9, %v4108_v19  ;;  %v4658_v19 = vunpack.c.h.bf16 %v4679_v20 }
 0x481   : > { %v4194_v40 = vmax.f32 %v4162_v30, 0.0 }
 0x483   : > { %v4226_v33 = vpack.c.bf16 %v4194_v40, %v4194_v40 }
 0x484   : > { %v4110_v56 = vpop.f32.mrf.mxu2 }
 0x485   : > { %4259 = vst.msk [vmem:[%s6430_s20 + $0x44] sm:$0xf] %vm4241_vm10, %v4226_v33  ;;  %v4111_v39 = vadd.f32 %v6415_v7, %v4110_v56  ;;  %v4680_v33 = vld [vmem:[%s4767_s8 + $0x70] sm:$0xff]  }
 0x487   : > { %v4163_v15 = vadd.f32 %v4641_v58, %v4111_v39  ;;  %v4661_v39 = vunpack.c.l.bf16 %v4680_v33 }
 0x489   : > { %v4195_v38 = vmax.f32 %v4163_v15, 0.0 }
 0x48b   : > { %v4227_v45 = vpack.c.bf16 %v4195_v38, %v4195_v38 }
 0x48c   : > { %v4112_v5 = vpop.f32.mrf.mxu2 }
 0x48d   : > { %4260 = vst.msk [vmem:[%s6430_s20 + $0x48] sm:$0xf] %vm4241_vm10, %v4227_v45  ;;  %v4113_v26 = vadd.f32 %v6415_v7, %v4112_v5 }
 0x48f   : > { %v4164_v14 = vadd.f32 %v4642_v61, %v4113_v26  ;;  %v4662_v26 = vunpack.c.h.bf16 %v4680_v33 }
 0x491   : > { %v4196_v60 = vmax.f32 %v4164_v14, 0.0 }
 0x493   : > { %v4228_v23 = vpack.c.bf16 %v4196_v60, %v4196_v60 }
 0x494   : > { %v4115_v4 = vpop.f32.mrf.mxu2 }
 0x495   : > { %4261 = vst.msk [vmem:[%s6430_s20 + $0x4c] sm:$0xf] %vm4241_vm10, %v4228_v23  ;;  %v4116_v10 = vadd.f32 %v6415_v7, %v4115_v4  ;;  %v4681_v23 = vld [vmem:[%s4767_s8 + $0x78] sm:$0xff]  }
 0x497   : > { %v4165_v28 = vadd.f32 %v4645_v2, %v4116_v10  ;;  %v4665_v10 = vunpack.c.l.bf16 %v4681_v23 }
 0x499   : > { %v4197_v63 = vmax.f32 %v4165_v28, 0.0 }
 0x49b   : > { %v4229_v12 = vpack.c.bf16 %v4197_v63, %v4197_v63 }
 0x49c   : > { %v4117_v29 = vpop.f32.mrf.mxu2 }
 0x49d   : > { %4262 = vst.msk [vmem:[%s6430_s20 + $0x50] sm:$0xf] %vm4241_vm10, %v4229_v12  ;;  %v4118_v3 = vadd.f32 %v6415_v7, %v4117_v29 }
 0x49f   : > { %v4166_v6 = vadd.f32 %v4646_v11, %v4118_v3  ;;  %v4666_v3 = vunpack.c.h.bf16 %v4681_v23 }
 0x4a1   : > { %v4198_v35 = vmax.f32 %v4166_v6, 0.0 }
 0x4a3   : > { %v4230_v17 = vpack.c.bf16 %v4198_v35, %v4198_v35 }
 0x4a4   : > { %v4120_v16 = vpop.f32.mrf.mxu2 }
 0x4a5   : > { %4263 = vst.msk [vmem:[%s6430_s20 + $0x54] sm:$0xf] %vm4241_vm10, %v4230_v17  ;;  %v4121_v34 = vadd.f32 %v6415_v7, %v4120_v16 }
 0x4a7   : > { %v4167_v53 = vadd.f32 %v4649_v43, %v4121_v34 }
 0x4a9   : > { %v4199_v36 = vmax.f32 %v4167_v53, 0.0 }
 0x4ab   : > { %v4231_v46 = vpack.c.bf16 %v4199_v36, %v4199_v36 }
 0x4ac   : > { %v4122_v50 = vpop.f32.mrf.mxu2 }
 0x4ad   : > { %4264 = vst.msk [vmem:[%s6430_s20 + $0x58] sm:$0xf] %vm4241_vm10, %v4231_v46  ;;  %v4123_v31 = vadd.f32 %v6415_v7, %v4122_v50 }
 0x4af   : > { %v4168_v27 = vadd.f32 %v4650_v24, %v4123_v31 }
 0x4b1   : > { %v4200_v8 = vmax.f32 %v4168_v27, 0.0 }
 0x4b3   : > { %v4232_v44 = vpack.c.bf16 %v4200_v8, %v4200_v8 }
 0x4b4   : > { %v4125_v1 = vpop.f32.mrf.mxu2 }
 0x4b5   : > { %4265 = vst.msk [vmem:[%s6430_s20 + $0x5c] sm:$0xf] %vm4241_vm10, %v4232_v44  ;;  %v4126_v41 = vadd.f32 %v6415_v7, %v4125_v1 }
 0x4b7   : > { %v4169_v52 = vadd.f32 %v4653_v42, %v4126_v41 }
 0x4b9   : > { %v4201_v18 = vmax.f32 %v4169_v52, 0.0 }
 0x4bb   : > { %v4233_v22 = vpack.c.bf16 %v4201_v18, %v4201_v18 }
 0x4bc   : > { %v4127_v62 = vpop.f32.mrf.mxu2 }
 0x4bd   : > { %4266 = vst.msk [vmem:[%s6430_s20 + $0x60] sm:$0xf] %vm4241_vm10, %v4233_v22  ;;  %v4128_v59 = vadd.f32 %v6415_v7, %v4127_v62 }
 0x4bf   : > { %v4170_v54 = vadd.f32 %v4654_v32, %v4128_v59 }
 0x4c1   : > { %v4202_v51 = vmax.f32 %v4170_v54, 0.0 }
 0x4c3   : > { %v4234_v57 = vpack.c.bf16 %v4202_v51, %v4202_v51 }
 0x4c4   : > { %v4130_v37 = vpop.f32.mrf.mxu2 }
 0x4c5   : > { %4267 = vst.msk [vmem:[%s6430_s20 + $0x64] sm:$0xf] %vm4241_vm10, %v4234_v57  ;;  %v4131_v21 = vadd.f32 %v6415_v7, %v4130_v37 }
 0x4c7   : > { %v4171_v48 = vadd.f32 %v4657_v49, %v4131_v21 }
 0x4c9   : > { %v4203_v9 = vmax.f32 %v4171_v48, 0.0 }
 0x4cb   : > { %v4235_v55 = vpack.c.bf16 %v4203_v9, %v4203_v9 }
 0x4cc   : > { %v4132_v30 = vpop.f32.mrf.mxu2 }
 0x4cd   : > { %4268 = vst.msk [vmem:[%s6430_s20 + $0x68] sm:$0xf] %vm4241_vm10, %v4235_v55  ;;  %v4133_v47 = vadd.f32 %v6415_v7, %v4132_v30 }
 0x4cf   : > { %v4172_v40 = vadd.f32 %v4658_v19, %v4133_v47 }
 0x4d1   : > { %v4204_v58 = vmax.f32 %v4172_v40, 0.0 }
 0x4d3   : > { %v4236_v56 = vpack.c.bf16 %v4204_v58, %v4204_v58 }
 0x4d4   : > { %v4135_v15 = vpop.f32.mrf.mxu2 }
 0x4d5   : > { %4269 = vst.msk [vmem:[%s6430_s20 + $0x6c] sm:$0xf] %vm4241_vm10, %v4236_v56  ;;  %v4136_v38 = vadd.f32 %v6415_v7, %v4135_v15 }
 0x4d7   : > { %v4173_v45 = vadd.f32 %v4661_v39, %v4136_v38 }
 0x4d9   : > { %v4205_v61 = vmax.f32 %v4173_v45, 0.0 }
 0x4db   : > { %v4237_v5 = vpack.c.bf16 %v4205_v61, %v4205_v61 }
 0x4dc   : > { %v4137_v14 = vpop.f32.mrf.mxu2 }
 0x4dd   : > { %4270 = vst.msk [vmem:[%s6430_s20 + $0x70] sm:$0xf] %vm4241_vm10, %v4237_v5  ;;  %v4138_v25 = vadd.f32 %v6415_v7, %v4137_v14 }
 0x4df   : > { %v4174_v60 = vadd.f32 %v4662_v26, %v4138_v25 }
 0x4e1   : > { %v4206_v2 = vmax.f32 %v4174_v60, 0.0 }
 0x4e3   : > { %v4238_v4 = vpack.c.bf16 %v4206_v2, %v4206_v2 }
 0x4e4   : > { %v4140_v28 = vpop.f32.mrf.mxu2 }
 0x4e5   : > { %4271 = vst.msk [vmem:[%s6430_s20 + $0x74] sm:$0xf] %vm4241_vm10, %v4238_v4  ;;  %v4141_v63 = vadd.f32 %v6415_v7, %v4140_v28 }
 0x4e7   : > { %v4175_v12 = vadd.f32 %v4665_v10, %v4141_v63 }
 0x4e9   : > { %v4207_v11 = vmax.f32 %v4175_v12, 0.0 }
 0x4eb   : > { %v4239_v29 = vpack.c.bf16 %v4207_v11, %v4207_v11 }
 0x4ec   : > { %v4142_v6 = vpop.f32.mrf.mxu2 }
 0x4ed   : > { %4272 = vst.msk [vmem:[%s6430_s20 + $0x78] sm:$0xf] %vm4241_vm10, %v4239_v29  ;;  %v4143_v13 = vadd.f32 %v6415_v7, %v4142_v6 }
 0x4ef   : > { %v4176_v35 = vadd.f32 %v4666_v3, %v4143_v13 }
 0x4f1   : > { %v4208_v17 = vmax.f32 %v4176_v35, 0.0 }
 0x4f3   : > { %v4240_v43 = vpack.c.bf16 %v4208_v17, %v4208_v17 }
 0x4f5   : > { %4273 = vst.msk [vmem:[%s6430_s20 + $0x7c] sm:$0xf] %vm4241_vm10, %v4240_v43 }
 0x4f6 PF: > { %s17_s24 = sadd.s32 1, %s4705_s24  }
 0x4f7   : > { %p14_p4 = scmp.ge.s32.totalorder %s17_s24, 4  }
 0x4f9   :  { %16 = sbr.rel (!%p14_p4) target bundleno = 1 (0x1), region = 78 }

</bundles_post_ra>
